<compile_context>
chip_gen: v5e
topology: v5e:2x2
jax: 0.10.0
libtpu: 0.0.40
codegen_flags: <defaults>
</compile_context>

<pallas_src>
import functools

import jax
import jax.numpy as jnp
from jax.experimental import pallas as pl
from jax.experimental.pallas import tpu as pltpu

# ----------------------------- hyperparameters ------------------------------
INPUT_SIZE = 4             # Conv1d in_channels
NUM_FILTERS = 8            # conv2 outputs 2 * NUM_FILTERS = 16 channels
KERNEL_SIZE = 7
UNITS = 32                 # lstm1 hidden; lstm2 hidden = UNITS // 2
SEQ_LEN = 8
BATCH = 2
BN_EPS = 1e-5


# ------------------------- in-kernel building blocks -------------------------
def _conv_bn(x, w_ref, scale_ref, shift_ref, *, B, relu):
    """Conv1d('same') + eval-mode BatchNorm (+optional ReLU).

    x: (T*B, Cin) value, rows ordered t*B + b (time-major, batch-minor).
    w_ref: (K, Cin, Cout) taps.  scale/shift: (1, Cout) with conv bias folded.
    Returns (T*B, Cout).
    """
    TB, _ = x.shape
    K, _, cout = w_ref.shape
    pad = (K // 2) * B
    z = jnp.zeros((pad, x.shape[1]), jnp.float32)
    xp = jnp.concatenate([z, x, z], axis=0)           # ((T+K-1)*B, Cin)
    acc = jnp.zeros((TB, cout), jnp.float32)
    for k in range(K):                                # K small MXU pushes, no batch loop
        acc = acc + jnp.dot(xp[k * B:k * B + TB, :], w_ref[k],
                            preferred_element_type=jnp.float32)
    y = acc * scale_ref[...] + shift_ref[...]
    return jnp.maximum(y, 0.0) if relu else y


def _bilstm(gx, whh_f, whh_b, *, T, B, H):
    """Both directions of a bidirectional LSTM in one (unrolled) loop.

    gx: (T*B, 8H) precomputed input-gate preactivations (+bias), columns
        [fwd i f g o | bwd i f g o], rows ordered t*B + b.
    whh_f / whh_b: (H, 4H) recurrent weights.
    Returns (yf, yb): each (T*B, H), rows ordered by original time t*B + b.
    """
    h = jnp.zeros((2 * B, H), jnp.float32)            # [fwd rows | bwd rows]
    c = jnp.zeros((2 * B, H), jnp.float32)
    ys_f = [None] * T
    ys_b = [None] * T
    for t in range(T):                                # static unroll (T == 8)
        rt = T - 1 - t                                # bwd direction reads reversed time
        gx_t = jnp.concatenate(
            [gx[t * B:(t + 1) * B, 0:4 * H],
             gx[rt * B:(rt + 1) * B, 4 * H:8 * H]], axis=0)          # (2B, 4H)
        gh = jnp.concatenate(
            [jnp.dot(h[0:B], whh_f, preferred_element_type=jnp.float32),
             jnp.dot(h[B:2 * B], whh_b, preferred_element_type=jnp.float32)],
            axis=0)                                                  # (2B, 4H)
        gates = gx_t + gh
        s = jax.nn.sigmoid(gates)                     # one EUP pass for i, f, o
        g = jnp.tanh(gates[:, 2 * H:3 * H])           # torch gate order: i, f, g, o
        c = s[:, H:2 * H] * c + s[:, 0:H] * g
        h = s[:, 3 * H:4 * H] * jnp.tanh(c)
        ys_f[t] = h[0:B]
        ys_b[rt] = h[B:2 * B]
    return jnp.concatenate(ys_f, axis=0), jnp.concatenate(ys_b, axis=0)


# ------------------------------- fused kernel --------------------------------
def _fused_kernel(x_ref, w1_ref, s1_ref, t1_ref, w2_ref, s2_ref, t2_ref,
                  wih1_ref, b1_ref, whh1f_ref, whh1b_ref,
                  wih2_ref, b2_ref, whh2f_ref, whh2b_ref,
                  out_ref, *, T, B):
    U1 = whh1f_ref.shape[0]
    U2 = whh2f_ref.shape[0]

    # ----- CNN: Conv1d+BN, Conv1d+BN+ReLU (Dropout = identity in eval) -----
    a = _conv_bn(x_ref[...], w1_ref, s1_ref, t1_ref, B=B, relu=False)   # (T*B, NF)
    a = _conv_bn(a, w2_ref, s2_ref, t2_ref, B=B, relu=True)             # (T*B, 2NF)

    # ----- BiLSTM 1: one matmul precomputes input gates for both dirs -----
    gx1 = jnp.dot(a, wih1_ref[...],
                  preferred_element_type=jnp.float32) + b1_ref[...]     # (T*B, 8*U1)
    yf1, yb1 = _bilstm(gx1, whh1f_ref[...], whh1b_ref[...], T=T, B=B, H=U1)

    # ----- BiLSTM 2: split wih2 rows so no feature concat is needed -----
    wih2 = wih2_ref[...]                                                # (2*U1, 8*U2)
    gx2 = (jnp.dot(yf1, wih2[0:U1], preferred_element_type=jnp.float32)
           + jnp.dot(yb1, wih2[U1:2 * U1], preferred_element_type=jnp.float32)
           + b2_ref[...])                                               # (T*B, 8*U2)
    yf2, yb2 = _bilstm(gx2, whh2f_ref[...], whh2b_ref[...], T=T, B=B, H=U2)

    # ----- last time step, torch ordering [fwd | bwd]; dropout2 = identity -----
    out_ref[...] = jnp.concatenate(
        [yf2[(T - 1) * B:T * B], yb2[(T - 1) * B:T * B]], axis=-1)      # (B, 2*U2)


# --------------------------------- wrapper -----------------------------------
@jax.jit
def cnn_lstm_block(params, x):
    """x: (B, T, input_size) batch-first, like the PyTorch module."""
    B, T, Cin = x.shape
    U1 = params['lstm1_f']['whh'].shape[0]
    U2 = params['lstm2_f']['whh'].shape[0]

    # time-major, flattened (t*B + b) layout for the kernel (tiny one-off op).
    x2d = jnp.transpose(x.astype(jnp.float32), (1, 0, 2)).reshape(T * B, Cin)

    # Fold conv bias into the eval-mode BatchNorm affine (exact algebra).
    s1 = params['bn1_scale']
    t1 = params['bn1_shift'] + s1 * params['conv1_b']
    s2 = params['bn2_scale']
    t2 = params['bn2_shift'] + s2 * params['conv2_b']

    # Pack both LSTM directions' input weights column-wise: [fwd ifgo | bwd ifgo].
    wih1 = jnp.concatenate([params['lstm1_f']['wih'], params['lstm1_b']['wih']], axis=1)
    b1 = jnp.concatenate([params['lstm1_f']['b'], params['lstm1_b']['b']])[None, :]
    wih2 = jnp.concatenate([params['lstm2_f']['wih'], params['lstm2_b']['wih']], axis=1)
    b2 = jnp.concatenate([params['lstm2_f']['b'], params['lstm2_b']['b']])[None, :]

    vmem = pl.BlockSpec(memory_space=pltpu.MemorySpace.VMEM)
    kernel = functools.partial(_fused_kernel, T=T, B=B)
    return pl.pallas_call(
        kernel,
        out_shape=jax.ShapeDtypeStruct((B, 2 * U2), jnp.float32),
        in_specs=[vmem] * 15,
        out_specs=vmem,
    )(x2d,
      params['conv1_w'], s1[None, :], t1[None, :],
      params['conv2_w'], s2[None, :], t2[None, :],
      wih1, b1, params['lstm1_f']['whh'], params['lstm1_b']['whh'],
      wih2, b2, params['lstm2_f']['whh'], params['lstm2_b']['whh'])


# ------------------------------ parameter init -------------------------------
def _uniform(key, shape, scale):
    return jax.random.uniform(key, shape, jnp.float32, -scale, scale)


def _bn_fold(key, c):
    k1, k2, k3, k4 = jax.random.split(key, 4)
    gamma = 1.0 + 0.1 * jax.random.normal(k1, (c,), jnp.float32)
    beta = 0.1 * jax.random.normal(k2, (c,), jnp.float32)
    r_mean = 0.1 * jax.random.normal(k3, (c,), jnp.float32)
    r_var = 1.0 + 0.1 * jnp.abs(jax.random.normal(k4, (c,), jnp.float32))
    scale = gamma / jnp.sqrt(r_var + BN_EPS)
    shift = beta - r_mean * scale
    return scale, shift


def _lstm_dir(key, d_in, h):
    k1, k2, k3 = jax.random.split(key, 3)
    s = 1.0 / float(h) ** 0.5
    # wih: (Din, 4H) cols [i f g o]; whh: (H, 4H); b = b_ih + b_hh (torch order).
    return dict(wih=_uniform(k1, (d_in, 4 * h), s),
                whh=_uniform(k2, (h, 4 * h), s),
                b=_uniform(k3, (4 * h,), s))


def init_params(key):
    ks = jax.random.split(key, 10)
    nf, nf2, u1, u2 = NUM_FILTERS, 2 * NUM_FILTERS, UNITS, UNITS // 2
    p = {}
    sc1 = 1.0 / float(INPUT_SIZE * KERNEL_SIZE) ** 0.5
    p['conv1_w'] = _uniform(ks[0], (KERNEL_SIZE, INPUT_SIZE, nf), sc1)   # (K, Cin, Cout)
    p['conv1_b'] = _uniform(ks[1], (nf,), sc1)
    p['bn1_scale'], p['bn1_shift'] = _bn_fold(ks[2], nf)
    sc2 = 1.0 / float(nf * KERNEL_SIZE) ** 0.5
    p['conv2_w'] = _uniform(ks[3], (KERNEL_SIZE, nf, nf2), sc2)
    p['conv2_b'] = _uniform(ks[4], (nf2,), sc2)
    p['bn2_scale'], p['bn2_shift'] = _bn_fold(ks[5], nf2)
    p['lstm1_f'] = _lstm_dir(ks[6], nf2, u1)
    p['lstm1_b'] = _lstm_dir(ks[7], nf2, u1)
    p['lstm2_f'] = _lstm_dir(ks[8], 2 * u1, u2)
    p['lstm2_b'] = _lstm_dir(ks[9], 2 * u1, u2)
    return p


# ----------------------------------- main ------------------------------------
if __name__ == "__main__":
    key = jax.random.PRNGKey(0)
    k_par, k_x = jax.random.split(key)
    params = init_params(k_par)
    x = jax.random.normal(k_x, (BATCH, SEQ_LEN, INPUT_SIZE), jnp.float32)

    out = cnn_lstm_block(params, x)
    out = jax.block_until_ready(out)
    assert out.shape == (BATCH, UNITS) and out.dtype == jnp.float32
    print("KERNEL_OK")
</pallas_src>

<mosaic_0001>
module attributes {stable_mosaic.version = 11 : i64} {
  func.func @_fused_kernel(%arg0: memref<16x4xf32, #tpu.memory_space<vmem>>, %arg1: memref<7x4x8xf32, #tpu.memory_space<vmem>>, %arg2: memref<1x8xf32, #tpu.memory_space<vmem>>, %arg3: memref<1x8xf32, #tpu.memory_space<vmem>>, %arg4: memref<7x8x16xf32, #tpu.memory_space<vmem>>, %arg5: memref<1x16xf32, #tpu.memory_space<vmem>>, %arg6: memref<1x16xf32, #tpu.memory_space<vmem>>, %arg7: memref<16x256xf32, #tpu.memory_space<vmem>>, %arg8: memref<1x256xf32, #tpu.memory_space<vmem>>, %arg9: memref<32x128xf32, #tpu.memory_space<vmem>>, %arg10: memref<32x128xf32, #tpu.memory_space<vmem>>, %arg11: memref<64x128xf32, #tpu.memory_space<vmem>>, %arg12: memref<1x128xf32, #tpu.memory_space<vmem>>, %arg13: memref<16x64xf32, #tpu.memory_space<vmem>>, %arg14: memref<16x64xf32, #tpu.memory_space<vmem>>, %arg15: memref<2x32xf32, #tpu.memory_space<vmem>>) attributes {dimension_semantics = [], scalar_prefetch = 0 : i64, scratch_operands = 0 : i64, tpu.core_type = #tpu.core_type<tc>} {
    %c0 = arith.constant 0 : index
    %c0_0 = arith.constant 0 : index
    %0 = vector.load %arg0[%c0, %c0_0] : memref<16x4xf32, #tpu.memory_space<vmem>>, vector<16x4xf32>
    %cst = arith.constant 0.000000e+00 : f32
    %1 = vector.broadcast %cst : f32 to vector<6x4xf32>
    %2 = tpu.concatenate %1, %0, %1 in 0 : vector<6x4xf32>, vector<16x4xf32>, vector<6x4xf32> -> vector<28x4xf32>
    %cst_1 = arith.constant 0.000000e+00 : f32
    %3 = vector.broadcast %cst_1 : f32 to vector<16x8xf32>
    %4 = vector.extract_strided_slice %2 {offsets = [0, 0], sizes = [16, 4], strides = [1, 1]} : vector<28x4xf32> to vector<16x4xf32>
    %c0_2 = arith.constant 0 : index
    %c0_3 = arith.constant 0 : index
    %c0_4 = arith.constant 0 : index
    %5 = vector.load %arg1[%c0_2, %c0_3, %c0_4] : memref<7x4x8xf32, #tpu.memory_space<vmem>>, vector<1x4x8xf32>
    %6 = vector.shape_cast %5 : vector<1x4x8xf32> to vector<4x8xf32>
    %cst_5 = arith.constant dense<0.000000e+00> : vector<16x8xf32>
    %7 = tpu.matmul %4, %6, %cst_5 {dimension_numbers = #tpu.dot_dimension_numbers<[1], [0], [0], [1], [0, 0, 1, 1], [], []>} : vector<16x4xf32>, vector<4x8xf32>, vector<16x8xf32> -> vector<16x8xf32>
    %8 = arith.addf %3, %7 : vector<16x8xf32>
    %9 = vector.extract_strided_slice %2 {offsets = [2, 0], sizes = [16, 4], strides = [1, 1]} : vector<28x4xf32> to vector<16x4xf32>
    %c1 = arith.constant 1 : index
    %c0_6 = arith.constant 0 : index
    %c0_7 = arith.constant 0 : index
    %10 = vector.load %arg1[%c1, %c0_6, %c0_7] : memref<7x4x8xf32, #tpu.memory_space<vmem>>, vector<1x4x8xf32>
    %11 = vector.shape_cast %10 : vector<1x4x8xf32> to vector<4x8xf32>
    %cst_8 = arith.constant dense<0.000000e+00> : vector<16x8xf32>
    %12 = tpu.matmul %9, %11, %cst_8 {dimension_numbers = #tpu.dot_dimension_numbers<[1], [0], [0], [1], [0, 0, 1, 1], [], []>} : vector<16x4xf32>, vector<4x8xf32>, vector<16x8xf32> -> vector<16x8xf32>
    %13 = arith.addf %8, %12 : vector<16x8xf32>
    %14 = vector.extract_strided_slice %2 {offsets = [4, 0], sizes = [16, 4], strides = [1, 1]} : vector<28x4xf32> to vector<16x4xf32>
    %c2 = arith.constant 2 : index
    %c0_9 = arith.constant 0 : index
    %c0_10 = arith.constant 0 : index
    %15 = vector.load %arg1[%c2, %c0_9, %c0_10] : memref<7x4x8xf32, #tpu.memory_space<vmem>>, vector<1x4x8xf32>
    %16 = vector.shape_cast %15 : vector<1x4x8xf32> to vector<4x8xf32>
    %cst_11 = arith.constant dense<0.000000e+00> : vector<16x8xf32>
    %17 = tpu.matmul %14, %16, %cst_11 {dimension_numbers = #tpu.dot_dimension_numbers<[1], [0], [0], [1], [0, 0, 1, 1], [], []>} : vector<16x4xf32>, vector<4x8xf32>, vector<16x8xf32> -> vector<16x8xf32>
    %18 = arith.addf %13, %17 : vector<16x8xf32>
    %19 = vector.extract_strided_slice %2 {offsets = [6, 0], sizes = [16, 4], strides = [1, 1]} : vector<28x4xf32> to vector<16x4xf32>
    %c3 = arith.constant 3 : index
    %c0_12 = arith.constant 0 : index
    %c0_13 = arith.constant 0 : index
    %20 = vector.load %arg1[%c3, %c0_12, %c0_13] : memref<7x4x8xf32, #tpu.memory_space<vmem>>, vector<1x4x8xf32>
    %21 = vector.shape_cast %20 : vector<1x4x8xf32> to vector<4x8xf32>
    %cst_14 = arith.constant dense<0.000000e+00> : vector<16x8xf32>
    %22 = tpu.matmul %19, %21, %cst_14 {dimension_numbers = #tpu.dot_dimension_numbers<[1], [0], [0], [1], [0, 0, 1, 1], [], []>} : vector<16x4xf32>, vector<4x8xf32>, vector<16x8xf32> -> vector<16x8xf32>
    %23 = arith.addf %18, %22 : vector<16x8xf32>
    %24 = vector.extract_strided_slice %2 {offsets = [8, 0], sizes = [16, 4], strides = [1, 1]} : vector<28x4xf32> to vector<16x4xf32>
    %c4 = arith.constant 4 : index
    %c0_15 = arith.constant 0 : index
    %c0_16 = arith.constant 0 : index
    %25 = vector.load %arg1[%c4, %c0_15, %c0_16] : memref<7x4x8xf32, #tpu.memory_space<vmem>>, vector<1x4x8xf32>
    %26 = vector.shape_cast %25 : vector<1x4x8xf32> to vector<4x8xf32>
    %cst_17 = arith.constant dense<0.000000e+00> : vector<16x8xf32>
    %27 = tpu.matmul %24, %26, %cst_17 {dimension_numbers = #tpu.dot_dimension_numbers<[1], [0], [0], [1], [0, 0, 1, 1], [], []>} : vector<16x4xf32>, vector<4x8xf32>, vector<16x8xf32> -> vector<16x8xf32>
    %28 = arith.addf %23, %27 : vector<16x8xf32>
    %29 = vector.extract_strided_slice %2 {offsets = [10, 0], sizes = [16, 4], strides = [1, 1]} : vector<28x4xf32> to vector<16x4xf32>
    %c5 = arith.constant 5 : index
    %c0_18 = arith.constant 0 : index
    %c0_19 = arith.constant 0 : index
    %30 = vector.load %arg1[%c5, %c0_18, %c0_19] : memref<7x4x8xf32, #tpu.memory_space<vmem>>, vector<1x4x8xf32>
    %31 = vector.shape_cast %30 : vector<1x4x8xf32> to vector<4x8xf32>
    %cst_20 = arith.constant dense<0.000000e+00> : vector<16x8xf32>
    %32 = tpu.matmul %29, %31, %cst_20 {dimension_numbers = #tpu.dot_dimension_numbers<[1], [0], [0], [1], [0, 0, 1, 1], [], []>} : vector<16x4xf32>, vector<4x8xf32>, vector<16x8xf32> -> vector<16x8xf32>
    %33 = arith.addf %28, %32 : vector<16x8xf32>
    %34 = vector.extract_strided_slice %2 {offsets = [12, 0], sizes = [16, 4], strides = [1, 1]} : vector<28x4xf32> to vector<16x4xf32>
    %c6 = arith.constant 6 : index
    %c0_21 = arith.constant 0 : index
    %c0_22 = arith.constant 0 : index
    %35 = vector.load %arg1[%c6, %c0_21, %c0_22] : memref<7x4x8xf32, #tpu.memory_space<vmem>>, vector<1x4x8xf32>
    %36 = vector.shape_cast %35 : vector<1x4x8xf32> to vector<4x8xf32>
    %cst_23 = arith.constant dense<0.000000e+00> : vector<16x8xf32>
    %37 = tpu.matmul %34, %36, %cst_23 {dimension_numbers = #tpu.dot_dimension_numbers<[1], [0], [0], [1], [0, 0, 1, 1], [], []>} : vector<16x4xf32>, vector<4x8xf32>, vector<16x8xf32> -> vector<16x8xf32>
    %38 = arith.addf %33, %37 : vector<16x8xf32>
    %c0_24 = arith.constant 0 : index
    %c0_25 = arith.constant 0 : index
    %39 = vector.load %arg2[%c0_24, %c0_25] : memref<1x8xf32, #tpu.memory_space<vmem>>, vector<1x8xf32>
    %40 = vector.broadcast %39 : vector<1x8xf32> to vector<16x8xf32>
    %41 = arith.mulf %38, %40 : vector<16x8xf32>
    %c0_26 = arith.constant 0 : index
    %c0_27 = arith.constant 0 : index
    %42 = vector.load %arg3[%c0_26, %c0_27] : memref<1x8xf32, #tpu.memory_space<vmem>>, vector<1x8xf32>
    %43 = vector.broadcast %42 : vector<1x8xf32> to vector<16x8xf32>
    %44 = arith.addf %41, %43 : vector<16x8xf32>
    %cst_28 = arith.constant 0.000000e+00 : f32
    %45 = vector.broadcast %cst_28 : f32 to vector<6x8xf32>
    %46 = tpu.concatenate %45, %44, %45 in 0 : vector<6x8xf32>, vector<16x8xf32>, vector<6x8xf32> -> vector<28x8xf32>
    %cst_29 = arith.constant 0.000000e+00 : f32
    %47 = vector.broadcast %cst_29 : f32 to vector<16x16xf32>
    %48 = vector.extract_strided_slice %46 {offsets = [0, 0], sizes = [16, 8], strides = [1, 1]} : vector<28x8xf32> to vector<16x8xf32>
    %c0_30 = arith.constant 0 : index
    %c0_31 = arith.constant 0 : index
    %c0_32 = arith.constant 0 : index
    %49 = vector.load %arg4[%c0_30, %c0_31, %c0_32] : memref<7x8x16xf32, #tpu.memory_space<vmem>>, vector<1x8x16xf32>
    %50 = vector.shape_cast %49 : vector<1x8x16xf32> to vector<8x16xf32>
    %cst_33 = arith.constant dense<0.000000e+00> : vector<16x16xf32>
    %51 = tpu.matmul %48, %50, %cst_33 {dimension_numbers = #tpu.dot_dimension_numbers<[1], [0], [0], [1], [0, 0, 1, 1], [], []>} : vector<16x8xf32>, vector<8x16xf32>, vector<16x16xf32> -> vector<16x16xf32>
    %52 = arith.addf %47, %51 : vector<16x16xf32>
    %53 = vector.extract_strided_slice %46 {offsets = [2, 0], sizes = [16, 8], strides = [1, 1]} : vector<28x8xf32> to vector<16x8xf32>
    %c1_34 = arith.constant 1 : index
    %c0_35 = arith.constant 0 : index
    %c0_36 = arith.constant 0 : index
    %54 = vector.load %arg4[%c1_34, %c0_35, %c0_36] : memref<7x8x16xf32, #tpu.memory_space<vmem>>, vector<1x8x16xf32>
    %55 = vector.shape_cast %54 : vector<1x8x16xf32> to vector<8x16xf32>
    %cst_37 = arith.constant dense<0.000000e+00> : vector<16x16xf32>
    %56 = tpu.matmul %53, %55, %cst_37 {dimension_numbers = #tpu.dot_dimension_numbers<[1], [0], [0], [1], [0, 0, 1, 1], [], []>} : vector<16x8xf32>, vector<8x16xf32>, vector<16x16xf32> -> vector<16x16xf32>
    %57 = arith.addf %52, %56 : vector<16x16xf32>
    %58 = vector.extract_strided_slice %46 {offsets = [4, 0], sizes = [16, 8], strides = [1, 1]} : vector<28x8xf32> to vector<16x8xf32>
    %c2_38 = arith.constant 2 : index
    %c0_39 = arith.constant 0 : index
    %c0_40 = arith.constant 0 : index
    %59 = vector.load %arg4[%c2_38, %c0_39, %c0_40] : memref<7x8x16xf32, #tpu.memory_space<vmem>>, vector<1x8x16xf32>
    %60 = vector.shape_cast %59 : vector<1x8x16xf32> to vector<8x16xf32>
    %cst_41 = arith.constant dense<0.000000e+00> : vector<16x16xf32>
    %61 = tpu.matmul %58, %60, %cst_41 {dimension_numbers = #tpu.dot_dimension_numbers<[1], [0], [0], [1], [0, 0, 1, 1], [], []>} : vector<16x8xf32>, vector<8x16xf32>, vector<16x16xf32> -> vector<16x16xf32>
    %62 = arith.addf %57, %61 : vector<16x16xf32>
    %63 = vector.extract_strided_slice %46 {offsets = [6, 0], sizes = [16, 8], strides = [1, 1]} : vector<28x8xf32> to vector<16x8xf32>
    %c3_42 = arith.constant 3 : index
    %c0_43 = arith.constant 0 : index
    %c0_44 = arith.constant 0 : index
    %64 = vector.load %arg4[%c3_42, %c0_43, %c0_44] : memref<7x8x16xf32, #tpu.memory_space<vmem>>, vector<1x8x16xf32>
    %65 = vector.shape_cast %64 : vector<1x8x16xf32> to vector<8x16xf32>
    %cst_45 = arith.constant dense<0.000000e+00> : vector<16x16xf32>
    %66 = tpu.matmul %63, %65, %cst_45 {dimension_numbers = #tpu.dot_dimension_numbers<[1], [0], [0], [1], [0, 0, 1, 1], [], []>} : vector<16x8xf32>, vector<8x16xf32>, vector<16x16xf32> -> vector<16x16xf32>
    %67 = arith.addf %62, %66 : vector<16x16xf32>
    %68 = vector.extract_strided_slice %46 {offsets = [8, 0], sizes = [16, 8], strides = [1, 1]} : vector<28x8xf32> to vector<16x8xf32>
    %c4_46 = arith.constant 4 : index
    %c0_47 = arith.constant 0 : index
    %c0_48 = arith.constant 0 : index
    %69 = vector.load %arg4[%c4_46, %c0_47, %c0_48] : memref<7x8x16xf32, #tpu.memory_space<vmem>>, vector<1x8x16xf32>
    %70 = vector.shape_cast %69 : vector<1x8x16xf32> to vector<8x16xf32>
    %cst_49 = arith.constant dense<0.000000e+00> : vector<16x16xf32>
    %71 = tpu.matmul %68, %70, %cst_49 {dimension_numbers = #tpu.dot_dimension_numbers<[1], [0], [0], [1], [0, 0, 1, 1], [], []>} : vector<16x8xf32>, vector<8x16xf32>, vector<16x16xf32> -> vector<16x16xf32>
    %72 = arith.addf %67, %71 : vector<16x16xf32>
    %73 = vector.extract_strided_slice %46 {offsets = [10, 0], sizes = [16, 8], strides = [1, 1]} : vector<28x8xf32> to vector<16x8xf32>
    %c5_50 = arith.constant 5 : index
    %c0_51 = arith.constant 0 : index
    %c0_52 = arith.constant 0 : index
    %74 = vector.load %arg4[%c5_50, %c0_51, %c0_52] : memref<7x8x16xf32, #tpu.memory_space<vmem>>, vector<1x8x16xf32>
    %75 = vector.shape_cast %74 : vector<1x8x16xf32> to vector<8x16xf32>
    %cst_53 = arith.constant dense<0.000000e+00> : vector<16x16xf32>
    %76 = tpu.matmul %73, %75, %cst_53 {dimension_numbers = #tpu.dot_dimension_numbers<[1], [0], [0], [1], [0, 0, 1, 1], [], []>} : vector<16x8xf32>, vector<8x16xf32>, vector<16x16xf32> -> vector<16x16xf32>
    %77 = arith.addf %72, %76 : vector<16x16xf32>
    %78 = vector.extract_strided_slice %46 {offsets = [12, 0], sizes = [16, 8], strides = [1, 1]} : vector<28x8xf32> to vector<16x8xf32>
    %c6_54 = arith.constant 6 : index
    %c0_55 = arith.constant 0 : index
    %c0_56 = arith.constant 0 : index
    %79 = vector.load %arg4[%c6_54, %c0_55, %c0_56] : memref<7x8x16xf32, #tpu.memory_space<vmem>>, vector<1x8x16xf32>
    %80 = vector.shape_cast %79 : vector<1x8x16xf32> to vector<8x16xf32>
    %cst_57 = arith.constant dense<0.000000e+00> : vector<16x16xf32>
    %81 = tpu.matmul %78, %80, %cst_57 {dimension_numbers = #tpu.dot_dimension_numbers<[1], [0], [0], [1], [0, 0, 1, 1], [], []>} : vector<16x8xf32>, vector<8x16xf32>, vector<16x16xf32> -> vector<16x16xf32>
    %82 = arith.addf %77, %81 : vector<16x16xf32>
    %c0_58 = arith.constant 0 : index
    %c0_59 = arith.constant 0 : index
    %83 = vector.load %arg5[%c0_58, %c0_59] : memref<1x16xf32, #tpu.memory_space<vmem>>, vector<1x16xf32>
    %84 = vector.broadcast %83 : vector<1x16xf32> to vector<16x16xf32>
    %85 = arith.mulf %82, %84 : vector<16x16xf32>
    %c0_60 = arith.constant 0 : index
    %c0_61 = arith.constant 0 : index
    %86 = vector.load %arg6[%c0_60, %c0_61] : memref<1x16xf32, #tpu.memory_space<vmem>>, vector<1x16xf32>
    %87 = vector.broadcast %86 : vector<1x16xf32> to vector<16x16xf32>
    %88 = arith.addf %85, %87 : vector<16x16xf32>
    %cst_62 = arith.constant 0.000000e+00 : f32
    %89 = vector.broadcast %cst_62 : f32 to vector<16x16xf32>
    %90 = arith.maximumf %88, %89 : vector<16x16xf32>
    %c0_63 = arith.constant 0 : index
    %c0_64 = arith.constant 0 : index
    %91 = vector.load %arg7[%c0_63, %c0_64] : memref<16x256xf32, #tpu.memory_space<vmem>>, vector<16x256xf32>
    %cst_65 = arith.constant dense<0.000000e+00> : vector<16x256xf32>
    %92 = tpu.matmul %90, %91, %cst_65 {dimension_numbers = #tpu.dot_dimension_numbers<[1], [0], [0], [1], [0, 0, 1, 1], [], []>} : vector<16x16xf32>, vector<16x256xf32>, vector<16x256xf32> -> vector<16x256xf32>
    %c0_66 = arith.constant 0 : index
    %c0_67 = arith.constant 0 : index
    %93 = vector.load %arg8[%c0_66, %c0_67] : memref<1x256xf32, #tpu.memory_space<vmem>>, vector<1x256xf32>
    %94 = vector.broadcast %93 : vector<1x256xf32> to vector<16x256xf32>
    %95 = arith.addf %92, %94 : vector<16x256xf32>
    %c0_68 = arith.constant 0 : index
    %c0_69 = arith.constant 0 : index
    %96 = vector.load %arg9[%c0_68, %c0_69] : memref<32x128xf32, #tpu.memory_space<vmem>>, vector<32x128xf32>
    %c0_70 = arith.constant 0 : index
    %c0_71 = arith.constant 0 : index
    %97 = vector.load %arg10[%c0_70, %c0_71] : memref<32x128xf32, #tpu.memory_space<vmem>>, vector<32x128xf32>
    %cst_72 = arith.constant 0.000000e+00 : f32
    %98 = vector.broadcast %cst_72 : f32 to vector<4x32xf32>
    %cst_73 = arith.constant 0.000000e+00 : f32
    %99 = vector.broadcast %cst_73 : f32 to vector<4x32xf32>
    %100 = vector.extract_strided_slice %95 {offsets = [0, 0], sizes = [2, 128], strides = [1, 1]} : vector<16x256xf32> to vector<2x128xf32>
    %101 = vector.extract_strided_slice %95 {offsets = [14, 128], sizes = [2, 128], strides = [1, 1]} : vector<16x256xf32> to vector<2x128xf32>
    %102 = tpu.concatenate %100, %101 in 0 : vector<2x128xf32>, vector<2x128xf32> -> vector<4x128xf32>
    %103 = vector.extract_strided_slice %98 {offsets = [0, 0], sizes = [2, 32], strides = [1, 1]} : vector<4x32xf32> to vector<2x32xf32>
    %cst_74 = arith.constant dense<0.000000e+00> : vector<2x128xf32>
    %104 = tpu.matmul %103, %96, %cst_74 {dimension_numbers = #tpu.dot_dimension_numbers<[1], [0], [0], [1], [0, 0, 1, 1], [], []>} : vector<2x32xf32>, vector<32x128xf32>, vector<2x128xf32> -> vector<2x128xf32>
    %105 = vector.extract_strided_slice %98 {offsets = [2, 0], sizes = [2, 32], strides = [1, 1]} : vector<4x32xf32> to vector<2x32xf32>
    %cst_75 = arith.constant dense<0.000000e+00> : vector<2x128xf32>
    %106 = tpu.matmul %105, %97, %cst_75 {dimension_numbers = #tpu.dot_dimension_numbers<[1], [0], [0], [1], [0, 0, 1, 1], [], []>} : vector<2x32xf32>, vector<32x128xf32>, vector<2x128xf32> -> vector<2x128xf32>
    %107 = tpu.concatenate %104, %106 in 0 : vector<2x128xf32>, vector<2x128xf32> -> vector<4x128xf32>
    %108 = arith.addf %102, %107 : vector<4x128xf32>
    %109 = arith.negf %108 : vector<4x128xf32>
    %110 = math.exp %109 : vector<4x128xf32>
    %cst_76 = arith.constant 1.000000e+00 : f32
    %111 = vector.broadcast %cst_76 : f32 to vector<4x128xf32>
    %112 = arith.addf %111, %110 : vector<4x128xf32>
    %113 = arith.divf %111, %112 : vector<4x128xf32>
    %114 = vector.extract_strided_slice %108 {offsets = [0, 64], sizes = [4, 32], strides = [1, 1]} : vector<4x128xf32> to vector<4x32xf32>
    %115 = math.tanh %114 : vector<4x32xf32>
    %116 = vector.extract_strided_slice %113 {offsets = [0, 32], sizes = [4, 32], strides = [1, 1]} : vector<4x128xf32> to vector<4x32xf32>
    %117 = arith.mulf %116, %99 : vector<4x32xf32>
    %118 = vector.extract_strided_slice %113 {offsets = [0, 0], sizes = [4, 32], strides = [1, 1]} : vector<4x128xf32> to vector<4x32xf32>
    %119 = arith.mulf %118, %115 : vector<4x32xf32>
    %120 = arith.addf %117, %119 : vector<4x32xf32>
    %121 = vector.extract_strided_slice %113 {offsets = [0, 96], sizes = [4, 32], strides = [1, 1]} : vector<4x128xf32> to vector<4x32xf32>
    %122 = math.tanh %120 : vector<4x32xf32>
    %123 = arith.mulf %121, %122 : vector<4x32xf32>
    %124 = vector.extract_strided_slice %123 {offsets = [0, 0], sizes = [2, 32], strides = [1, 1]} : vector<4x32xf32> to vector<2x32xf32>
    %125 = vector.extract_strided_slice %123 {offsets = [2, 0], sizes = [2, 32], strides = [1, 1]} : vector<4x32xf32> to vector<2x32xf32>
    %126 = vector.extract_strided_slice %95 {offsets = [2, 0], sizes = [2, 128], strides = [1, 1]} : vector<16x256xf32> to vector<2x128xf32>
    %127 = vector.extract_strided_slice %95 {offsets = [12, 128], sizes = [2, 128], strides = [1, 1]} : vector<16x256xf32> to vector<2x128xf32>
    %128 = tpu.concatenate %126, %127 in 0 : vector<2x128xf32>, vector<2x128xf32> -> vector<4x128xf32>
    %129 = vector.extract_strided_slice %123 {offsets = [0, 0], sizes = [2, 32], strides = [1, 1]} : vector<4x32xf32> to vector<2x32xf32>
    %cst_77 = arith.constant dense<0.000000e+00> : vector<2x128xf32>
    %130 = tpu.matmul %129, %96, %cst_77 {dimension_numbers = #tpu.dot_dimension_numbers<[1], [0], [0], [1], [0, 0, 1, 1], [], []>} : vector<2x32xf32>, vector<32x128xf32>, vector<2x128xf32> -> vector<2x128xf32>
    %131 = vector.extract_strided_slice %123 {offsets = [2, 0], sizes = [2, 32], strides = [1, 1]} : vector<4x32xf32> to vector<2x32xf32>
    %cst_78 = arith.constant dense<0.000000e+00> : vector<2x128xf32>
    %132 = tpu.matmul %131, %97, %cst_78 {dimension_numbers = #tpu.dot_dimension_numbers<[1], [0], [0], [1], [0, 0, 1, 1], [], []>} : vector<2x32xf32>, vector<32x128xf32>, vector<2x128xf32> -> vector<2x128xf32>
    %133 = tpu.concatenate %130, %132 in 0 : vector<2x128xf32>, vector<2x128xf32> -> vector<4x128xf32>
    %134 = arith.addf %128, %133 : vector<4x128xf32>
    %135 = arith.negf %134 : vector<4x128xf32>
    %136 = math.exp %135 : vector<4x128xf32>
    %cst_79 = arith.constant 1.000000e+00 : f32
    %137 = vector.broadcast %cst_79 : f32 to vector<4x128xf32>
    %138 = arith.addf %137, %136 : vector<4x128xf32>
    %139 = arith.divf %137, %138 : vector<4x128xf32>
    %140 = vector.extract_strided_slice %134 {offsets = [0, 64], sizes = [4, 32], strides = [1, 1]} : vector<4x128xf32> to vector<4x32xf32>
    %141 = math.tanh %140 : vector<4x32xf32>
    %142 = vector.extract_strided_slice %139 {offsets = [0, 32], sizes = [4, 32], strides = [1, 1]} : vector<4x128xf32> to vector<4x32xf32>
    %143 = arith.mulf %142, %120 : vector<4x32xf32>
    %144 = vector.extract_strided_slice %139 {offsets = [0, 0], sizes = [4, 32], strides = [1, 1]} : vector<4x128xf32> to vector<4x32xf32>
    %145 = arith.mulf %144, %141 : vector<4x32xf32>
    %146 = arith.addf %143, %145 : vector<4x32xf32>
    %147 = vector.extract_strided_slice %139 {offsets = [0, 96], sizes = [4, 32], strides = [1, 1]} : vector<4x128xf32> to vector<4x32xf32>
    %148 = math.tanh %146 : vector<4x32xf32>
    %149 = arith.mulf %147, %148 : vector<4x32xf32>
    %150 = vector.extract_strided_slice %149 {offsets = [0, 0], sizes = [2, 32], strides = [1, 1]} : vector<4x32xf32> to vector<2x32xf32>
    %151 = vector.extract_strided_slice %149 {offsets = [2, 0], sizes = [2, 32], strides = [1, 1]} : vector<4x32xf32> to vector<2x32xf32>
    %152 = vector.extract_strided_slice %95 {offsets = [4, 0], sizes = [2, 128], strides = [1, 1]} : vector<16x256xf32> to vector<2x128xf32>
    %153 = vector.extract_strided_slice %95 {offsets = [10, 128], sizes = [2, 128], strides = [1, 1]} : vector<16x256xf32> to vector<2x128xf32>
    %154 = tpu.concatenate %152, %153 in 0 : vector<2x128xf32>, vector<2x128xf32> -> vector<4x128xf32>
    %155 = vector.extract_strided_slice %149 {offsets = [0, 0], sizes = [2, 32], strides = [1, 1]} : vector<4x32xf32> to vector<2x32xf32>
    %cst_80 = arith.constant dense<0.000000e+00> : vector<2x128xf32>
    %156 = tpu.matmul %155, %96, %cst_80 {dimension_numbers = #tpu.dot_dimension_numbers<[1], [0], [0], [1], [0, 0, 1, 1], [], []>} : vector<2x32xf32>, vector<32x128xf32>, vector<2x128xf32> -> vector<2x128xf32>
    %157 = vector.extract_strided_slice %149 {offsets = [2, 0], sizes = [2, 32], strides = [1, 1]} : vector<4x32xf32> to vector<2x32xf32>
    %cst_81 = arith.constant dense<0.000000e+00> : vector<2x128xf32>
    %158 = tpu.matmul %157, %97, %cst_81 {dimension_numbers = #tpu.dot_dimension_numbers<[1], [0], [0], [1], [0, 0, 1, 1], [], []>} : vector<2x32xf32>, vector<32x128xf32>, vector<2x128xf32> -> vector<2x128xf32>
    %159 = tpu.concatenate %156, %158 in 0 : vector<2x128xf32>, vector<2x128xf32> -> vector<4x128xf32>
    %160 = arith.addf %154, %159 : vector<4x128xf32>
    %161 = arith.negf %160 : vector<4x128xf32>
    %162 = math.exp %161 : vector<4x128xf32>
    %cst_82 = arith.constant 1.000000e+00 : f32
    %163 = vector.broadcast %cst_82 : f32 to vector<4x128xf32>
    %164 = arith.addf %163, %162 : vector<4x128xf32>
    %165 = arith.divf %163, %164 : vector<4x128xf32>
    %166 = vector.extract_strided_slice %160 {offsets = [0, 64], sizes = [4, 32], strides = [1, 1]} : vector<4x128xf32> to vector<4x32xf32>
    %167 = math.tanh %166 : vector<4x32xf32>
    %168 = vector.extract_strided_slice %165 {offsets = [0, 32], sizes = [4, 32], strides = [1, 1]} : vector<4x128xf32> to vector<4x32xf32>
    %169 = arith.mulf %168, %146 : vector<4x32xf32>
    %170 = vector.extract_strided_slice %165 {offsets = [0, 0], sizes = [4, 32], strides = [1, 1]} : vector<4x128xf32> to vector<4x32xf32>
    %171 = arith.mulf %170, %167 : vector<4x32xf32>
    %172 = arith.addf %169, %171 : vector<4x32xf32>
    %173 = vector.extract_strided_slice %165 {offsets = [0, 96], sizes = [4, 32], strides = [1, 1]} : vector<4x128xf32> to vector<4x32xf32>
    %174 = math.tanh %172 : vector<4x32xf32>
    %175 = arith.mulf %173, %174 : vector<4x32xf32>
    %176 = vector.extract_strided_slice %175 {offsets = [0, 0], sizes = [2, 32], strides = [1, 1]} : vector<4x32xf32> to vector<2x32xf32>
    %177 = vector.extract_strided_slice %175 {offsets = [2, 0], sizes = [2, 32], strides = [1, 1]} : vector<4x32xf32> to vector<2x32xf32>
    %178 = vector.extract_strided_slice %95 {offsets = [6, 0], sizes = [2, 128], strides = [1, 1]} : vector<16x256xf32> to vector<2x128xf32>
    %179 = vector.extract_strided_slice %95 {offsets = [8, 128], sizes = [2, 128], strides = [1, 1]} : vector<16x256xf32> to vector<2x128xf32>
    %180 = tpu.concatenate %178, %179 in 0 : vector<2x128xf32>, vector<2x128xf32> -> vector<4x128xf32>
    %181 = vector.extract_strided_slice %175 {offsets = [0, 0], sizes = [2, 32], strides = [1, 1]} : vector<4x32xf32> to vector<2x32xf32>
    %cst_83 = arith.constant dense<0.000000e+00> : vector<2x128xf32>
    %182 = tpu.matmul %181, %96, %cst_83 {dimension_numbers = #tpu.dot_dimension_numbers<[1], [0], [0], [1], [0, 0, 1, 1], [], []>} : vector<2x32xf32>, vector<32x128xf32>, vector<2x128xf32> -> vector<2x128xf32>
    %183 = vector.extract_strided_slice %175 {offsets = [2, 0], sizes = [2, 32], strides = [1, 1]} : vector<4x32xf32> to vector<2x32xf32>
    %cst_84 = arith.constant dense<0.000000e+00> : vector<2x128xf32>
    %184 = tpu.matmul %183, %97, %cst_84 {dimension_numbers = #tpu.dot_dimension_numbers<[1], [0], [0], [1], [0, 0, 1, 1], [], []>} : vector<2x32xf32>, vector<32x128xf32>, vector<2x128xf32> -> vector<2x128xf32>
    %185 = tpu.concatenate %182, %184 in 0 : vector<2x128xf32>, vector<2x128xf32> -> vector<4x128xf32>
    %186 = arith.addf %180, %185 : vector<4x128xf32>
    %187 = arith.negf %186 : vector<4x128xf32>
    %188 = math.exp %187 : vector<4x128xf32>
    %cst_85 = arith.constant 1.000000e+00 : f32
    %189 = vector.broadcast %cst_85 : f32 to vector<4x128xf32>
    %190 = arith.addf %189, %188 : vector<4x128xf32>
    %191 = arith.divf %189, %190 : vector<4x128xf32>
    %192 = vector.extract_strided_slice %186 {offsets = [0, 64], sizes = [4, 32], strides = [1, 1]} : vector<4x128xf32> to vector<4x32xf32>
    %193 = math.tanh %192 : vector<4x32xf32>
    %194 = vector.extract_strided_slice %191 {offsets = [0, 32], sizes = [4, 32], strides = [1, 1]} : vector<4x128xf32> to vector<4x32xf32>
    %195 = arith.mulf %194, %172 : vector<4x32xf32>
    %196 = vector.extract_strided_slice %191 {offsets = [0, 0], sizes = [4, 32], strides = [1, 1]} : vector<4x128xf32> to vector<4x32xf32>
    %197 = arith.mulf %196, %193 : vector<4x32xf32>
    %198 = arith.addf %195, %197 : vector<4x32xf32>
    %199 = vector.extract_strided_slice %191 {offsets = [0, 96], sizes = [4, 32], strides = [1, 1]} : vector<4x128xf32> to vector<4x32xf32>
    %200 = math.tanh %198 : vector<4x32xf32>
    %201 = arith.mulf %199, %200 : vector<4x32xf32>
    %202 = vector.extract_strided_slice %201 {offsets = [0, 0], sizes = [2, 32], strides = [1, 1]} : vector<4x32xf32> to vector<2x32xf32>
    %203 = vector.extract_strided_slice %201 {offsets = [2, 0], sizes = [2, 32], strides = [1, 1]} : vector<4x32xf32> to vector<2x32xf32>
    %204 = vector.extract_strided_slice %95 {offsets = [8, 0], sizes = [2, 128], strides = [1, 1]} : vector<16x256xf32> to vector<2x128xf32>
    %205 = vector.extract_strided_slice %95 {offsets = [6, 128], sizes = [2, 128], strides = [1, 1]} : vector<16x256xf32> to vector<2x128xf32>
    %206 = tpu.concatenate %204, %205 in 0 : vector<2x128xf32>, vector<2x128xf32> -> vector<4x128xf32>
    %207 = vector.extract_strided_slice %201 {offsets = [0, 0], sizes = [2, 32], strides = [1, 1]} : vector<4x32xf32> to vector<2x32xf32>
    %cst_86 = arith.constant dense<0.000000e+00> : vector<2x128xf32>
    %208 = tpu.matmul %207, %96, %cst_86 {dimension_numbers = #tpu.dot_dimension_numbers<[1], [0], [0], [1], [0, 0, 1, 1], [], []>} : vector<2x32xf32>, vector<32x128xf32>, vector<2x128xf32> -> vector<2x128xf32>
    %209 = vector.extract_strided_slice %201 {offsets = [2, 0], sizes = [2, 32], strides = [1, 1]} : vector<4x32xf32> to vector<2x32xf32>
    %cst_87 = arith.constant dense<0.000000e+00> : vector<2x128xf32>
    %210 = tpu.matmul %209, %97, %cst_87 {dimension_numbers = #tpu.dot_dimension_numbers<[1], [0], [0], [1], [0, 0, 1, 1], [], []>} : vector<2x32xf32>, vector<32x128xf32>, vector<2x128xf32> -> vector<2x128xf32>
    %211 = tpu.concatenate %208, %210 in 0 : vector<2x128xf32>, vector<2x128xf32> -> vector<4x128xf32>
    %212 = arith.addf %206, %211 : vector<4x128xf32>
    %213 = arith.negf %212 : vector<4x128xf32>
    %214 = math.exp %213 : vector<4x128xf32>
    %cst_88 = arith.constant 1.000000e+00 : f32
    %215 = vector.broadcast %cst_88 : f32 to vector<4x128xf32>
    %216 = arith.addf %215, %214 : vector<4x128xf32>
    %217 = arith.divf %215, %216 : vector<4x128xf32>
    %218 = vector.extract_strided_slice %212 {offsets = [0, 64], sizes = [4, 32], strides = [1, 1]} : vector<4x128xf32> to vector<4x32xf32>
    %219 = math.tanh %218 : vector<4x32xf32>
    %220 = vector.extract_strided_slice %217 {offsets = [0, 32], sizes = [4, 32], strides = [1, 1]} : vector<4x128xf32> to vector<4x32xf32>
    %221 = arith.mulf %220, %198 : vector<4x32xf32>
    %222 = vector.extract_strided_slice %217 {offsets = [0, 0], sizes = [4, 32], strides = [1, 1]} : vector<4x128xf32> to vector<4x32xf32>
    %223 = arith.mulf %222, %219 : vector<4x32xf32>
    %224 = arith.addf %221, %223 : vector<4x32xf32>
    %225 = vector.extract_strided_slice %217 {offsets = [0, 96], sizes = [4, 32], strides = [1, 1]} : vector<4x128xf32> to vector<4x32xf32>
    %226 = math.tanh %224 : vector<4x32xf32>
    %227 = arith.mulf %225, %226 : vector<4x32xf32>
    %228 = vector.extract_strided_slice %227 {offsets = [0, 0], sizes = [2, 32], strides = [1, 1]} : vector<4x32xf32> to vector<2x32xf32>
    %229 = vector.extract_strided_slice %227 {offsets = [2, 0], sizes = [2, 32], strides = [1, 1]} : vector<4x32xf32> to vector<2x32xf32>
    %230 = vector.extract_strided_slice %95 {offsets = [10, 0], sizes = [2, 128], strides = [1, 1]} : vector<16x256xf32> to vector<2x128xf32>
    %231 = vector.extract_strided_slice %95 {offsets = [4, 128], sizes = [2, 128], strides = [1, 1]} : vector<16x256xf32> to vector<2x128xf32>
    %232 = tpu.concatenate %230, %231 in 0 : vector<2x128xf32>, vector<2x128xf32> -> vector<4x128xf32>
    %233 = vector.extract_strided_slice %227 {offsets = [0, 0], sizes = [2, 32], strides = [1, 1]} : vector<4x32xf32> to vector<2x32xf32>
    %cst_89 = arith.constant dense<0.000000e+00> : vector<2x128xf32>
    %234 = tpu.matmul %233, %96, %cst_89 {dimension_numbers = #tpu.dot_dimension_numbers<[1], [0], [0], [1], [0, 0, 1, 1], [], []>} : vector<2x32xf32>, vector<32x128xf32>, vector<2x128xf32> -> vector<2x128xf32>
    %235 = vector.extract_strided_slice %227 {offsets = [2, 0], sizes = [2, 32], strides = [1, 1]} : vector<4x32xf32> to vector<2x32xf32>
    %cst_90 = arith.constant dense<0.000000e+00> : vector<2x128xf32>
    %236 = tpu.matmul %235, %97, %cst_90 {dimension_numbers = #tpu.dot_dimension_numbers<[1], [0], [0], [1], [0, 0, 1, 1], [], []>} : vector<2x32xf32>, vector<32x128xf32>, vector<2x128xf32> -> vector<2x128xf32>
    %237 = tpu.concatenate %234, %236 in 0 : vector<2x128xf32>, vector<2x128xf32> -> vector<4x128xf32>
    %238 = arith.addf %232, %237 : vector<4x128xf32>
    %239 = arith.negf %238 : vector<4x128xf32>
    %240 = math.exp %239 : vector<4x128xf32>
    %cst_91 = arith.constant 1.000000e+00 : f32
    %241 = vector.broadcast %cst_91 : f32 to vector<4x128xf32>
    %242 = arith.addf %241, %240 : vector<4x128xf32>
    %243 = arith.divf %241, %242 : vector<4x128xf32>
    %244 = vector.extract_strided_slice %238 {offsets = [0, 64], sizes = [4, 32], strides = [1, 1]} : vector<4x128xf32> to vector<4x32xf32>
    %245 = math.tanh %244 : vector<4x32xf32>
    %246 = vector.extract_strided_slice %243 {offsets = [0, 32], sizes = [4, 32], strides = [1, 1]} : vector<4x128xf32> to vector<4x32xf32>
    %247 = arith.mulf %246, %224 : vector<4x32xf32>
    %248 = vector.extract_strided_slice %243 {offsets = [0, 0], sizes = [4, 32], strides = [1, 1]} : vector<4x128xf32> to vector<4x32xf32>
    %249 = arith.mulf %248, %245 : vector<4x32xf32>
    %250 = arith.addf %247, %249 : vector<4x32xf32>
    %251 = vector.extract_strided_slice %243 {offsets = [0, 96], sizes = [4, 32], strides = [1, 1]} : vector<4x128xf32> to vector<4x32xf32>
    %252 = math.tanh %250 : vector<4x32xf32>
    %253 = arith.mulf %251, %252 : vector<4x32xf32>
    %254 = vector.extract_strided_slice %253 {offsets = [0, 0], sizes = [2, 32], strides = [1, 1]} : vector<4x32xf32> to vector<2x32xf32>
    %255 = vector.extract_strided_slice %253 {offsets = [2, 0], sizes = [2, 32], strides = [1, 1]} : vector<4x32xf32> to vector<2x32xf32>
    %256 = vector.extract_strided_slice %95 {offsets = [12, 0], sizes = [2, 128], strides = [1, 1]} : vector<16x256xf32> to vector<2x128xf32>
    %257 = vector.extract_strided_slice %95 {offsets = [2, 128], sizes = [2, 128], strides = [1, 1]} : vector<16x256xf32> to vector<2x128xf32>
    %258 = tpu.concatenate %256, %257 in 0 : vector<2x128xf32>, vector<2x128xf32> -> vector<4x128xf32>
    %259 = vector.extract_strided_slice %253 {offsets = [0, 0], sizes = [2, 32], strides = [1, 1]} : vector<4x32xf32> to vector<2x32xf32>
    %cst_92 = arith.constant dense<0.000000e+00> : vector<2x128xf32>
    %260 = tpu.matmul %259, %96, %cst_92 {dimension_numbers = #tpu.dot_dimension_numbers<[1], [0], [0], [1], [0, 0, 1, 1], [], []>} : vector<2x32xf32>, vector<32x128xf32>, vector<2x128xf32> -> vector<2x128xf32>
    %261 = vector.extract_strided_slice %253 {offsets = [2, 0], sizes = [2, 32], strides = [1, 1]} : vector<4x32xf32> to vector<2x32xf32>
    %cst_93 = arith.constant dense<0.000000e+00> : vector<2x128xf32>
    %262 = tpu.matmul %261, %97, %cst_93 {dimension_numbers = #tpu.dot_dimension_numbers<[1], [0], [0], [1], [0, 0, 1, 1], [], []>} : vector<2x32xf32>, vector<32x128xf32>, vector<2x128xf32> -> vector<2x128xf32>
    %263 = tpu.concatenate %260, %262 in 0 : vector<2x128xf32>, vector<2x128xf32> -> vector<4x128xf32>
    %264 = arith.addf %258, %263 : vector<4x128xf32>
    %265 = arith.negf %264 : vector<4x128xf32>
    %266 = math.exp %265 : vector<4x128xf32>
    %cst_94 = arith.constant 1.000000e+00 : f32
    %267 = vector.broadcast %cst_94 : f32 to vector<4x128xf32>
    %268 = arith.addf %267, %266 : vector<4x128xf32>
    %269 = arith.divf %267, %268 : vector<4x128xf32>
    %270 = vector.extract_strided_slice %264 {offsets = [0, 64], sizes = [4, 32], strides = [1, 1]} : vector<4x128xf32> to vector<4x32xf32>
    %271 = math.tanh %270 : vector<4x32xf32>
    %272 = vector.extract_strided_slice %269 {offsets = [0, 32], sizes = [4, 32], strides = [1, 1]} : vector<4x128xf32> to vector<4x32xf32>
    %273 = arith.mulf %272, %250 : vector<4x32xf32>
    %274 = vector.extract_strided_slice %269 {offsets = [0, 0], sizes = [4, 32], strides = [1, 1]} : vector<4x128xf32> to vector<4x32xf32>
    %275 = arith.mulf %274, %271 : vector<4x32xf32>
    %276 = arith.addf %273, %275 : vector<4x32xf32>
    %277 = vector.extract_strided_slice %269 {offsets = [0, 96], sizes = [4, 32], strides = [1, 1]} : vector<4x128xf32> to vector<4x32xf32>
    %278 = math.tanh %276 : vector<4x32xf32>
    %279 = arith.mulf %277, %278 : vector<4x32xf32>
    %280 = vector.extract_strided_slice %279 {offsets = [0, 0], sizes = [2, 32], strides = [1, 1]} : vector<4x32xf32> to vector<2x32xf32>
    %281 = vector.extract_strided_slice %279 {offsets = [2, 0], sizes = [2, 32], strides = [1, 1]} : vector<4x32xf32> to vector<2x32xf32>
    %282 = vector.extract_strided_slice %95 {offsets = [14, 0], sizes = [2, 128], strides = [1, 1]} : vector<16x256xf32> to vector<2x128xf32>
    %283 = vector.extract_strided_slice %95 {offsets = [0, 128], sizes = [2, 128], strides = [1, 1]} : vector<16x256xf32> to vector<2x128xf32>
    %284 = tpu.concatenate %282, %283 in 0 : vector<2x128xf32>, vector<2x128xf32> -> vector<4x128xf32>
    %285 = vector.extract_strided_slice %279 {offsets = [0, 0], sizes = [2, 32], strides = [1, 1]} : vector<4x32xf32> to vector<2x32xf32>
    %cst_95 = arith.constant dense<0.000000e+00> : vector<2x128xf32>
    %286 = tpu.matmul %285, %96, %cst_95 {dimension_numbers = #tpu.dot_dimension_numbers<[1], [0], [0], [1], [0, 0, 1, 1], [], []>} : vector<2x32xf32>, vector<32x128xf32>, vector<2x128xf32> -> vector<2x128xf32>
    %287 = vector.extract_strided_slice %279 {offsets = [2, 0], sizes = [2, 32], strides = [1, 1]} : vector<4x32xf32> to vector<2x32xf32>
    %cst_96 = arith.constant dense<0.000000e+00> : vector<2x128xf32>
    %288 = tpu.matmul %287, %97, %cst_96 {dimension_numbers = #tpu.dot_dimension_numbers<[1], [0], [0], [1], [0, 0, 1, 1], [], []>} : vector<2x32xf32>, vector<32x128xf32>, vector<2x128xf32> -> vector<2x128xf32>
    %289 = tpu.concatenate %286, %288 in 0 : vector<2x128xf32>, vector<2x128xf32> -> vector<4x128xf32>
    %290 = arith.addf %284, %289 : vector<4x128xf32>
    %291 = arith.negf %290 : vector<4x128xf32>
    %292 = math.exp %291 : vector<4x128xf32>
    %cst_97 = arith.constant 1.000000e+00 : f32
    %293 = vector.broadcast %cst_97 : f32 to vector<4x128xf32>
    %294 = arith.addf %293, %292 : vector<4x128xf32>
    %295 = arith.divf %293, %294 : vector<4x128xf32>
    %296 = vector.extract_strided_slice %290 {offsets = [0, 64], sizes = [4, 32], strides = [1, 1]} : vector<4x128xf32> to vector<4x32xf32>
    %297 = math.tanh %296 : vector<4x32xf32>
    %298 = vector.extract_strided_slice %295 {offsets = [0, 32], sizes = [4, 32], strides = [1, 1]} : vector<4x128xf32> to vector<4x32xf32>
    %299 = arith.mulf %298, %276 : vector<4x32xf32>
    %300 = vector.extract_strided_slice %295 {offsets = [0, 0], sizes = [4, 32], strides = [1, 1]} : vector<4x128xf32> to vector<4x32xf32>
    %301 = arith.mulf %300, %297 : vector<4x32xf32>
    %302 = arith.addf %299, %301 : vector<4x32xf32>
    %303 = vector.extract_strided_slice %295 {offsets = [0, 96], sizes = [4, 32], strides = [1, 1]} : vector<4x128xf32> to vector<4x32xf32>
    %304 = math.tanh %302 : vector<4x32xf32>
    %305 = arith.mulf %303, %304 : vector<4x32xf32>
    %306 = vector.extract_strided_slice %305 {offsets = [0, 0], sizes = [2, 32], strides = [1, 1]} : vector<4x32xf32> to vector<2x32xf32>
    %307 = vector.extract_strided_slice %305 {offsets = [2, 0], sizes = [2, 32], strides = [1, 1]} : vector<4x32xf32> to vector<2x32xf32>
    %308 = tpu.concatenate %124, %150, %176, %202, %228, %254, %280, %306 in 0 : vector<2x32xf32>, vector<2x32xf32>, vector<2x32xf32>, vector<2x32xf32>, vector<2x32xf32>, vector<2x32xf32>, vector<2x32xf32>, vector<2x32xf32> -> vector<16x32xf32>
    %309 = tpu.concatenate %307, %281, %255, %229, %203, %177, %151, %125 in 0 : vector<2x32xf32>, vector<2x32xf32>, vector<2x32xf32>, vector<2x32xf32>, vector<2x32xf32>, vector<2x32xf32>, vector<2x32xf32>, vector<2x32xf32> -> vector<16x32xf32>
    %c0_98 = arith.constant 0 : index
    %c0_99 = arith.constant 0 : index
    %310 = vector.load %arg11[%c0_98, %c0_99] : memref<64x128xf32, #tpu.memory_space<vmem>>, vector<64x128xf32>
    %311 = vector.extract_strided_slice %310 {offsets = [0, 0], sizes = [32, 128], strides = [1, 1]} : vector<64x128xf32> to vector<32x128xf32>
    %cst_100 = arith.constant dense<0.000000e+00> : vector<16x128xf32>
    %312 = tpu.matmul %308, %311, %cst_100 {dimension_numbers = #tpu.dot_dimension_numbers<[1], [0], [0], [1], [0, 0, 1, 1], [], []>} : vector<16x32xf32>, vector<32x128xf32>, vector<16x128xf32> -> vector<16x128xf32>
    %313 = vector.extract_strided_slice %310 {offsets = [32, 0], sizes = [32, 128], strides = [1, 1]} : vector<64x128xf32> to vector<32x128xf32>
    %cst_101 = arith.constant dense<0.000000e+00> : vector<16x128xf32>
    %314 = tpu.matmul %309, %313, %cst_101 {dimension_numbers = #tpu.dot_dimension_numbers<[1], [0], [0], [1], [0, 0, 1, 1], [], []>} : vector<16x32xf32>, vector<32x128xf32>, vector<16x128xf32> -> vector<16x128xf32>
    %315 = arith.addf %312, %314 : vector<16x128xf32>
    %c0_102 = arith.constant 0 : index
    %c0_103 = arith.constant 0 : index
    %316 = vector.load %arg12[%c0_102, %c0_103] : memref<1x128xf32, #tpu.memory_space<vmem>>, vector<1x128xf32>
    %317 = vector.broadcast %316 : vector<1x128xf32> to vector<16x128xf32>
    %318 = arith.addf %315, %317 : vector<16x128xf32>
    %c0_104 = arith.constant 0 : index
    %c0_105 = arith.constant 0 : index
    %319 = vector.load %arg13[%c0_104, %c0_105] : memref<16x64xf32, #tpu.memory_space<vmem>>, vector<16x64xf32>
    %c0_106 = arith.constant 0 : index
    %c0_107 = arith.constant 0 : index
    %320 = vector.load %arg14[%c0_106, %c0_107] : memref<16x64xf32, #tpu.memory_space<vmem>>, vector<16x64xf32>
    %cst_108 = arith.constant 0.000000e+00 : f32
    %321 = vector.broadcast %cst_108 : f32 to vector<4x16xf32>
    %cst_109 = arith.constant 0.000000e+00 : f32
    %322 = vector.broadcast %cst_109 : f32 to vector<4x16xf32>
    %323 = vector.extract_strided_slice %318 {offsets = [0, 0], sizes = [2, 64], strides = [1, 1]} : vector<16x128xf32> to vector<2x64xf32>
    %324 = vector.extract_strided_slice %318 {offsets = [14, 64], sizes = [2, 64], strides = [1, 1]} : vector<16x128xf32> to vector<2x64xf32>
    %325 = tpu.concatenate %323, %324 in 0 : vector<2x64xf32>, vector<2x64xf32> -> vector<4x64xf32>
    %326 = vector.extract_strided_slice %321 {offsets = [0, 0], sizes = [2, 16], strides = [1, 1]} : vector<4x16xf32> to vector<2x16xf32>
    %cst_110 = arith.constant dense<0.000000e+00> : vector<2x64xf32>
    %327 = tpu.matmul %326, %319, %cst_110 {dimension_numbers = #tpu.dot_dimension_numbers<[1], [0], [0], [1], [0, 0, 1, 1], [], []>} : vector<2x16xf32>, vector<16x64xf32>, vector<2x64xf32> -> vector<2x64xf32>
    %328 = vector.extract_strided_slice %321 {offsets = [2, 0], sizes = [2, 16], strides = [1, 1]} : vector<4x16xf32> to vector<2x16xf32>
    %cst_111 = arith.constant dense<0.000000e+00> : vector<2x64xf32>
    %329 = tpu.matmul %328, %320, %cst_111 {dimension_numbers = #tpu.dot_dimension_numbers<[1], [0], [0], [1], [0, 0, 1, 1], [], []>} : vector<2x16xf32>, vector<16x64xf32>, vector<2x64xf32> -> vector<2x64xf32>
    %330 = tpu.concatenate %327, %329 in 0 : vector<2x64xf32>, vector<2x64xf32> -> vector<4x64xf32>
    %331 = arith.addf %325, %330 : vector<4x64xf32>
    %332 = arith.negf %331 : vector<4x64xf32>
    %333 = math.exp %332 : vector<4x64xf32>
    %cst_112 = arith.constant 1.000000e+00 : f32
    %334 = vector.broadcast %cst_112 : f32 to vector<4x64xf32>
    %335 = arith.addf %334, %333 : vector<4x64xf32>
    %336 = arith.divf %334, %335 : vector<4x64xf32>
    %337 = vector.extract_strided_slice %331 {offsets = [0, 32], sizes = [4, 16], strides = [1, 1]} : vector<4x64xf32> to vector<4x16xf32>
    %338 = math.tanh %337 : vector<4x16xf32>
    %339 = vector.extract_strided_slice %336 {offsets = [0, 16], sizes = [4, 16], strides = [1, 1]} : vector<4x64xf32> to vector<4x16xf32>
    %340 = arith.mulf %339, %322 : vector<4x16xf32>
    %341 = vector.extract_strided_slice %336 {offsets = [0, 0], sizes = [4, 16], strides = [1, 1]} : vector<4x64xf32> to vector<4x16xf32>
    %342 = arith.mulf %341, %338 : vector<4x16xf32>
    %343 = arith.addf %340, %342 : vector<4x16xf32>
    %344 = vector.extract_strided_slice %336 {offsets = [0, 48], sizes = [4, 16], strides = [1, 1]} : vector<4x64xf32> to vector<4x16xf32>
    %345 = math.tanh %343 : vector<4x16xf32>
    %346 = arith.mulf %344, %345 : vector<4x16xf32>
    %347 = vector.extract_strided_slice %346 {offsets = [0, 0], sizes = [2, 16], strides = [1, 1]} : vector<4x16xf32> to vector<2x16xf32>
    %348 = vector.extract_strided_slice %346 {offsets = [2, 0], sizes = [2, 16], strides = [1, 1]} : vector<4x16xf32> to vector<2x16xf32>
    %349 = vector.extract_strided_slice %318 {offsets = [2, 0], sizes = [2, 64], strides = [1, 1]} : vector<16x128xf32> to vector<2x64xf32>
    %350 = vector.extract_strided_slice %318 {offsets = [12, 64], sizes = [2, 64], strides = [1, 1]} : vector<16x128xf32> to vector<2x64xf32>
    %351 = tpu.concatenate %349, %350 in 0 : vector<2x64xf32>, vector<2x64xf32> -> vector<4x64xf32>
    %352 = vector.extract_strided_slice %346 {offsets = [0, 0], sizes = [2, 16], strides = [1, 1]} : vector<4x16xf32> to vector<2x16xf32>
    %cst_113 = arith.constant dense<0.000000e+00> : vector<2x64xf32>
    %353 = tpu.matmul %352, %319, %cst_113 {dimension_numbers = #tpu.dot_dimension_numbers<[1], [0], [0], [1], [0, 0, 1, 1], [], []>} : vector<2x16xf32>, vector<16x64xf32>, vector<2x64xf32> -> vector<2x64xf32>
    %354 = vector.extract_strided_slice %346 {offsets = [2, 0], sizes = [2, 16], strides = [1, 1]} : vector<4x16xf32> to vector<2x16xf32>
    %cst_114 = arith.constant dense<0.000000e+00> : vector<2x64xf32>
    %355 = tpu.matmul %354, %320, %cst_114 {dimension_numbers = #tpu.dot_dimension_numbers<[1], [0], [0], [1], [0, 0, 1, 1], [], []>} : vector<2x16xf32>, vector<16x64xf32>, vector<2x64xf32> -> vector<2x64xf32>
    %356 = tpu.concatenate %353, %355 in 0 : vector<2x64xf32>, vector<2x64xf32> -> vector<4x64xf32>
    %357 = arith.addf %351, %356 : vector<4x64xf32>
    %358 = arith.negf %357 : vector<4x64xf32>
    %359 = math.exp %358 : vector<4x64xf32>
    %cst_115 = arith.constant 1.000000e+00 : f32
    %360 = vector.broadcast %cst_115 : f32 to vector<4x64xf32>
    %361 = arith.addf %360, %359 : vector<4x64xf32>
    %362 = arith.divf %360, %361 : vector<4x64xf32>
    %363 = vector.extract_strided_slice %357 {offsets = [0, 32], sizes = [4, 16], strides = [1, 1]} : vector<4x64xf32> to vector<4x16xf32>
    %364 = math.tanh %363 : vector<4x16xf32>
    %365 = vector.extract_strided_slice %362 {offsets = [0, 16], sizes = [4, 16], strides = [1, 1]} : vector<4x64xf32> to vector<4x16xf32>
    %366 = arith.mulf %365, %343 : vector<4x16xf32>
    %367 = vector.extract_strided_slice %362 {offsets = [0, 0], sizes = [4, 16], strides = [1, 1]} : vector<4x64xf32> to vector<4x16xf32>
    %368 = arith.mulf %367, %364 : vector<4x16xf32>
    %369 = arith.addf %366, %368 : vector<4x16xf32>
    %370 = vector.extract_strided_slice %362 {offsets = [0, 48], sizes = [4, 16], strides = [1, 1]} : vector<4x64xf32> to vector<4x16xf32>
    %371 = math.tanh %369 : vector<4x16xf32>
    %372 = arith.mulf %370, %371 : vector<4x16xf32>
    %373 = vector.extract_strided_slice %372 {offsets = [0, 0], sizes = [2, 16], strides = [1, 1]} : vector<4x16xf32> to vector<2x16xf32>
    %374 = vector.extract_strided_slice %372 {offsets = [2, 0], sizes = [2, 16], strides = [1, 1]} : vector<4x16xf32> to vector<2x16xf32>
    %375 = vector.extract_strided_slice %318 {offsets = [4, 0], sizes = [2, 64], strides = [1, 1]} : vector<16x128xf32> to vector<2x64xf32>
    %376 = vector.extract_strided_slice %318 {offsets = [10, 64], sizes = [2, 64], strides = [1, 1]} : vector<16x128xf32> to vector<2x64xf32>
    %377 = tpu.concatenate %375, %376 in 0 : vector<2x64xf32>, vector<2x64xf32> -> vector<4x64xf32>
    %378 = vector.extract_strided_slice %372 {offsets = [0, 0], sizes = [2, 16], strides = [1, 1]} : vector<4x16xf32> to vector<2x16xf32>
    %cst_116 = arith.constant dense<0.000000e+00> : vector<2x64xf32>
    %379 = tpu.matmul %378, %319, %cst_116 {dimension_numbers = #tpu.dot_dimension_numbers<[1], [0], [0], [1], [0, 0, 1, 1], [], []>} : vector<2x16xf32>, vector<16x64xf32>, vector<2x64xf32> -> vector<2x64xf32>
    %380 = vector.extract_strided_slice %372 {offsets = [2, 0], sizes = [2, 16], strides = [1, 1]} : vector<4x16xf32> to vector<2x16xf32>
    %cst_117 = arith.constant dense<0.000000e+00> : vector<2x64xf32>
    %381 = tpu.matmul %380, %320, %cst_117 {dimension_numbers = #tpu.dot_dimension_numbers<[1], [0], [0], [1], [0, 0, 1, 1], [], []>} : vector<2x16xf32>, vector<16x64xf32>, vector<2x64xf32> -> vector<2x64xf32>
    %382 = tpu.concatenate %379, %381 in 0 : vector<2x64xf32>, vector<2x64xf32> -> vector<4x64xf32>
    %383 = arith.addf %377, %382 : vector<4x64xf32>
    %384 = arith.negf %383 : vector<4x64xf32>
    %385 = math.exp %384 : vector<4x64xf32>
    %cst_118 = arith.constant 1.000000e+00 : f32
    %386 = vector.broadcast %cst_118 : f32 to vector<4x64xf32>
    %387 = arith.addf %386, %385 : vector<4x64xf32>
    %388 = arith.divf %386, %387 : vector<4x64xf32>
    %389 = vector.extract_strided_slice %383 {offsets = [0, 32], sizes = [4, 16], strides = [1, 1]} : vector<4x64xf32> to vector<4x16xf32>
    %390 = math.tanh %389 : vector<4x16xf32>
    %391 = vector.extract_strided_slice %388 {offsets = [0, 16], sizes = [4, 16], strides = [1, 1]} : vector<4x64xf32> to vector<4x16xf32>
    %392 = arith.mulf %391, %369 : vector<4x16xf32>
    %393 = vector.extract_strided_slice %388 {offsets = [0, 0], sizes = [4, 16], strides = [1, 1]} : vector<4x64xf32> to vector<4x16xf32>
    %394 = arith.mulf %393, %390 : vector<4x16xf32>
    %395 = arith.addf %392, %394 : vector<4x16xf32>
    %396 = vector.extract_strided_slice %388 {offsets = [0, 48], sizes = [4, 16], strides = [1, 1]} : vector<4x64xf32> to vector<4x16xf32>
    %397 = math.tanh %395 : vector<4x16xf32>
    %398 = arith.mulf %396, %397 : vector<4x16xf32>
    %399 = vector.extract_strided_slice %398 {offsets = [0, 0], sizes = [2, 16], strides = [1, 1]} : vector<4x16xf32> to vector<2x16xf32>
    %400 = vector.extract_strided_slice %398 {offsets = [2, 0], sizes = [2, 16], strides = [1, 1]} : vector<4x16xf32> to vector<2x16xf32>
    %401 = vector.extract_strided_slice %318 {offsets = [6, 0], sizes = [2, 64], strides = [1, 1]} : vector<16x128xf32> to vector<2x64xf32>
    %402 = vector.extract_strided_slice %318 {offsets = [8, 64], sizes = [2, 64], strides = [1, 1]} : vector<16x128xf32> to vector<2x64xf32>
    %403 = tpu.concatenate %401, %402 in 0 : vector<2x64xf32>, vector<2x64xf32> -> vector<4x64xf32>
    %404 = vector.extract_strided_slice %398 {offsets = [0, 0], sizes = [2, 16], strides = [1, 1]} : vector<4x16xf32> to vector<2x16xf32>
    %cst_119 = arith.constant dense<0.000000e+00> : vector<2x64xf32>
    %405 = tpu.matmul %404, %319, %cst_119 {dimension_numbers = #tpu.dot_dimension_numbers<[1], [0], [0], [1], [0, 0, 1, 1], [], []>} : vector<2x16xf32>, vector<16x64xf32>, vector<2x64xf32> -> vector<2x64xf32>
    %406 = vector.extract_strided_slice %398 {offsets = [2, 0], sizes = [2, 16], strides = [1, 1]} : vector<4x16xf32> to vector<2x16xf32>
    %cst_120 = arith.constant dense<0.000000e+00> : vector<2x64xf32>
    %407 = tpu.matmul %406, %320, %cst_120 {dimension_numbers = #tpu.dot_dimension_numbers<[1], [0], [0], [1], [0, 0, 1, 1], [], []>} : vector<2x16xf32>, vector<16x64xf32>, vector<2x64xf32> -> vector<2x64xf32>
    %408 = tpu.concatenate %405, %407 in 0 : vector<2x64xf32>, vector<2x64xf32> -> vector<4x64xf32>
    %409 = arith.addf %403, %408 : vector<4x64xf32>
    %410 = arith.negf %409 : vector<4x64xf32>
    %411 = math.exp %410 : vector<4x64xf32>
    %cst_121 = arith.constant 1.000000e+00 : f32
    %412 = vector.broadcast %cst_121 : f32 to vector<4x64xf32>
    %413 = arith.addf %412, %411 : vector<4x64xf32>
    %414 = arith.divf %412, %413 : vector<4x64xf32>
    %415 = vector.extract_strided_slice %409 {offsets = [0, 32], sizes = [4, 16], strides = [1, 1]} : vector<4x64xf32> to vector<4x16xf32>
    %416 = math.tanh %415 : vector<4x16xf32>
    %417 = vector.extract_strided_slice %414 {offsets = [0, 16], sizes = [4, 16], strides = [1, 1]} : vector<4x64xf32> to vector<4x16xf32>
    %418 = arith.mulf %417, %395 : vector<4x16xf32>
    %419 = vector.extract_strided_slice %414 {offsets = [0, 0], sizes = [4, 16], strides = [1, 1]} : vector<4x64xf32> to vector<4x16xf32>
    %420 = arith.mulf %419, %416 : vector<4x16xf32>
    %421 = arith.addf %418, %420 : vector<4x16xf32>
    %422 = vector.extract_strided_slice %414 {offsets = [0, 48], sizes = [4, 16], strides = [1, 1]} : vector<4x64xf32> to vector<4x16xf32>
    %423 = math.tanh %421 : vector<4x16xf32>
    %424 = arith.mulf %422, %423 : vector<4x16xf32>
    %425 = vector.extract_strided_slice %424 {offsets = [0, 0], sizes = [2, 16], strides = [1, 1]} : vector<4x16xf32> to vector<2x16xf32>
    %426 = vector.extract_strided_slice %424 {offsets = [2, 0], sizes = [2, 16], strides = [1, 1]} : vector<4x16xf32> to vector<2x16xf32>
    %427 = vector.extract_strided_slice %318 {offsets = [8, 0], sizes = [2, 64], strides = [1, 1]} : vector<16x128xf32> to vector<2x64xf32>
    %428 = vector.extract_strided_slice %318 {offsets = [6, 64], sizes = [2, 64], strides = [1, 1]} : vector<16x128xf32> to vector<2x64xf32>
    %429 = tpu.concatenate %427, %428 in 0 : vector<2x64xf32>, vector<2x64xf32> -> vector<4x64xf32>
    %430 = vector.extract_strided_slice %424 {offsets = [0, 0], sizes = [2, 16], strides = [1, 1]} : vector<4x16xf32> to vector<2x16xf32>
    %cst_122 = arith.constant dense<0.000000e+00> : vector<2x64xf32>
    %431 = tpu.matmul %430, %319, %cst_122 {dimension_numbers = #tpu.dot_dimension_numbers<[1], [0], [0], [1], [0, 0, 1, 1], [], []>} : vector<2x16xf32>, vector<16x64xf32>, vector<2x64xf32> -> vector<2x64xf32>
    %432 = vector.extract_strided_slice %424 {offsets = [2, 0], sizes = [2, 16], strides = [1, 1]} : vector<4x16xf32> to vector<2x16xf32>
    %cst_123 = arith.constant dense<0.000000e+00> : vector<2x64xf32>
    %433 = tpu.matmul %432, %320, %cst_123 {dimension_numbers = #tpu.dot_dimension_numbers<[1], [0], [0], [1], [0, 0, 1, 1], [], []>} : vector<2x16xf32>, vector<16x64xf32>, vector<2x64xf32> -> vector<2x64xf32>
    %434 = tpu.concatenate %431, %433 in 0 : vector<2x64xf32>, vector<2x64xf32> -> vector<4x64xf32>
    %435 = arith.addf %429, %434 : vector<4x64xf32>
    %436 = arith.negf %435 : vector<4x64xf32>
    %437 = math.exp %436 : vector<4x64xf32>
    %cst_124 = arith.constant 1.000000e+00 : f32
    %438 = vector.broadcast %cst_124 : f32 to vector<4x64xf32>
    %439 = arith.addf %438, %437 : vector<4x64xf32>
    %440 = arith.divf %438, %439 : vector<4x64xf32>
    %441 = vector.extract_strided_slice %435 {offsets = [0, 32], sizes = [4, 16], strides = [1, 1]} : vector<4x64xf32> to vector<4x16xf32>
    %442 = math.tanh %441 : vector<4x16xf32>
    %443 = vector.extract_strided_slice %440 {offsets = [0, 16], sizes = [4, 16], strides = [1, 1]} : vector<4x64xf32> to vector<4x16xf32>
    %444 = arith.mulf %443, %421 : vector<4x16xf32>
    %445 = vector.extract_strided_slice %440 {offsets = [0, 0], sizes = [4, 16], strides = [1, 1]} : vector<4x64xf32> to vector<4x16xf32>
    %446 = arith.mulf %445, %442 : vector<4x16xf32>
    %447 = arith.addf %444, %446 : vector<4x16xf32>
    %448 = vector.extract_strided_slice %440 {offsets = [0, 48], sizes = [4, 16], strides = [1, 1]} : vector<4x64xf32> to vector<4x16xf32>
    %449 = math.tanh %447 : vector<4x16xf32>
    %450 = arith.mulf %448, %449 : vector<4x16xf32>
    %451 = vector.extract_strided_slice %450 {offsets = [0, 0], sizes = [2, 16], strides = [1, 1]} : vector<4x16xf32> to vector<2x16xf32>
    %452 = vector.extract_strided_slice %450 {offsets = [2, 0], sizes = [2, 16], strides = [1, 1]} : vector<4x16xf32> to vector<2x16xf32>
    %453 = vector.extract_strided_slice %318 {offsets = [10, 0], sizes = [2, 64], strides = [1, 1]} : vector<16x128xf32> to vector<2x64xf32>
    %454 = vector.extract_strided_slice %318 {offsets = [4, 64], sizes = [2, 64], strides = [1, 1]} : vector<16x128xf32> to vector<2x64xf32>
    %455 = tpu.concatenate %453, %454 in 0 : vector<2x64xf32>, vector<2x64xf32> -> vector<4x64xf32>
    %456 = vector.extract_strided_slice %450 {offsets = [0, 0], sizes = [2, 16], strides = [1, 1]} : vector<4x16xf32> to vector<2x16xf32>
    %cst_125 = arith.constant dense<0.000000e+00> : vector<2x64xf32>
    %457 = tpu.matmul %456, %319, %cst_125 {dimension_numbers = #tpu.dot_dimension_numbers<[1], [0], [0], [1], [0, 0, 1, 1], [], []>} : vector<2x16xf32>, vector<16x64xf32>, vector<2x64xf32> -> vector<2x64xf32>
    %458 = vector.extract_strided_slice %450 {offsets = [2, 0], sizes = [2, 16], strides = [1, 1]} : vector<4x16xf32> to vector<2x16xf32>
    %cst_126 = arith.constant dense<0.000000e+00> : vector<2x64xf32>
    %459 = tpu.matmul %458, %320, %cst_126 {dimension_numbers = #tpu.dot_dimension_numbers<[1], [0], [0], [1], [0, 0, 1, 1], [], []>} : vector<2x16xf32>, vector<16x64xf32>, vector<2x64xf32> -> vector<2x64xf32>
    %460 = tpu.concatenate %457, %459 in 0 : vector<2x64xf32>, vector<2x64xf32> -> vector<4x64xf32>
    %461 = arith.addf %455, %460 : vector<4x64xf32>
    %462 = arith.negf %461 : vector<4x64xf32>
    %463 = math.exp %462 : vector<4x64xf32>
    %cst_127 = arith.constant 1.000000e+00 : f32
    %464 = vector.broadcast %cst_127 : f32 to vector<4x64xf32>
    %465 = arith.addf %464, %463 : vector<4x64xf32>
    %466 = arith.divf %464, %465 : vector<4x64xf32>
    %467 = vector.extract_strided_slice %461 {offsets = [0, 32], sizes = [4, 16], strides = [1, 1]} : vector<4x64xf32> to vector<4x16xf32>
    %468 = math.tanh %467 : vector<4x16xf32>
    %469 = vector.extract_strided_slice %466 {offsets = [0, 16], sizes = [4, 16], strides = [1, 1]} : vector<4x64xf32> to vector<4x16xf32>
    %470 = arith.mulf %469, %447 : vector<4x16xf32>
    %471 = vector.extract_strided_slice %466 {offsets = [0, 0], sizes = [4, 16], strides = [1, 1]} : vector<4x64xf32> to vector<4x16xf32>
    %472 = arith.mulf %471, %468 : vector<4x16xf32>
    %473 = arith.addf %470, %472 : vector<4x16xf32>
    %474 = vector.extract_strided_slice %466 {offsets = [0, 48], sizes = [4, 16], strides = [1, 1]} : vector<4x64xf32> to vector<4x16xf32>
    %475 = math.tanh %473 : vector<4x16xf32>
    %476 = arith.mulf %474, %475 : vector<4x16xf32>
    %477 = vector.extract_strided_slice %476 {offsets = [0, 0], sizes = [2, 16], strides = [1, 1]} : vector<4x16xf32> to vector<2x16xf32>
    %478 = vector.extract_strided_slice %476 {offsets = [2, 0], sizes = [2, 16], strides = [1, 1]} : vector<4x16xf32> to vector<2x16xf32>
    %479 = vector.extract_strided_slice %318 {offsets = [12, 0], sizes = [2, 64], strides = [1, 1]} : vector<16x128xf32> to vector<2x64xf32>
    %480 = vector.extract_strided_slice %318 {offsets = [2, 64], sizes = [2, 64], strides = [1, 1]} : vector<16x128xf32> to vector<2x64xf32>
    %481 = tpu.concatenate %479, %480 in 0 : vector<2x64xf32>, vector<2x64xf32> -> vector<4x64xf32>
    %482 = vector.extract_strided_slice %476 {offsets = [0, 0], sizes = [2, 16], strides = [1, 1]} : vector<4x16xf32> to vector<2x16xf32>
    %cst_128 = arith.constant dense<0.000000e+00> : vector<2x64xf32>
    %483 = tpu.matmul %482, %319, %cst_128 {dimension_numbers = #tpu.dot_dimension_numbers<[1], [0], [0], [1], [0, 0, 1, 1], [], []>} : vector<2x16xf32>, vector<16x64xf32>, vector<2x64xf32> -> vector<2x64xf32>
    %484 = vector.extract_strided_slice %476 {offsets = [2, 0], sizes = [2, 16], strides = [1, 1]} : vector<4x16xf32> to vector<2x16xf32>
    %cst_129 = arith.constant dense<0.000000e+00> : vector<2x64xf32>
    %485 = tpu.matmul %484, %320, %cst_129 {dimension_numbers = #tpu.dot_dimension_numbers<[1], [0], [0], [1], [0, 0, 1, 1], [], []>} : vector<2x16xf32>, vector<16x64xf32>, vector<2x64xf32> -> vector<2x64xf32>
    %486 = tpu.concatenate %483, %485 in 0 : vector<2x64xf32>, vector<2x64xf32> -> vector<4x64xf32>
    %487 = arith.addf %481, %486 : vector<4x64xf32>
    %488 = arith.negf %487 : vector<4x64xf32>
    %489 = math.exp %488 : vector<4x64xf32>
    %cst_130 = arith.constant 1.000000e+00 : f32
    %490 = vector.broadcast %cst_130 : f32 to vector<4x64xf32>
    %491 = arith.addf %490, %489 : vector<4x64xf32>
    %492 = arith.divf %490, %491 : vector<4x64xf32>
    %493 = vector.extract_strided_slice %487 {offsets = [0, 32], sizes = [4, 16], strides = [1, 1]} : vector<4x64xf32> to vector<4x16xf32>
    %494 = math.tanh %493 : vector<4x16xf32>
    %495 = vector.extract_strided_slice %492 {offsets = [0, 16], sizes = [4, 16], strides = [1, 1]} : vector<4x64xf32> to vector<4x16xf32>
    %496 = arith.mulf %495, %473 : vector<4x16xf32>
    %497 = vector.extract_strided_slice %492 {offsets = [0, 0], sizes = [4, 16], strides = [1, 1]} : vector<4x64xf32> to vector<4x16xf32>
    %498 = arith.mulf %497, %494 : vector<4x16xf32>
    %499 = arith.addf %496, %498 : vector<4x16xf32>
    %500 = vector.extract_strided_slice %492 {offsets = [0, 48], sizes = [4, 16], strides = [1, 1]} : vector<4x64xf32> to vector<4x16xf32>
    %501 = math.tanh %499 : vector<4x16xf32>
    %502 = arith.mulf %500, %501 : vector<4x16xf32>
    %503 = vector.extract_strided_slice %502 {offsets = [0, 0], sizes = [2, 16], strides = [1, 1]} : vector<4x16xf32> to vector<2x16xf32>
    %504 = vector.extract_strided_slice %502 {offsets = [2, 0], sizes = [2, 16], strides = [1, 1]} : vector<4x16xf32> to vector<2x16xf32>
    %505 = vector.extract_strided_slice %318 {offsets = [14, 0], sizes = [2, 64], strides = [1, 1]} : vector<16x128xf32> to vector<2x64xf32>
    %506 = vector.extract_strided_slice %318 {offsets = [0, 64], sizes = [2, 64], strides = [1, 1]} : vector<16x128xf32> to vector<2x64xf32>
    %507 = tpu.concatenate %505, %506 in 0 : vector<2x64xf32>, vector<2x64xf32> -> vector<4x64xf32>
    %508 = vector.extract_strided_slice %502 {offsets = [0, 0], sizes = [2, 16], strides = [1, 1]} : vector<4x16xf32> to vector<2x16xf32>
    %cst_131 = arith.constant dense<0.000000e+00> : vector<2x64xf32>
    %509 = tpu.matmul %508, %319, %cst_131 {dimension_numbers = #tpu.dot_dimension_numbers<[1], [0], [0], [1], [0, 0, 1, 1], [], []>} : vector<2x16xf32>, vector<16x64xf32>, vector<2x64xf32> -> vector<2x64xf32>
    %510 = vector.extract_strided_slice %502 {offsets = [2, 0], sizes = [2, 16], strides = [1, 1]} : vector<4x16xf32> to vector<2x16xf32>
    %cst_132 = arith.constant dense<0.000000e+00> : vector<2x64xf32>
    %511 = tpu.matmul %510, %320, %cst_132 {dimension_numbers = #tpu.dot_dimension_numbers<[1], [0], [0], [1], [0, 0, 1, 1], [], []>} : vector<2x16xf32>, vector<16x64xf32>, vector<2x64xf32> -> vector<2x64xf32>
    %512 = tpu.concatenate %509, %511 in 0 : vector<2x64xf32>, vector<2x64xf32> -> vector<4x64xf32>
    %513 = arith.addf %507, %512 : vector<4x64xf32>
    %514 = arith.negf %513 : vector<4x64xf32>
    %515 = math.exp %514 : vector<4x64xf32>
    %cst_133 = arith.constant 1.000000e+00 : f32
    %516 = vector.broadcast %cst_133 : f32 to vector<4x64xf32>
    %517 = arith.addf %516, %515 : vector<4x64xf32>
    %518 = arith.divf %516, %517 : vector<4x64xf32>
    %519 = vector.extract_strided_slice %513 {offsets = [0, 32], sizes = [4, 16], strides = [1, 1]} : vector<4x64xf32> to vector<4x16xf32>
    %520 = math.tanh %519 : vector<4x16xf32>
    %521 = vector.extract_strided_slice %518 {offsets = [0, 16], sizes = [4, 16], strides = [1, 1]} : vector<4x64xf32> to vector<4x16xf32>
    %522 = arith.mulf %521, %499 : vector<4x16xf32>
    %523 = vector.extract_strided_slice %518 {offsets = [0, 0], sizes = [4, 16], strides = [1, 1]} : vector<4x64xf32> to vector<4x16xf32>
    %524 = arith.mulf %523, %520 : vector<4x16xf32>
    %525 = arith.addf %522, %524 : vector<4x16xf32>
    %526 = vector.extract_strided_slice %518 {offsets = [0, 48], sizes = [4, 16], strides = [1, 1]} : vector<4x64xf32> to vector<4x16xf32>
    %527 = math.tanh %525 : vector<4x16xf32>
    %528 = arith.mulf %526, %527 : vector<4x16xf32>
    %529 = vector.extract_strided_slice %528 {offsets = [0, 0], sizes = [2, 16], strides = [1, 1]} : vector<4x16xf32> to vector<2x16xf32>
    %530 = vector.extract_strided_slice %528 {offsets = [2, 0], sizes = [2, 16], strides = [1, 1]} : vector<4x16xf32> to vector<2x16xf32>
    %531 = tpu.concatenate %347, %373, %399, %425, %451, %477, %503, %529 in 0 : vector<2x16xf32>, vector<2x16xf32>, vector<2x16xf32>, vector<2x16xf32>, vector<2x16xf32>, vector<2x16xf32>, vector<2x16xf32>, vector<2x16xf32> -> vector<16x16xf32>
    %532 = tpu.concatenate %530, %504, %478, %452, %426, %400, %374, %348 in 0 : vector<2x16xf32>, vector<2x16xf32>, vector<2x16xf32>, vector<2x16xf32>, vector<2x16xf32>, vector<2x16xf32>, vector<2x16xf32>, vector<2x16xf32> -> vector<16x16xf32>
    %533 = vector.extract_strided_slice %531 {offsets = [14, 0], sizes = [2, 16], strides = [1, 1]} : vector<16x16xf32> to vector<2x16xf32>
    %534 = vector.extract_strided_slice %532 {offsets = [14, 0], sizes = [2, 16], strides = [1, 1]} : vector<16x16xf32> to vector<2x16xf32>
    %535 = tpu.concatenate %533, %534 in 1 : vector<2x16xf32>, vector<2x16xf32> -> vector<2x32xf32>
    %c0_134 = arith.constant 0 : index
    %c0_135 = arith.constant 0 : index
    %536 = vector.load %arg15[%c0_134, %c0_135] : memref<2x32xf32, #tpu.memory_space<vmem>>, vector<2x32xf32>
    tpu.vector_store %arg15[%c0_134, %c0_135], %535 {strides = array<i32>} : memref<2x32xf32, #tpu.memory_space<vmem>>, vector<2x32xf32>,
    return
  }
}

</mosaic_0001>

<bundles_post_ra>
// kernel: cnn_lstm_block.1
= control target key start
LH: loop header
LB: loop body
LE: loop exit
PB: predicated region body
PF: predicated region fallthrough
CT: control target
= control target key end

     0   :  { %vm78_vm0 = vcmask 1043456   ;;  %vm55_vm1 = vcmask 1045504   ;;  %vm73_vm2 = vcmask 31744   ;;  %vm176_vm3 = vcmask 1041408   ;;  %s3320_s0 = inlined_call_operand.vmem [shape: f32[16,4], index: 0, kind: input, shape index: {}]   ;;  %s3321_s1 = inlined_call_operand.vmem [shape: f32[7,4,8], index: 1, kind: input, shape index: {}]   ;;  %s3322_s2 = inlined_call_operand.vmem [shape: f32[1,8], index: 2, kind: input, shape index: {}]   ;;  %s3323_s3 = inlined_call_operand.vmem [shape: f32[1,8], index: 3, kind: input, shape index: {}]   ;;  %s3324_s4 = inlined_call_operand.vmem [shape: f32[7,8,16], index: 4, kind: input, shape index: {}]   ;;  %s3325_s5 = inlined_call_operand.vmem [shape: f32[1,16], index: 5, kind: input, shape index: {}]   ;;  %s3326_s6 = inlined_call_operand.vmem [shape: f32[1,16], index: 6, kind: input, shape index: {}]   ;;  %s3327_s7 = inlined_call_operand.vmem [shape: f32[16,256], index: 7, kind: input, shape index: {}]   ;;  %s3328_s8 = inlined_call_operand.vmem [shape: f32[1,256], index: 8, kind: input, shape index: {}]   ;;  %s3329_s9 = inlined_call_operand.vmem [shape: f32[32,128], index: 9, kind: input, shape index: {}]   ;;  %s3330_s10 = inlined_call_operand.vmem [shape: f32[32,128], index: 10, kind: input, shape index: {}]   ;;  %s3331_s11 = inlined_call_operand.vmem [shape: f32[64,128], index: 11, kind: input, shape index: {}]   ;;  %s3332_s12 = inlined_call_operand.vmem [shape: f32[1,128], index: 12, kind: input, shape index: {}]   ;;  %s3333_s13 = inlined_call_operand.vmem [shape: f32[16,64], index: 13, kind: input, shape index: {}]   ;;  %s3334_s14 = inlined_call_operand.vmem [shape: f32[16,64], index: 14, kind: input, shape index: {}]   ;;  %s3335_s15 = inlined_call_operand.hbm [shape: f32[2,32], index: 15, kind: output, shape index: {}]  }
   0x1   :  { %v2343_v0 = vld [vmem:[%s3321_s1 + $0x4] sm:$0xf]  ;;  %v2350_v1 = vld [vmem:[%s3321_s1 + $0x8] sm:$0xf]  ;;  %v2366_v5 = vld [vmem:[%s3321_s1 + $0x18] sm:$0xf] }
   0x2   :  { %v51_v2 = vld [vmem:[%s3320_s0] sm:$0xff]  ;;  %2344 = vmatpush.msk.msra.mxu0 %vm78_vm0, %v2343_v0  ;;  %2351 = vmatpush.msk.msra.mxu2 %vm78_vm0, %v2350_v1  ;;  %v52_v3 = vld [vmem:[%s3320_s0 + $0x8] sm:$0xff]  ;;  %v2358_v10 = vld [vmem:[%s3321_s1 + $0x10] sm:$0xf] }
   0x3   :  { %v56_v4 = vrot.slane %v51_v2, 2  ;;  %v57_v6 = vrot.slane %v52_v3, 2  ;;  %v63_v7 = vld [vmem:[%s3321_s1] sm:$0xf]  ;;  %v2354_v8 = vld [vmem:[%s3321_s1 + $0xc] sm:$0xf] }
   0x4   :  { %2367 = vmatpush.msk.msrb.mxu2 %vm78_vm0, %v2366_v5  ;;  %2347 = vmatpush.msk.msra.mxu1 %vm78_vm0, %v63_v7  ;;  %v2362_v11 = vld [vmem:[%s3321_s1 + $0x14] sm:$0xf] }
   0x5   :  { %v61_v9 = vsel %vm55_vm1, 0.0, %v56_v4  ;;  %2355 = vmatpush.msk.msra.mxu3 %vm78_vm0, %v2354_v8  ;;  %v58_v12 = vsel %vm55_vm1, %v56_v4, %v57_v6  ;;  %2359 = vmatpush.msk.msrb.mxu0 %vm78_vm0, %v2358_v10  ;;  %v62_v19 = vsel %vm55_vm1, %v57_v6, 0.0 }
   0x6   :  { %v68_v13 = vrot.slane %v61_v9, 2  ;;  %v137_v14 = vrot.slane %v61_v9, 4  ;;  %2348 = vmatmul.msk.f32.vlgmr.msra.gmra.mxu1 %vm73_vm2, %v61_v9  ;;  %v177_v15 = vrot.slane %v61_v9, 6  ;;  %v69_v16 = vrot.slane %v58_v12, 2 }
   0x7   :  { %v138_v17 = vrot.slane %v58_v12, 4  ;;  %v178_v18 = vrot.slane %v58_v12, 6  ;;  %2363 = vmatpush.msk.msrb.mxu1 %vm78_vm0, %v2362_v11 }
   0x8   :  { %v70_v20 = vsel %vm55_vm1, %v68_v13, %v69_v16 }
   0x9   :  { %v139_v21 = vsel %vm78_vm0, %v137_v14, %v138_v17  ;;  %v179_v22 = vsel %vm176_vm3, %v177_v15, %v178_v18  ;;  %2345 = vmatmul.msk.f32.vlgmr.msra.gmra.mxu0 %vm73_vm2, %v70_v20 }
   0xa   :  { %2352 = vmatmul.msk.f32.vlgmr.msra.gmra.mxu2 %vm73_vm2, %v139_v21 }
   0xb   :  { %20 = vsyncpa [#allocation3], 0  ;;  %2356 = vmatmul.msk.f32.vlgmr.msra.gmra.mxu3 %vm73_vm2, %v179_v22  ;;  %v71_v23 = vrot.slane %v62_v19, 2  ;;  %v140_v24 = vrot.slane %v62_v19, 4  ;;  %v180_v25 = vrot.slane %v62_v19, 6  ;;  %v2608_v29 = vmov 0.0  }
   0xc   :  { %v2748_v30 = vrot.slane %v2608_v29, 2  ;;  %v2753_v31 = vrot.slane %v2608_v29, 4  ;;  %v2370_v35 = vld [vmem:[%s3324_s4 + $0x8] sm:$0xff]  ;;  %v336_v36 = vld [vmem:[%s3324_s4] sm:$0xff]  ;;  %v2375_v40 = vld [vmem:[%s3324_s4 + $0x10] sm:$0xff]  ;;  %vm346_vm4 = vcmask 64512  }
   0xd   :  { %v72_v26 = vsel %vm55_vm1, %v69_v16, %v71_v23  ;;  %v141_v27 = vsel %vm78_vm0, %v138_v17, %v140_v24  ;;  %v181_v28 = vsel %vm176_vm3, %v178_v18, %v180_v25  ;;  %366 = vmatpush.msrb.mxu3 %v2370_v35  ;;  %393 = vmatpush.msra.mxu0 %v336_v36  ;;  %v2378_v42 = vld [vmem:[%s3324_s4 + $0x18] sm:$0xff]  ;;  %v2381_v46 = vld [vmem:[%s3324_s4 + $0x20] sm:$0xff]  ;;  %v2384_v47 = vld [vmem:[%s3324_s4 + $0x28] sm:$0xff]  ;;  %vm586_vm5 = vcmask 130048   ;;  %s2610_s22 = smov 32   ;;  %s2613_s23 = smov 80  }
   0xe   :  { %2349 = vmatmul.msk.f32.gmra.mxu1 %vm73_vm2, %v58_v12  ;;  %v250_v32 = vsel %vm55_vm1, %v71_v23, %v2748_v30  ;;  %v284_v33 = vsel %vm78_vm0, %v140_v24, %v2753_v31  ;;  %463 = vmatpush.msra.mxu2 %v2378_v42  ;;  %v2387_v56 = vld [vmem:[%s3324_s4 + $0x30] sm:$0xff]  ;;  %v2449_v58 = vld [vmem:[%s3322_s2] ss:$0 sm:$0xff]  ;;  %vm651_vm10 = vcmask 261120   ;;  %s2334_s27 = sshll.u32 %s3335_s15, 4  ;;  %s2335_s27 = int_to_ptr.hbm [resolvable:$true] %s2334_s27 }
   0xf   :  { %427 = vmatpush.msra.mxu1 %v2375_v40  ;;  %492 = vmatpush.msra.mxu3 %v2381_v46  ;;  %v2450_v62 = vld [vmem:[%s3323_s3] ss:$0 sm:$0xff]  ;;  %v578_v35 = vld [vmem:[%s3327_s7 + $0x10] sm:$0xff] }
  0x10   :  { %v2842_v40 = vld [vmem:[%s3330_s10 + $0x10] sm:$0xff] }
  0x11   :  { %2346 = vmatmul.msk.f32.gmra.mxu0 %vm73_vm2, %v72_v26 }
  0x12   :  { %2353 = vmatmul.msk.f32.gmra.mxu2 %vm73_vm2, %v141_v27 }
  0x13   :  { %2357 = vmatmul.msk.f32.gmra.mxu3 %vm73_vm2, %v181_v28 }
  0x16   :  { %2364 = vmatmul.msk.f32.vlgmr.msrb.gmra.mxu1 %vm73_vm2, %v72_v26 }
  0x17   :  { %552 = vmatpush.msrb.mxu1 %v2387_v56 }
  0x19   :  { %2360 = vmatmul.msk.f32.vlgmr.msrb.gmra.mxu0 %vm73_vm2, %v58_v12 }
  0x1a   :  { %2368 = vmatmul.msk.f32.vlgmr.msrb.gmra.mxu2 %vm73_vm2, %v141_v27  ;;  %522 = vmatpush.msrb.mxu0 %v2384_v47  ;;  %v2876_v47 = vld [vmem:[%s3329_s9] sm:$0xff] }
  0x1b   :  { %607 = vmatpush.msrb.mxu2 %v578_v35 }
  0x1e   :  { %2365 = vmatmul.msk.f32.gmra.mxu1 %vm73_vm2, %v250_v32 }
  0x21   :  { %2361 = vmatmul.msk.f32.gmra.mxu0 %vm73_vm2, %v62_v19 }
  0x22   :  { %2369 = vmatmul.msk.f32.gmra.mxu2 %vm73_vm2, %v284_v33 }
  0x83   :  { %v129_v34 = vpop.f32.mrf.mxu1 }
  0x86   :  { %v99_v37 = vpop.f32.mrf.mxu0 }
  0x87   :  { %v130_v43 = vadd.f32 %v129_v34, %v99_v37  ;;  %v579_v34 = vld [vmem:[%s3327_s7 + $0x18] sm:$0xff] }
  0x88   :  { %v2831_v37 = vld [vmem:[%s3330_s10 + $0x18] sm:$0xff] }
  0x8b   :  { %v132_v39 = vpop.f32.mrf.mxu1 }
  0x8d   :  { %v166_v38 = vpop.f32.mrf.mxu2 }
  0x8e   :  { %v102_v41 = vpop.f32.mrf.mxu0  ;;  %v206_v44 = vpop.f32.mrf.mxu3  ;;  %v172_v45 = vadd.f32 %v166_v38, %v130_v43  ;;  %v2836_v38 = vld [vmem:[%s3329_s9 + $0x18] sm:$0xff]  ;;  %v2859_v43 = vld [vmem:[%s3330_s10 + $0x8] sm:$0xff] }
  0x8f   :  { %v133_v52 = vadd.f32 %v132_v39, %v102_v41  ;;  %v2847_v41 = vld [vmem:[%s3329_s9 + $0x10] sm:$0xff] }
  0x90   :  { %v212_v49 = vadd.f32 %v206_v44, %v172_v45  ;;  %v2864_v44 = vld [vmem:[%s3329_s9 + $0x8] sm:$0xff]  ;;  %v2869_v45 = vld [vmem:[%s3330_s10] sm:$0xff] }
  0x93   :  { %v273_v51 = vpop.f32.mrf.mxu1 }
  0x95   :  { %v169_v48 = vpop.f32.mrf.mxu2 }
  0x96   :  { %v238_v50 = vpop.f32.mrf.mxu0  ;;  %v173_v54 = vadd.f32 %v169_v48, %v133_v52  ;;  %v209_v55 = vpop.f32.mrf.mxu3 }
  0x97   :  { %v244_v53 = vadd.f32 %v238_v50, %v212_v49 }
  0x98   :  { %v213_v60 = vadd.f32 %v209_v55, %v173_v54 }
  0x99   :  { %v279_v57 = vadd.f32 %v273_v51, %v244_v53 }
  0x9b   :  { %v276_v2 = vpop.f32.mrf.mxu1 }
  0x9d   :  { %v307_v59 = vpop.f32.mrf.mxu2 }
  0x9e   :  { %v313_v61 = vadd.f32 %v307_v59, %v279_v57  ;;  %v241_v63 = vpop.f32.mrf.mxu0 }
  0x9f   :  { %v245_v1 = vadd.f32 %v241_v63, %v213_v60  ;;  %v2452_v63 = vld [vmem:[%s3326_s6] ss:$0 sm:$0xff]  ;;  %s2612_s6 = smov 16  }
  0xa0   :  { %v319_v0 = vmul.f32 %v2449_v58, %v313_v61  ;;  %v2451_v61 = vld [vmem:[%s3325_s5] ss:$0 sm:$0xff] }
  0xa1   :  { %v280_v5 = vadd.f32 %v276_v2, %v245_v1 }
  0xa2   :  { %v325_v3 = vadd.f32 %v2450_v62, %v319_v0 }
  0xa4   :  { %v329_v4 = vrot.slane %v325_v3, 2 }
  0xa5   :  { %v310_v6 = vpop.f32.mrf.mxu2 }
  0xa6   :  { %v314_v7 = vadd.f32 %v310_v6, %v280_v5  ;;  %v334_v8 = vsel %vm55_vm1, 0.0, %v329_v4 }
  0xa7   :  { %2373 = vmatmul.msk.f32.vlgmr.msra.gmra.mxu0 %vm346_vm4, %v334_v8  ;;  %v403_v12 = vrot.slane %v334_v8, 4  ;;  %v439_v13 = vrot.slane %v334_v8, 6  ;;  %v341_v15 = vrot.slane %v334_v8, 2 }
  0xa8   :  { %v320_v9 = vmul.f32 %v2449_v58, %v314_v7  ;;  %666 = vmatpush.msra.mxu0 %v2836_v38 }
  0xaa   :  { %v326_v10 = vadd.f32 %v2450_v62, %v320_v9  ;;  %667 = vmatpush.msra.mxu0 %v2847_v41 }
  0xac   :  { %v330_v11 = vrot.slane %v326_v10, 2  ;;  %668 = vmatpush.msra.mxu0 %v2864_v44 }
  0xae   :  { %v331_v14 = vsel %vm55_vm1, %v329_v4, %v330_v11  ;;  %v335_v16 = vsel %vm55_vm1, %v330_v11, 0.0  ;;  %669 = vmatpush.msra.mxu0 %v2876_v47 }
  0xaf   :  { %2374 = vmatmul.msk.f32.gmra.mxu0 %vm346_vm4, %v331_v14  ;;  %v342_v17 = vrot.slane %v331_v14, 2  ;;  %v404_v18 = vrot.slane %v331_v14, 4  ;;  %v440_v19 = vrot.slane %v331_v14, 6  ;;  %v344_v23 = vrot.slane %v335_v16, 2 }
  0xb0   :  { %v406_v24 = vrot.slane %v335_v16, 4  ;;  %v442_v26 = vrot.slane %v335_v16, 6 }
  0xb1   :  { %v343_v20 = vsel %vm55_vm1, %v341_v15, %v342_v17  ;;  %v405_v21 = vsel %vm78_vm0, %v403_v12, %v404_v18  ;;  %v441_v22 = vsel %vm176_vm3, %v439_v13, %v440_v19  ;;  %v345_v25 = vsel %vm55_vm1, %v342_v17, %v344_v23 }
  0xb2   :  { %2371 = vmatmul.msk.f32.vlgmr.msrb.gmra.mxu3 %vm346_vm4, %v343_v20  ;;  %2376 = vmatmul.msk.f32.vlgmr.msra.gmra.mxu1 %vm346_vm4, %v405_v21  ;;  %v407_v27 = vsel %vm78_vm0, %v404_v18, %v406_v24  ;;  %v443_v28 = vsel %vm176_vm3, %v440_v19, %v442_v26  ;;  %v504_v32 = vsel %vm55_vm1, %v344_v23, %v2748_v30  ;;  %v577_v30 = vld [vmem:[%s3327_s7 + $0x8] sm:$0xff] }
  0xb3   :  { %2379 = vmatmul.msk.f32.vlgmr.msra.gmra.mxu2 %vm346_vm4, %v441_v22  ;;  %v534_v33 = vsel %vm78_vm0, %v406_v24, %v2753_v31  ;;  %630 = vmatpush.msrb.mxu3 %v579_v34  ;;  %v576_v31 = vld [vmem:[%s3327_s7] sm:$0xff] }
  0xb4   :  { %608 = vmatpush.msrb.mxu2 %v576_v31  ;;  %686 = vmatpush.msra.mxu1 %v2831_v37 }
  0xb5   :  { %631 = vmatpush.msrb.mxu3 %v577_v30 }
  0xb6   :  { %759 = vmatpush.msra.mxu2 %v2836_v38  ;;  %687 = vmatpush.msra.mxu1 %v2842_v40 }
  0xb7   :  { %2385 = vmatmul.msk.f32.vlgmr.msrb.gmra.mxu0 %vm346_vm4, %v345_v25 }
  0xb8   :  { %760 = vmatpush.msra.mxu2 %v2847_v41  ;;  %688 = vmatpush.msra.mxu1 %v2859_v43 }
  0xb9   :  { %854 = vmatpush.msrb.mxu0 %v2836_v38 }
  0xba   :  { %2372 = vmatmul.msk.f32.gmra.mxu3 %vm346_vm4, %v345_v25  ;;  %2377 = vmatmul.msk.f32.gmra.mxu1 %vm346_vm4, %v407_v27 }
  0xbb   :  { %2380 = vmatmul.msk.f32.gmra.mxu2 %vm346_vm4, %v443_v28  ;;  %689 = vmatpush.msra.mxu1 %v2869_v45 }
  0xbc   :  { %761 = vmatpush.msra.mxu2 %v2864_v44  ;;  %855 = vmatpush.msrb.mxu0 %v2847_v41 }
  0xbe   :  { %762 = vmatpush.msra.mxu2 %v2876_v47  ;;  %856 = vmatpush.msrb.mxu0 %v2864_v44 }
  0xbf   :  { %2386 = vmatmul.msk.f32.gmra.mxu0 %vm346_vm4, %v504_v32 }
  0xc0   :  { %857 = vmatpush.msrb.mxu0 %v2876_v47 }
  0xc2   :  { %2382 = vmatmul.msk.f32.vlgmr.msra.gmra.mxu3 %vm346_vm4, %v331_v14  ;;  %2388 = vmatmul.msk.f32.vlgmr.msrb.gmra.mxu1 %vm346_vm4, %v407_v27  ;;  %v580_v14 = vld [vmem:[%s3328_s8] sm:$0x3]  ;;  %s2609_s8 = smov 64  }
  0xc3   :  { %784 = vmatpush.msra.mxu3 %v2831_v37  ;;  %879 = vmatpush.msrb.mxu1 %v2831_v37  ;;  %v583_v15 = vperm.slane %v580_v14, 1  ;;  %v582_v18 = vperm.slane %v580_v14, 0 }
  0xc5   :  { %785 = vmatpush.msra.mxu3 %v2842_v40  ;;  %880 = vmatpush.msrb.mxu1 %v2842_v40 }
  0xc7   :  { %786 = vmatpush.msra.mxu3 %v2859_v43  ;;  %670 = vmatmul.f32.vlgmr.msra.gmra.mxu0 %v2608_v29 }
  0xc8   :  { %881 = vmatpush.msrb.mxu1 %v2859_v43  ;;  %1047 = vmatpush.msra.mxu0 %v2836_v38 }
  0xc9   :  { %787 = vmatpush.msra.mxu3 %v2869_v45 }
  0xca   :  { %2383 = vmatmul.msk.f32.gmra.mxu3 %vm346_vm4, %v335_v16  ;;  %2389 = vmatmul.msk.f32.gmra.mxu1 %vm346_vm4, %v534_v33 }
  0xcb   :  { %882 = vmatpush.msrb.mxu1 %v2869_v45  ;;  %1048 = vmatpush.msra.mxu0 %v2847_v41 }
  0xcd   :  { %1049 = vmatpush.msra.mxu0 %v2864_v44 }
  0xcf   :  { %1050 = vmatpush.msra.mxu0 %v2876_v47 }
  0xd2   :  { %690 = vmatmul.f32.vlgmr.msra.gmra.mxu1 %v2608_v29 }
  0xd3   :  { %1072 = vmatpush.msra.mxu1 %v2831_v37 }
  0xd5   :  { %1073 = vmatpush.msra.mxu1 %v2842_v40 }
  0xd7   :  { %1074 = vmatpush.msra.mxu1 %v2859_v43 }
  0xd9   :  { %1075 = vmatpush.msra.mxu1 %v2869_v45 }
 0x124   :  { %v395_v36 = vpop.f32.mrf.mxu0 }
 0x12c   :  { %v398_v46 = vpop.f32.mrf.mxu0 }
 0x12f   :  { %v429_v39 = vpop.f32.mrf.mxu1 }
 0x134   :  { %v524_v55 = vpop.f32.mrf.mxu0 }
 0x135   :  { %v368_v42 = vpop.f32.mrf.mxu3 }
 0x136   :  { %v396_v48 = vadd.f32 %v395_v36, %v368_v42  ;;  %v465_v52 = vpop.f32.mrf.mxu2 }
 0x137   :  { %v432_v49 = vpop.f32.mrf.mxu1 }
 0x138   :  { %v435_v51 = vadd.f32 %v429_v39, %v396_v48 }
 0x13a   :  { %v471_v53 = vadd.f32 %v465_v52, %v435_v51 }
 0x13c   :  { %v527_v6 = vpop.f32.mrf.mxu0 }
 0x13d   :  { %v371_v50 = vpop.f32.mrf.mxu3 }
 0x13e   :  { %v399_v54 = vadd.f32 %v398_v46, %v371_v50  ;;  %v468_v0 = vpop.f32.mrf.mxu2 }
 0x13f   :  { %v554_v58 = vpop.f32.mrf.mxu1 }
 0x140   :  { %v436_v59 = vadd.f32 %v432_v49, %v399_v54 }
 0x142   :  { %v472_v1 = vadd.f32 %v468_v0, %v436_v59 }
 0x144   :  { %v671_v23 = vpop.f32.mrf.mxu0 }
 0x145   :  { %v494_v56 = vpop.f32.mrf.mxu3 }
 0x146   :  { %v500_v57 = vadd.f32 %v494_v56, %v471_v53 }
 0x147   :  { %v557_v9 = vpop.f32.mrf.mxu1 }
 0x148   :  { %v530_v60 = vadd.f32 %v524_v55, %v500_v57 }
 0x14a   :  { %v560_v62 = vadd.f32 %v554_v58, %v530_v60 }
 0x14c   :  { %v566_v2 = vmul.f32 %v2451_v61, %v560_v62 }
 0x14d   :  { %v497_v3 = vpop.f32.mrf.mxu3 }
 0x14e   :  { %v572_v4 = vadd.f32 %v2452_v63, %v566_v2  ;;  %v501_v5 = vadd.f32 %v497_v3, %v472_v1 }
 0x14f   :  { %v691_v20 = vpop.f32.mrf.mxu1 }
 0x150   :  { %v574_v7 = vmax.f32 %v572_v4, 0.0  ;;  %v531_v8 = vadd.f32 %v527_v6, %v501_v5  ;;  %v695_v21 = vrot.slane %v691_v20, 6 }
 0x152   :  { %v561_v10 = vadd.f32 %v557_v9, %v531_v8  ;;  %2390 = vmatmul.msk.f32.vlgmr.msrb.gmra.mxu2 %vm586_vm5, %v574_v7  ;;  %2392 = vmatmul.msk.f32.vlgmr.msrb.gmra.mxu3 %vm586_vm5, %v574_v7  ;;  %v697_v26 = vsel %vm176_vm3, %v671_v23, %v695_v21 }
 0x153   :  { %951 = vmatpush.msrb.mxu2 %v2836_v38  ;;  %976 = vmatpush.msrb.mxu3 %v2831_v37 }
 0x154   :  { %v567_v11 = vmul.f32 %v2451_v61, %v561_v10 }
 0x155   :  { %952 = vmatpush.msrb.mxu2 %v2847_v41  ;;  %977 = vmatpush.msrb.mxu3 %v2842_v40 }
 0x156   :  { %v573_v12 = vadd.f32 %v2452_v63, %v567_v11 }
 0x157   :  { %953 = vmatpush.msrb.mxu2 %v2864_v44  ;;  %978 = vmatpush.msrb.mxu3 %v2859_v43 }
 0x158   :  { %v575_v13 = vmax.f32 %v573_v12, 0.0 }
 0x159   :  { %954 = vmatpush.msrb.mxu2 %v2876_v47  ;;  %979 = vmatpush.msrb.mxu3 %v2869_v45 }
 0x15a   :  { %2391 = vmatmul.msk.f32.gmra.mxu2 %vm586_vm5, %v575_v13  ;;  %2393 = vmatmul.msk.f32.gmra.mxu3 %vm586_vm5, %v575_v13 }
 0x1d5   :  { %v610_v16 = vpop.f32.mrf.mxu2  ;;  %v633_v17 = vpop.f32.mrf.mxu3 }
 0x1d6   :  { %v634_v19 = vadd.f32 %v633_v17, %v583_v15  ;;  %v611_v22 = vadd.f32 %v610_v16, %v582_v18 }
 0x1d8   :  { %v737_v27 = vrot.slane %v611_v22, 2  ;;  %v929_v28 = vrot.slane %v611_v22, 6  ;;  %v1027_v34 = vrot.slane %v634_v19, 4  ;;  %v1317_v30 = vrot.slane %v634_v19, 6 }
 0x1d9   :  { %v834_v35 = vrot.slane %v611_v22, 4  ;;  %v1125_v36 = vrot.slane %v634_v19, 2 }
 0x1dd   :  { %v613_v24 = vpop.f32.mrf.mxu2  ;;  %v636_v25 = vpop.f32.mrf.mxu3 }
 0x1de   :  { %v614_v32 = vadd.f32 %v613_v24, %v582_v18  ;;  %v637_v33 = vadd.f32 %v636_v25, %v583_v15 }
 0x1e0   :  { %v1220_v31 = vrot.slane %v614_v32, 4  ;;  %v1315_v39 = vrot.slane %v614_v32, 6  ;;  %v739_v42 = vrot.slane %v637_v33, 2  ;;  %v931_v46 = vrot.slane %v637_v33, 6 }
 0x1e1   :  { %v648_v48 = vrot.slane %v637_v33, 4  ;;  %v2925_v49 = vsel %vm176_vm3, %v834_v35, %v637_v33  ;;  %v2928_v50 = vsel %vm176_vm3, %v614_v32, %v1027_v34  ;;  %v1123_v51 = vrot.slane %v614_v32, 2 }
 0x1e2   :  { %v2931_v52 = vsel %vm176_vm3, %v737_v27, %v739_v42  ;;  %v2934_v53 = vsel %vm176_vm3, %v929_v28, %v931_v46  ;;  %v2937_v54 = vsel %vm176_vm3, %v1220_v31, %v634_v19  ;;  %v2940_v55 = vsel %vm176_vm3, %v1315_v39, %v1317_v30 }
 0x1e3   :  { %v650_v56 = vsel %vm176_vm3, %v611_v22, %v648_v48  ;;  %v2944_v57 = vsel %vm176_vm3, %v1123_v51, %v1125_v36 }
 0x1e4   :  { %v698_v58 = vadd.f32 %v697_v26, %v650_v56 }
 0x1e6   :  { %2454 = vtanh.f32 %v698_v58  ;;  %v2394_v60 = vmul.f32 -1.442695, %v698_v58 }
 0x1e8   :  { %2456 = vpow2.f32 %v2394_v60 }
 0x1ec   :  { %v2455_v59 = vpop.eup %2454 }
 0x1ed   :  { %721 = vrot.lane.b32.xlu0 %v2455_v59, %s2609_s8 }
 0x1ee   :  { %v2457_v61 = vpop.eup %2456 }
 0x1ef   :  { %v702_v62 = vadd.f32 1.0, %v2457_v61 }
 0x1f1   :  { %2458 = vrcp.f32 %v702_v62  ;;  %v714_v4 = vand.u32 2147483648, %v702_v62  ;;  %vm708_vm7 = vweird.f32 %v702_v62  ;;  %v712_v5 = vand.u32 2147483647, %v702_v62 }
 0x1f3   :  { %v715_v7 = vor.u32 1.1754944e-38, %v714_v4  ;;  %vm713_vm9 = vcmp.eq.f32.partialorder %v712_v5, 8.507059e+37 }
 0x1f7   :  { %v2459_v63 = vpop.eup %2458 }
 0x1f8   :  { %v704_v0 = vmul.f32 %v2459_v63, %v702_v62  ;;  %vm709_vm6 = vweird.f32 %v2459_v63 }
 0x1f9   :  { %vm710_vm8 = vmor %vm708_vm7, %vm709_vm6 }
 0x1fa   :  { %v705_v1 = vsub.f32 1.0, %v704_v0 }
 0x1fc   :  { %v706_v2 = vmul.f32 %v2459_v63, %v705_v1 }
 0x1fe   :  { %v707_v3 = vadd.f32 %v2459_v63, %v706_v2 }
 0x200   :  { %v711_v6 = vsel %vm710_vm8, %v2459_v63, %v707_v3 }
 0x201   :  { %v716_v9 = vsel %vm713_vm9, %v715_v7, %v711_v6 }
 0x202   :  { %v719_v11 = vmul.f32 0.0, %v716_v9 }
 0x25f   :  { %v722_v8 = vpop.permute.xlu0 %721 }
 0x260   :  { %v724_v10 = vmul.f32 %v722_v8, %v716_v9 }
 0x262   :  { %726 = vrot.lane.b32.xlu0 %v724_v10, %s2610_s22 }
 0x2d4   :  { %v727_v12 = vpop.permute.xlu0 %726 }
 0x2d5   :  { %v729_v13 = vadd.f32 %v727_v12, %v719_v11 }
 0x2d7   :  { %2460 = vtanh.f32 %v729_v13 }
 0x2dd   :  { %v2461_v14 = vpop.eup %2460 }
 0x2de   :  { %732 = vrot.lane.b32.xlu1 %v2461_v14, %s2609_s8 }
 0x350   :  { %v733_v15 = vpop.permute.xlu1 %732 }
 0x351   :  { %v2949_v16 = vmul.f32 %v733_v15, %v716_v9 }
 0x353   :  { %743 = vrot.lane.b32.xlu2 %v2949_v16, %s2610_s22  ;;  %v767_v17 = vrot.slane %v2949_v16, 2 }
 0x355   :  { %768 = vrot.lane.b32.xlu1 %v767_v17, %s2610_s22 }
 0x3ad   :  { %v744_v18 = vpop.permute.xlu2 %743 }
 0x3ae   :  { %2395 = vmatmul.msk.f32.vlgmr.msra.gmra.mxu2 %vm651_vm10, %v744_v18 }
 0x3af   :  { %1145 = vmatpush.msra.mxu2 %v2836_v38 }
 0x3b1   :  { %1146 = vmatpush.msra.mxu2 %v2847_v41 }
 0x3b3   :  { %1147 = vmatpush.msra.mxu2 %v2864_v44 }
 0x3b5   :  { %1148 = vmatpush.msra.mxu2 %v2876_v47 }
 0x3c7   :  { %v769_v19 = vpop.permute.xlu1 %768 }
 0x3c8   :  { %2396 = vmatmul.msk.f32.vlgmr.msra.gmra.mxu3 %vm651_vm10, %v769_v19 }
 0x3c9   :  { %1170 = vmatpush.msra.mxu3 %v2831_v37 }
 0x3cb   :  { %1171 = vmatpush.msra.mxu3 %v2842_v40 }
 0x3cd   :  { %1172 = vmatpush.msra.mxu3 %v2859_v43 }
 0x3cf   :  { %1173 = vmatpush.msra.mxu3 %v2869_v45 }
 0x431   :  { %v764_v22 = vpop.f32.mrf.mxu2 }
 0x44b   :  { %v789_v20 = vpop.f32.mrf.mxu3 }
 0x44c   :  { %v793_v21 = vrot.slane %v789_v20, 6 }
 0x44e   :  { %v795_v23 = vsel %vm176_vm3, %v764_v22, %v793_v21 }
 0x44f   :  { %v796_v24 = vadd.f32 %v795_v23, %v2931_v52 }
 0x451   :  { %2462 = vtanh.f32 %v796_v24  ;;  %v2397_v26 = vmul.f32 -1.442695, %v796_v24 }
 0x453   :  { %2464 = vpow2.f32 %v2397_v26 }
 0x457   :  { %v2463_v25 = vpop.eup %2462 }
 0x458   :  { %819 = vrot.lane.b32.xlu2 %v2463_v25, %s2609_s8 }
 0x459   :  { %v2465_v27 = vpop.eup %2464 }
 0x45a   :  { %v800_v28 = vadd.f32 1.0, %v2465_v27 }
 0x45c   :  { %2466 = vrcp.f32 %v800_v28  ;;  %v812_v36 = vand.u32 2147483648, %v800_v28  ;;  %vm806_vm12 = vweird.f32 %v800_v28  ;;  %v810_v31 = vand.u32 2147483647, %v800_v28 }
 0x45e   :  { %v813_v42 = vor.u32 1.1754944e-38, %v812_v36  ;;  %vm811_vm14 = vcmp.eq.f32.partialorder %v810_v31, 8.507059e+37 }
 0x462   :  { %v2467_v32 = vpop.eup %2466 }
 0x463   :  { %v802_v33 = vmul.f32 %v2467_v32, %v800_v28  ;;  %vm807_vm11 = vweird.f32 %v2467_v32 }
 0x464   :  { %vm808_vm13 = vmor %vm806_vm12, %vm807_vm11 }
 0x465   :  { %v803_v34 = vsub.f32 1.0, %v802_v33 }
 0x467   :  { %v804_v30 = vmul.f32 %v2467_v32, %v803_v34 }
 0x469   :  { %v805_v35 = vadd.f32 %v2467_v32, %v804_v30 }
 0x46b   :  { %v809_v39 = vsel %vm808_vm13, %v2467_v32, %v805_v35 }
 0x46c   :  { %v814_v48 = vsel %vm811_vm14, %v813_v42, %v809_v39 }
 0x46d   :  { %v817_v52 = vmul.f32 %v814_v48, %v729_v13 }
 0x4b2   :  { %v820_v46 = vpop.permute.xlu2 %819 }
 0x4b3   :  { %v822_v51 = vmul.f32 %v820_v46, %v814_v48 }
 0x4b5   :  { %824 = vrot.lane.b32.xlu0 %v822_v51, %s2610_s22 }
 0x527   :  { %v825_v56 = vpop.permute.xlu0 %824 }
 0x528   :  { %v827_v58 = vadd.f32 %v825_v56, %v817_v52 }
 0x52a   :  { %2468 = vtanh.f32 %v827_v58 }
 0x530   :  { %v2469_v59 = vpop.eup %2468 }
 0x531   :  { %830 = vrot.lane.b32.xlu1 %v2469_v59, %s2609_s8 }
 0x5a3   :  { %v831_v60 = vpop.permute.xlu1 %830 }
 0x5a4   :  { %v2970_v61 = vmul.f32 %v831_v60, %v814_v48 }
 0x5a6   :  { %838 = vrot.lane.b32.xlu0 %v2970_v61, %s2610_s22  ;;  %v862_v62 = vrot.slane %v2970_v61, 2 }
 0x5a8   :  { %863 = vrot.lane.b32.xlu2 %v862_v62, %s2610_s22 }
 0x602   :  { %v864_v63 = vpop.permute.xlu2 %863 }
 0x603   :  { %2399 = vmatmul.msk.f32.vlgmr.msrb.gmra.mxu1 %vm651_vm10, %v864_v63 }
 0x604   :  { %1265 = vmatpush.msrb.mxu1 %v2831_v37 }
 0x606   :  { %1266 = vmatpush.msrb.mxu1 %v2842_v40 }
 0x608   :  { %1267 = vmatpush.msrb.mxu1 %v2859_v43 }
 0x60a   :  { %1268 = vmatpush.msrb.mxu1 %v2869_v45 }
 0x618   :  { %v839_v0 = vpop.permute.xlu0 %838 }
 0x619   :  { %2398 = vmatmul.msk.f32.vlgmr.msrb.gmra.mxu0 %vm651_vm10, %v839_v0 }
 0x61a   :  { %1240 = vmatpush.msrb.mxu0 %v2836_v38 }
 0x61c   :  { %1241 = vmatpush.msrb.mxu0 %v2847_v41 }
 0x61e   :  { %1242 = vmatpush.msrb.mxu0 %v2864_v44 }
 0x620   :  { %1243 = vmatpush.msrb.mxu0 %v2876_v47 }
 0x680   :  { %v884_v1 = vpop.f32.mrf.mxu1 }
 0x681   :  { %v888_v2 = vrot.slane %v884_v1, 6 }
 0x696   :  { %v859_v3 = vpop.f32.mrf.mxu0 }
 0x697   :  { %v890_v4 = vsel %vm176_vm3, %v859_v3, %v888_v2 }
 0x698   :  { %v891_v5 = vadd.f32 %v890_v4, %v2925_v49 }
 0x69a   :  { %2470 = vtanh.f32 %v891_v5  ;;  %v2400_v7 = vmul.f32 -1.442695, %v891_v5 }
 0x69c   :  { %2472 = vpow2.f32 %v2400_v7 }
 0x6a0   :  { %v2471_v6 = vpop.eup %2470 }
 0x6a1   :  { %914 = vrot.lane.b32.xlu1 %v2471_v6, %s2609_s8 }
 0x6a2   :  { %v2473_v8 = vpop.eup %2472 }
 0x6a3   :  { %v895_v9 = vadd.f32 1.0, %v2473_v8 }
 0x6a5   :  { %2474 = vrcp.f32 %v895_v9  ;;  %v907_v15 = vand.u32 2147483648, %v895_v9  ;;  %vm901_vm2 = vweird.f32 %v895_v9  ;;  %v905_v17 = vand.u32 2147483647, %v895_v9 }
 0x6a7   :  { %v908_v18 = vor.u32 1.1754944e-38, %v907_v15  ;;  %vm906_vm6 = vcmp.eq.f32.partialorder %v905_v17, 8.507059e+37 }
 0x6ab   :  { %v2475_v10 = vpop.eup %2474 }
 0x6ac   :  { %v897_v11 = vmul.f32 %v2475_v10, %v895_v9  ;;  %vm902_vm15 = vweird.f32 %v2475_v10 }
 0x6ad   :  { %vm903_vm4 = vmor %vm901_vm2, %vm902_vm15 }
 0x6ae   :  { %v898_v12 = vsub.f32 1.0, %v897_v11 }
 0x6b0   :  { %v899_v13 = vmul.f32 %v2475_v10, %v898_v12 }
 0x6b2   :  { %v900_v14 = vadd.f32 %v2475_v10, %v899_v13 }
 0x6b4   :  { %v904_v49 = vsel %vm903_vm4, %v2475_v10, %v900_v14 }
 0x6b5   :  { %v909_v20 = vsel %vm906_vm6, %v908_v18, %v904_v49 }
 0x6b6   :  { %v912_v22 = vmul.f32 %v909_v20, %v827_v58 }
 0x713   :  { %v915_v19 = vpop.permute.xlu1 %914 }
 0x714   :  { %v917_v21 = vmul.f32 %v915_v19, %v909_v20 }
 0x716   :  { %919 = vrot.lane.b32.xlu2 %v917_v21, %s2610_s22 }
 0x770   :  { %v920_v23 = vpop.permute.xlu2 %919 }
 0x771   :  { %v922_v24 = vadd.f32 %v920_v23, %v912_v22 }
 0x773   :  { %2476 = vtanh.f32 %v922_v24 }
 0x779   :  { %v2477_v25 = vpop.eup %2476 }
 0x77a   :  { %925 = vrot.lane.b32.xlu0 %v2477_v25, %s2609_s8 }
 0x7ec   :  { %v926_v26 = vpop.permute.xlu0 %925 }
 0x7ed   :  { %v2991_v27 = vmul.f32 %v926_v26, %v909_v20 }
 0x7ef   :  { %935 = vrot.lane.b32.xlu2 %v2991_v27, %s2610_s22  ;;  %v959_v28 = vrot.slane %v2991_v27, 2 }
 0x7f1   :  { %960 = vrot.lane.b32.xlu1 %v959_v28, %s2610_s22 }
 0x849   :  { %v936_v32 = vpop.permute.xlu2 %935 }
 0x84a   :  { %2401 = vmatmul.msk.f32.vlgmr.msrb.gmra.mxu2 %vm651_vm10, %v936_v32 }
 0x84b   :  { %1337 = vmatpush.msrb.mxu2 %v2836_v38 }
 0x84d   :  { %1338 = vmatpush.msrb.mxu2 %v2847_v41 }
 0x84f   :  { %1339 = vmatpush.msrb.mxu2 %v2864_v44 }
 0x851   :  { %1340 = vmatpush.msrb.mxu2 %v2876_v47 }
 0x863   :  { %v961_v33 = vpop.permute.xlu1 %960 }
 0x864   :  { %2402 = vmatmul.msk.f32.vlgmr.msrb.gmra.mxu3 %vm651_vm10, %v961_v33 }
 0x865   :  { %1362 = vmatpush.msrb.mxu3 %v2831_v37 }
 0x867   :  { %1363 = vmatpush.msrb.mxu3 %v2842_v40 }
 0x869   :  { %1364 = vmatpush.msrb.mxu3 %v2859_v43 }
 0x86b   :  { %1365 = vmatpush.msrb.mxu3 %v2869_v45 }
 0x8cd   :  { %v956_v38 = vpop.f32.mrf.mxu2 }
 0x8e7   :  { %v981_v34 = vpop.f32.mrf.mxu3 }
 0x8e8   :  { %v985_v30 = vrot.slane %v981_v34, 6 }
 0x8ea   :  { %v987_v41 = vsel %vm176_vm3, %v956_v38, %v985_v30 }
 0x8eb   :  { %v988_v44 = vadd.f32 %v987_v41, %v2934_v53 }
 0x8ed   :  { %2478 = vtanh.f32 %v988_v44  ;;  %v2403_v35 = vmul.f32 -1.442695, %v988_v44 }
 0x8ef   :  { %2480 = vpow2.f32 %v2403_v35 }
 0x8f3   :  { %v2479_v47 = vpop.eup %2478 }
 0x8f4   :  { %1011 = vrot.lane.b32.xlu0 %v2479_v47, %s2609_s8 }
 0x8f5   :  { %v2481_v37 = vpop.eup %2480 }
 0x8f6   :  { %v992_v36 = vadd.f32 1.0, %v2481_v37 }
 0x8f8   :  { %2482 = vrcp.f32 %v992_v36  ;;  %v1004_v42 = vand.u32 2147483648, %v992_v36  ;;  %vm998_vm8 = vweird.f32 %v992_v36  ;;  %v1002_v46 = vand.u32 2147483647, %v992_v36 }
 0x8fa   :  { %v1005_v48 = vor.u32 1.1754944e-38, %v1004_v42  ;;  %vm1003_vm11 = vcmp.eq.f32.partialorder %v1002_v46, 8.507059e+37 }
 0x8fe   :  { %v2483_v40 = vpop.eup %2482 }
 0x8ff   :  { %v994_v43 = vmul.f32 %v2483_v40, %v992_v36  ;;  %vm999_vm7 = vweird.f32 %v2483_v40 }
 0x900   :  { %vm1000_vm9 = vmor %vm998_vm8, %vm999_vm7 }
 0x901   :  { %v995_v31 = vsub.f32 1.0, %v994_v43 }
 0x903   :  { %v996_v45 = vmul.f32 %v2483_v40, %v995_v31 }
 0x905   :  { %v997_v39 = vadd.f32 %v2483_v40, %v996_v45 }
 0x907   :  { %v1001_v53 = vsel %vm1000_vm9, %v2483_v40, %v997_v39 }
 0x908   :  { %v1006_v52 = vsel %vm1003_vm11, %v1005_v48, %v1001_v53 }
 0x909   :  { %v1009_v58 = vmul.f32 %v1006_v52, %v922_v24 }
 0x966   :  { %v1012_v51 = vpop.permute.xlu0 %1011 }
 0x967   :  { %v1014_v56 = vmul.f32 %v1012_v51, %v1006_v52 }
 0x969   :  { %1016 = vrot.lane.b32.xlu1 %v1014_v56, %s2610_s22 }
 0x9db   :  { %v1017_v59 = vpop.permute.xlu1 %1016 }
 0x9dc   :  { %v1019_v60 = vadd.f32 %v1017_v59, %v1009_v58 }
 0x9de   :  { %2484 = vtanh.f32 %v1019_v60 }
 0x9e4   :  { %v2485_v62 = vpop.eup %2484 }
 0x9e5   :  { %1022 = vrot.lane.b32.xlu2 %v2485_v62, %s2609_s8 }
 0xa3f   :  { %v1023_v63 = vpop.permute.xlu2 %1022 }
 0xa40   :  { %v1025_v0 = vmul.f32 %v1023_v63, %v1006_v52 }
 0xa42   :  { %v3012_v1 = vrot.slane %v1025_v0, 2  ;;  %1031 = vrot.lane.b32.xlu1 %v1025_v0, %s2610_s22 }
 0xa44   :  { %1056 = vrot.lane.b32.xlu0 %v3012_v1, %s2610_s22 }
 0xab4   :  { %v1032_v2 = vpop.permute.xlu1 %1031 }
 0xab5   :  { %2404 = vmatmul.msk.f32.vlgmr.msra.gmra.mxu0 %vm651_vm10, %v1032_v2 }
 0xab6   :  { %v1057_v3 = vpop.permute.xlu0 %1056 }
 0xab7   :  { %2405 = vmatmul.msk.f32.vlgmr.msra.gmra.mxu1 %vm651_vm10, %v1057_v3 }
 0xb32   :  { %v1052_v6 = vpop.f32.mrf.mxu0 }
 0xb34   :  { %v1077_v4 = vpop.f32.mrf.mxu1 }
 0xb35   :  { %v1081_v5 = vrot.slane %v1077_v4, 6 }
 0xb37   :  { %v1083_v7 = vsel %vm176_vm3, %v1052_v6, %v1081_v5 }
 0xb38   :  { %v1084_v8 = vadd.f32 %v1083_v7, %v2928_v50 }
 0xb3a   :  { %2486 = vtanh.f32 %v1084_v8  ;;  %v2406_v10 = vmul.f32 -1.442695, %v1084_v8 }
 0xb3c   :  { %2488 = vpow2.f32 %v2406_v10 }
 0xb40   :  { %v2487_v9 = vpop.eup %2486 }
 0xb41   :  { %1107 = vrot.lane.b32.xlu2 %v2487_v9, %s2609_s8 }
 0xb42   :  { %v2489_v11 = vpop.eup %2488 }
 0xb43   :  { %v1088_v12 = vadd.f32 1.0, %v2489_v11 }
 0xb45   :  { %2490 = vrcp.f32 %v1088_v12  ;;  %v1100_v18 = vand.u32 2147483648, %v1088_v12  ;;  %vm1094_vm13 = vweird.f32 %v1088_v12  ;;  %v1098_v19 = vand.u32 2147483647, %v1088_v12 }
 0xb47   :  { %v1101_v20 = vor.u32 1.1754944e-38, %v1100_v18  ;;  %vm1099_vm15 = vcmp.eq.f32.partialorder %v1098_v19, 8.507059e+37 }
 0xb4b   :  { %v2491_v13 = vpop.eup %2490 }
 0xb4c   :  { %v1090_v14 = vmul.f32 %v2491_v13, %v1088_v12  ;;  %vm1095_vm12 = vweird.f32 %v2491_v13 }
 0xb4d   :  { %vm1096_vm14 = vmor %vm1094_vm13, %vm1095_vm12 }
 0xb4e   :  { %v1091_v15 = vsub.f32 1.0, %v1090_v14 }
 0xb50   :  { %v1092_v17 = vmul.f32 %v2491_v13, %v1091_v15 }
 0xb52   :  { %v1093_v49 = vadd.f32 %v2491_v13, %v1092_v17 }
 0xb54   :  { %v1097_v50 = vsel %vm1096_vm14, %v2491_v13, %v1093_v49 }
 0xb55   :  { %v1102_v22 = vsel %vm1099_vm15, %v1101_v20, %v1097_v50 }
 0xb56   :  { %v1105_v24 = vmul.f32 %v1102_v22, %v1019_v60 }
 0xb9b   :  { %v1108_v21 = vpop.permute.xlu2 %1107 }
 0xb9c   :  { %v1110_v23 = vmul.f32 %v1108_v21, %v1102_v22 }
 0xb9e   :  { %1112 = vrot.lane.b32.xlu0 %v1110_v23, %s2610_s22 }
 0xc10   :  { %v1113_v25 = vpop.permute.xlu0 %1112 }
 0xc11   :  { %v1115_v26 = vadd.f32 %v1113_v25, %v1105_v24 }
 0xc13   :  { %2492 = vtanh.f32 %v1115_v26 }
 0xc19   :  { %v2493_v28 = vpop.eup %2492 }
 0xc1a   :  { %1118 = vrot.lane.b32.xlu1 %v2493_v28, %s2609_s8 }
 0xc8c   :  { %v1119_v32 = vpop.permute.xlu1 %1118 }
 0xc8d   :  { %v3024_v33 = vmul.f32 %v1119_v32, %v1102_v22 }
 0xc8f   :  { %1129 = vrot.lane.b32.xlu0 %v3024_v33, %s2610_s22  ;;  %v1153_v34 = vrot.slane %v3024_v33, 2 }
 0xc91   :  { %1154 = vrot.lane.b32.xlu2 %v1153_v34, %s2610_s22 }
 0xceb   :  { %v1155_v30 = vpop.permute.xlu2 %1154 }
 0xcec   :  { %2408 = vmatmul.msk.f32.vlgmr.msra.gmra.mxu3 %vm651_vm10, %v1155_v30 }
 0xd01   :  { %v1130_v38 = vpop.permute.xlu0 %1129 }
 0xd02   :  { %2407 = vmatmul.msk.f32.vlgmr.msra.gmra.mxu2 %vm651_vm10, %v1130_v38 }
 0xd6f   :  { %v1175_v41 = vpop.f32.mrf.mxu3 }
 0xd70   :  { %v1179_v44 = vrot.slane %v1175_v41, 6 }
 0xd85   :  { %v1150_v47 = vpop.f32.mrf.mxu2 }
 0xd86   :  { %v1181_v35 = vsel %vm176_vm3, %v1150_v47, %v1179_v44 }
 0xd87   :  { %v1182_v37 = vadd.f32 %v1181_v35, %v2944_v57 }
 0xd89   :  { %2494 = vtanh.f32 %v1182_v37  ;;  %v2409_v40 = vmul.f32 -1.442695, %v1182_v37 }
 0xd8b   :  { %2496 = vpow2.f32 %v2409_v40 }
 0xd8f   :  { %v2495_v36 = vpop.eup %2494 }
 0xd90   :  { %1205 = vrot.lane.b32.xlu1 %v2495_v36, %s2609_s8 }
 0xd91   :  { %v2497_v43 = vpop.eup %2496 }
 0xd92   :  { %v1186_v31 = vadd.f32 1.0, %v2497_v43 }
 0xd94   :  { %2498 = vrcp.f32 %v1186_v31  ;;  %v1198_v48 = vand.u32 2147483648, %v1186_v31  ;;  %vm1192_vm4 = vweird.f32 %v1186_v31  ;;  %v1196_v51 = vand.u32 2147483647, %v1186_v31 }
 0xd96   :  { %v1199_v52 = vor.u32 1.1754944e-38, %v1198_v48  ;;  %vm1197_vm7 = vcmp.eq.f32.partialorder %v1196_v51, 8.507059e+37 }
 0xd9a   :  { %v2499_v45 = vpop.eup %2498 }
 0xd9b   :  { %v1188_v39 = vmul.f32 %v2499_v45, %v1186_v31  ;;  %vm1193_vm2 = vweird.f32 %v2499_v45 }
 0xd9c   :  { %vm1194_vm6 = vmor %vm1192_vm4, %vm1193_vm2 }
 0xd9d   :  { %v1189_v42 = vsub.f32 1.0, %v1188_v39 }
 0xd9f   :  { %v1190_v46 = vmul.f32 %v2499_v45, %v1189_v42 }
 0xda1   :  { %v1191_v53 = vadd.f32 %v2499_v45, %v1190_v46 }
 0xda3   :  { %v1195_v57 = vsel %vm1194_vm6, %v2499_v45, %v1191_v53 }
 0xda4   :  { %v1200_v58 = vsel %vm1197_vm7, %v1199_v52, %v1195_v57 }
 0xda5   :  { %v1203_v60 = vmul.f32 %v1200_v58, %v1115_v26 }
 0xe02   :  { %v1206_v56 = vpop.permute.xlu1 %1205 }
 0xe03   :  { %v1208_v59 = vmul.f32 %v1206_v56, %v1200_v58 }
 0xe05   :  { %1210 = vrot.lane.b32.xlu2 %v1208_v59, %s2610_s22 }
 0xe5f   :  { %v1211_v62 = vpop.permute.xlu2 %1210 }
 0xe60   :  { %v1213_v63 = vadd.f32 %v1211_v62, %v1203_v60 }
 0xe62   :  { %2500 = vtanh.f32 %v1213_v63 }
 0xe68   :  { %v2501_v0 = vpop.eup %2500 }
 0xe69   :  { %1216 = vrot.lane.b32.xlu0 %v2501_v0, %s2609_s8  ;;  %v1414_v0 = vrot.slane %v2991_v27, 4 }
 0xedb   :  { %v1217_v2 = vpop.permute.xlu0 %1216 }
 0xedc   :  { %v3037_v3 = vmul.f32 %v1217_v2, %v1200_v58 }
 0xede   :  { %1224 = vrot.lane.b32.xlu2 %v3037_v3, %s2610_s22  ;;  %v1248_v4 = vrot.slane %v3037_v3, 2 }
 0xee0   :  { %1249 = vrot.lane.b32.xlu1 %v1248_v4, %s2610_s22 }
 0xf38   :  { %v1225_v5 = vpop.permute.xlu2 %1224 }
 0xf39   :  { %2410 = vmatmul.msk.f32.vlgmr.msrb.gmra.mxu0 %vm651_vm10, %v1225_v5 }
 0xf52   :  { %v1250_v6 = vpop.permute.xlu1 %1249 }
 0xf53   :  { %2411 = vmatmul.msk.f32.vlgmr.msrb.gmra.mxu1 %vm651_vm10, %v1250_v6  ;;  %v1443_v6 = vld [vmem:[%s3331_s11 + $0x18] sm:$0xff] }
 0xf54   :  { %1503 = vmatpush.msra.mxu1 %v1443_v6 }
 0xfb6   :  { %v1245_v9 = vpop.f32.mrf.mxu0 }
 0xfd0   :  { %v1270_v7 = vpop.f32.mrf.mxu1 }
 0xfd1   :  { %v1274_v8 = vrot.slane %v1270_v7, 6  ;;  %v1441_v7 = vld [vmem:[%s3331_s11 + $0x8] sm:$0xff] }
 0xfd3   :  { %v1276_v10 = vsel %vm176_vm3, %v1245_v9, %v1274_v8  ;;  %v1440_v8 = vld [vmem:[%s3331_s11] sm:$0xff] }
 0xfd4   :  { %v1277_v11 = vadd.f32 %v1276_v10, %v2937_v54 }
 0xfd6   :  { %2502 = vtanh.f32 %v1277_v11  ;;  %v2412_v13 = vmul.f32 -1.442695, %v1277_v11 }
 0xfd8   :  { %2504 = vpow2.f32 %v2412_v13 }
 0xfdc   :  { %v2503_v12 = vpop.eup %2502 }
 0xfdd   :  { %1300 = vrot.lane.b32.xlu0 %v2503_v12, %s2609_s8 }
 0xfde   :  { %v2505_v14 = vpop.eup %2504 }
 0xfdf   :  { %v1281_v15 = vadd.f32 1.0, %v2505_v14  ;;  %v1437_v14 = vsel %vm176_vm3, %v3012_v1, %v2991_v27  ;;  %v1445_v27 = vld [vmem:[%s3331_s11 + $0x28] sm:$0xff] }
 0xfe1   :  { %2506 = vrcp.f32 %v1281_v15  ;;  %v1293_v20 = vand.u32 2147483648, %v1281_v15  ;;  %vm1287_vm9 = vweird.f32 %v1281_v15  ;;  %v1291_v21 = vand.u32 2147483647, %v1281_v15 }
 0xfe3   :  { %v1294_v22 = vor.u32 1.1754944e-38, %v1293_v20  ;;  %vm1292_vm12 = vcmp.eq.f32.partialorder %v1291_v21, 8.507059e+37  ;;  %v1417_v21 = vrot.slane %v3037_v3, 6 }
 0xfe7   :  { %v2507_v17 = vpop.eup %2506 }
 0xfe8   :  { %v1283_v49 = vmul.f32 %v2507_v17, %v1281_v15  ;;  %vm1288_vm8 = vweird.f32 %v2507_v17 }
 0xfe9   :  { %vm1289_vm11 = vmor %vm1287_vm9, %vm1288_vm8 }
 0xfea   :  { %v1284_v18 = vsub.f32 1.0, %v1283_v49 }
 0xfec   :  { %v1285_v19 = vmul.f32 %v2507_v17, %v1284_v18  ;;  %v1447_v18 = vld [vmem:[%s3331_s11 + $0x38] sm:$0xff] }
 0xfed   :  { %1470 = vmatpush.msra.mxu0 %v1447_v18 }
 0xfee   :  { %v1286_v50 = vadd.f32 %v2507_v17, %v1285_v19  ;;  %v1446_v19 = vld [vmem:[%s3331_s11 + $0x30] sm:$0xff] }
 0xfef   :  { %1471 = vmatpush.msra.mxu0 %v1446_v19 }
 0xff0   :  { %v1290_v54 = vsel %vm1289_vm11, %v2507_v17, %v1286_v50  ;;  %v1432_v17 = vrot.slane %v2949_v16, 4 }
 0xff1   :  { %v1295_v24 = vsel %vm1292_vm12, %v1294_v22, %v1290_v54  ;;  %1472 = vmatpush.msra.mxu0 %v1445_v27  ;;  %v1430_v22 = vrot.slane %v3024_v33, 4 }
 0xff2   :  { %v1298_v26 = vmul.f32 %v1295_v24, %v1213_v63  ;;  %v1412_v63 = vrot.slane %v2970_v61, 6  ;;  %v1442_v61 = vld [vmem:[%s3331_s11 + $0x10] sm:$0xff] }
 0xff3   :  { %1504 = vmatpush.msra.mxu1 %v1442_v61 }
 0xff4   :  { %v1424_v2 = vsel %vm176_vm3, %v2949_v16, %v1412_v63  ;;  %v1438_v15 = vsel %vm78_vm0, %v1437_v14, %v1412_v63  ;;  %v1444_v16 = vld [vmem:[%s3331_s11 + $0x20] sm:$0xff] }
 0xff5   :  { %v1425_v4 = vsel %vm78_vm0, %v1424_v2, %v1414_v0  ;;  %1505 = vmatpush.msra.mxu1 %v1441_v7  ;;  %v1439_v49 = vsel %vm55_vm1, %v1438_v15, %v1432_v17  ;;  %1473 = vmatpush.msra.mxu0 %v1444_v16 }
 0xff6   :  { %v1426_v5 = vsel %vm55_vm1, %v1425_v4, %v3012_v1 }
 0xff7   :  { %1506 = vmatpush.msra.mxu1 %v1440_v8 }
0x104f   :  { %v1301_v23 = vpop.permute.xlu0 %1300 }
0x1050   :  { %v1303_v25 = vmul.f32 %v1301_v23, %v1295_v24 }
0x1052   :  { %1305 = vrot.lane.b32.xlu1 %v1303_v25, %s2610_s22 }
0x10c4   :  { %v1306_v28 = vpop.permute.xlu1 %1305 }
0x10c5   :  { %v1308_v32 = vadd.f32 %v1306_v28, %v1298_v26  ;;  %v1427_v26 = vsel %vm176_vm3, %v3024_v33, %v1417_v21  ;;  %v3129_v33 = vld [vmem:[%s3334_s14] sm:$0xff] }
0x10c7   :  { %2508 = vtanh.f32 %v1308_v32 }
0x10cd   :  { %v2509_v34 = vpop.eup %2508 }
0x10ce   :  { %1311 = vrot.lane.b32.xlu2 %v2509_v34, %s2609_s8  ;;  %v3124_v34 = vld [vmem:[%s3333_s13 + $0x8] sm:$0xff] }
0x10cf   :  { %1546 = vmatpush.msra.mxu2 %v3124_v34  ;;  %1739 = vmatpush.msrb.mxu0 %v3124_v34 }
0x1128   :  { %v1312_v30 = vpop.permute.xlu2 %1311 }
0x1129   :  { %v3050_v38 = vmul.f32 %v1312_v30, %v1295_v24  ;;  %v3136_v30 = vld [vmem:[%s3333_s13] sm:$0xff] }
0x112a   :  { %1547 = vmatpush.msra.mxu2 %v3136_v30  ;;  %1740 = vmatpush.msrb.mxu0 %v3136_v30 }
0x112b   :  { %1321 = vrot.lane.b32.xlu1 %v3050_v38, %s2610_s22  ;;  %v1345_v41 = vrot.slane %v3050_v38, 2  ;;  %v1419_v25 = vrot.slane %v3050_v38, 4 }
0x112d   :  { %1346 = vrot.lane.b32.xlu0 %v1345_v41, %s2610_s22  ;;  %v1428_v28 = vsel %vm78_vm0, %v1427_v26, %v1419_v25 }
0x119d   :  { %v1322_v44 = vpop.permute.xlu1 %1321 }
0x119e   :  { %2413 = vmatmul.msk.f32.vlgmr.msrb.gmra.mxu2 %vm651_vm10, %v1322_v44  ;;  %v2453_v44 = vld [vmem:[%s3332_s12] ss:$0 sm:$0xff]  ;;  %s2611_s12 = smov 96  }
0x119f   :  { %v1347_v47 = vpop.permute.xlu0 %1346  ;;  %1641 = vmatpush.msrb.mxu2 %v3124_v34 }
0x11a0   :  { %2414 = vmatmul.msk.f32.vlgmr.msrb.gmra.mxu3 %vm651_vm10, %v1347_v47 }
0x11a1   :  { %1642 = vmatpush.msrb.mxu2 %v3136_v30 }
0x11a6   :  { %1548 = vmatmul.f32.vlgmr.msra.gmra.mxu2 %v2608_v29 }
0x11a7   :  { %1838 = vmatpush.msra.mxu2 %v3124_v34 }
0x11a9   :  { %1839 = vmatpush.msra.mxu2 %v3136_v30 }
0x1221   :  { %v1342_v36 = vpop.f32.mrf.mxu2 }
0x1223   :  { %v1367_v35 = vpop.f32.mrf.mxu3 }
0x1224   :  { %v1371_v37 = vrot.slane %v1367_v35, 6 }
0x1226   :  { %v1373_v40 = vsel %vm176_vm3, %v1342_v36, %v1371_v37 }
0x1227   :  { %v1374_v43 = vadd.f32 %v1373_v40, %v2940_v55 }
0x1229   :  { %2510 = vtanh.f32 %v1374_v43  ;;  %v2415_v45 = vmul.f32 -1.442695, %v1374_v43 }
0x122b   :  { %2512 = vpow2.f32 %v2415_v45 }
0x122f   :  { %v2511_v31 = vpop.eup %2510 }
0x1230   :  { %1397 = vrot.lane.b32.xlu2 %v2511_v31, %s2609_s8 }
0x1231   :  { %v2513_v39 = vpop.eup %2512 }
0x1232   :  { %v1378_v42 = vadd.f32 1.0, %v2513_v39 }
0x1234   :  { %2514 = vrcp.f32 %v1378_v42  ;;  %v1390_v52 = vand.u32 2147483648, %v1378_v42  ;;  %vm1384_vm14 = vweird.f32 %v1378_v42  ;;  %v1388_v56 = vand.u32 2147483647, %v1378_v42 }
0x1236   :  { %v1391_v58 = vor.u32 1.1754944e-38, %v1390_v52  ;;  %vm1389_vm2 = vcmp.eq.f32.partialorder %v1388_v56, 8.507059e+37 }
0x123a   :  { %v2515_v46 = vpop.eup %2514 }
0x123b   :  { %v1380_v53 = vmul.f32 %v2515_v46, %v1378_v42  ;;  %vm1385_vm13 = vweird.f32 %v2515_v46 }
0x123c   :  { %vm1386_vm15 = vmor %vm1384_vm14, %vm1385_vm13 }
0x123d   :  { %v1381_v48 = vsub.f32 1.0, %v1380_v53  ;;  %v1549_v53 = vpop.f32.mrf.mxu2 }
0x123f   :  { %v1382_v51 = vmul.f32 %v2515_v46, %v1381_v48 }
0x1241   :  { %v1383_v57 = vadd.f32 %v2515_v46, %v1382_v51 }
0x1243   :  { %v1387_v55 = vsel %vm1386_vm15, %v2515_v46, %v1383_v57 }
0x1244   :  { %v1392_v60 = vsel %vm1389_vm2, %v1391_v58, %v1387_v55 }
0x1245   :  { %v1395_v9 = vmul.f32 %v1392_v60, %v1308_v32  ;;  %v3119_v32 = vld [vmem:[%s3334_s14 + $0x8] sm:$0xff] }
0x1246   :  { %1566 = vmatpush.msra.mxu3 %v3119_v32  ;;  %1764 = vmatpush.msrb.mxu1 %v3119_v32 }
0x1248   :  { %1567 = vmatpush.msra.mxu3 %v3129_v33  ;;  %1765 = vmatpush.msrb.mxu1 %v3129_v33 }
0x1249   :  { %1568 = vmatmul.f32.vlgmr.msra.gmra.mxu3 %v2608_v29 }
0x124a   :  { %1666 = vmatpush.msrb.mxu3 %v3119_v32 }
0x124c   :  { %1667 = vmatpush.msrb.mxu3 %v3129_v33 }
0x124e   :  { %1863 = vmatpush.msra.mxu3 %v3119_v32 }
0x1250   :  { %1864 = vmatpush.msra.mxu3 %v3129_v33 }
0x128a   :  { %v1398_v59 = vpop.permute.xlu2 %1397 }
0x128b   :  { %v1400_v62 = vmul.f32 %v1398_v59, %v1392_v60 }
0x128d   :  { %1402 = vrot.lane.b32.xlu0 %v1400_v62, %s2610_s22 }
0x1295   :  { %1483 = vrot.lane.b32.xlu0 %v1426_v5, %s2610_s22 }
0x12cc   :  { %v1569_v42 = vpop.f32.mrf.mxu3 }
0x12cd   :  { %v1573_v46 = vrot.slane %v1569_v42, 6 }
0x12cf   :  { %v1575_v48 = vsel %vm176_vm3, %v1549_v53, %v1573_v46 }
0x12ff   :  { %v1403_v10 = vpop.permute.xlu0 %1402 }
0x1300   :  { %v1405_v11 = vadd.f32 %v1403_v10, %v1395_v9 }
0x1302   :  { %2516 = vtanh.f32 %v1405_v11 }
0x1307   :  { %v1484_v12 = vpop.permute.xlu0 %1483 }
0x1308   :  { %v2517_v13 = vpop.eup %2516  ;;  %2418 = vmatmul.msk.f32.vlgmr.msra.gmra.mxu1 %vm651_vm10, %v1484_v12 }
0x1309   :  { %1408 = vrot.lane.b32.xlu1 %v2517_v13, %s2609_s8  ;;  %1959 = vmatpush.msra.mxu1 %v3119_v32 }
0x130b   :  { %1960 = vmatpush.msra.mxu1 %v3129_v33 }
0x1311   :  { %1452 = vrot.lane.b32.xlu1 %v1439_v49, %s2610_s22 }
0x137b   :  { %v1409_v1 = vpop.permute.xlu1 %1408 }
0x137c   :  { %v1411_v50 = vmul.f32 %v1409_v1, %v1392_v60 }
0x137e   :  { %v1422_v20 = vrot.slane %v1411_v50, 2 }
0x1380   :  { %v1434_v54 = vsel %vm176_vm3, %v1422_v20, %v3050_v38  ;;  %v1429_v3 = vsel %vm55_vm1, %v1428_v28, %v1422_v20 }
0x1381   :  { %v1435_v23 = vsel %vm78_vm0, %v1434_v54, %v1417_v21 }
0x1382   :  { %v1436_v24 = vsel %vm55_vm1, %v1435_v23, %v1430_v22 }
0x1383   :  { %1450 = vrot.lane.b32.xlu2 %v1436_v24, %s2610_s22  ;;  %v1453_v38 = vpop.permute.xlu1 %1452 }
0x1385   :  { %v1508_v47 = vpop.f32.mrf.mxu1 }
0x138b   :  { %1485 = vrot.lane.b32.xlu2 %v1429_v3, %s2610_s22 }
0x13dd   :  { %v1451_v29 = vpop.permute.xlu2 %1450 }
0x13de   :  { %2416 = vmatmul.msk.f32.vlgmr.msra.gmra.mxu0 %vm651_vm10, %v1451_v29 }
0x13df   :  { %1934 = vmatpush.msra.mxu0 %v3124_v34 }
0x13e1   :  { %1935 = vmatpush.msra.mxu0 %v3136_v30 }
0x13e5   :  { %v1486_v41 = vpop.permute.xlu2 %1485 }
0x13e6   :  { %2417 = vmatmul.msk.f32.gmra.mxu0 %vm651_vm10, %v1453_v38  ;;  %2419 = vmatmul.msk.f32.gmra.mxu1 %vm651_vm10, %v1486_v41 }
0x145b   :  { %v1475_v35 = vpop.f32.mrf.mxu0 }
0x145c   :  { %v1509_v37 = vadd.f32 %v1508_v47, %v1475_v35 }
0x145e   :  { %v3164_v36 = vadd.f32 %v2453_v44, %v1509_v37 }
0x1460   :  { %v1615_v1 = vrot.slane %v3164_v36, 2 }
0x1463   :  { %v1478_v40 = vpop.f32.mrf.mxu0  ;;  %v1511_v43 = vpop.f32.mrf.mxu1 }
0x1464   :  { %v1512_v31 = vadd.f32 %v1511_v43, %v1478_v40 }
0x1466   :  { %v3166_v45 = vadd.f32 %v2453_v44, %v1512_v31 }
0x1468   :  { %v1525_v39 = vrot.slane %v3166_v45, 4  ;;  %v1617_v14 = vrot.slane %v3166_v45, 2 }
0x146a   :  { %1526 = vrot.lane.b32.xlu0 %v1525_v39, %s2609_s8 }
0x14dc   :  { %v1527_v51 = vpop.permute.xlu0 %1526 }
0x14dd   :  { %v1529_v57 = vsel %vm176_vm3, %v3164_v36, %v1527_v51 }
0x14de   :  { %v1576_v52 = vadd.f32 %v1575_v48, %v1529_v57 }
0x14e0   :  { %2518 = vtanh.f32 %v1576_v52  ;;  %v2420_v55 = vmul.f32 -1.442695, %v1576_v52 }
0x14e2   :  { %2520 = vpow2.f32 %v2420_v55 }
0x14e6   :  { %v2519_v56 = vpop.eup %2518 }
0x14e7   :  { %1599 = vrot.lane.b32.xlu1 %v2519_v56, %s2611_s12 }
0x14e8   :  { %v2521_v58 = vpop.eup %2520 }
0x14e9   :  { %v1580_v59 = vadd.f32 1.0, %v2521_v58 }
0x14eb   :  { %2522 = vrcp.f32 %v1580_v59  ;;  %v1592_v4 = vand.u32 2147483648, %v1580_v59  ;;  %vm1586_vm4 = vweird.f32 %v1580_v59  ;;  %v1590_v5 = vand.u32 2147483647, %v1580_v59 }
0x14ed   :  { %v1593_v61 = vor.u32 1.1754944e-38, %v1592_v4  ;;  %vm1591_vm7 = vcmp.eq.f32.partialorder %v1590_v5, 8.507059e+37 }
0x14f1   :  { %v2523_v60 = vpop.eup %2522 }
0x14f2   :  { %v1582_v62 = vmul.f32 %v2523_v60, %v1580_v59  ;;  %vm1587_vm10 = vweird.f32 %v2523_v60 }
0x14f3   :  { %vm1588_vm6 = vmor %vm1586_vm4, %vm1587_vm10 }
0x14f4   :  { %v1583_v63 = vsub.f32 1.0, %v1582_v62 }
0x14f6   :  { %v1584_v0 = vmul.f32 %v2523_v60, %v1583_v63 }
0x14f8   :  { %v1585_v2 = vadd.f32 %v2523_v60, %v1584_v0 }
0x14fa   :  { %v1589_v6 = vsel %vm1588_vm6, %v2523_v60, %v1585_v2  ;;  %v1714_v60 = vrot.slane %v3164_v36, 4 }
0x14fb   :  { %v1594_v8 = vsel %vm1591_vm7, %v1593_v61, %v1589_v6 }
0x14fc   :  { %v1597_v10 = vmul.f32 0.0, %v1594_v8 }
0x1559   :  { %v1600_v7 = vpop.permute.xlu1 %1599 }
0x155a   :  { %v1602_v9 = vmul.f32 %v1600_v7, %v1594_v8 }
0x155c   :  { %1604 = vrot.lane.b32.xlu2 %v1602_v9, %s2612_s6 }
0x15b6   :  { %v1605_v11 = vpop.permute.xlu2 %1604 }
0x15b7   :  { %v1607_v12 = vadd.f32 %v1605_v11, %v1597_v10 }
0x15b9   :  { %2524 = vtanh.f32 %v1607_v12 }
0x15bf   :  { %v2525_v13 = vpop.eup %2524 }
0x15c0   :  { %1610 = vrot.lane.b32.xlu0 %v2525_v13, %s2610_s22 }
0x15c8   :  { %1618 = vrot.lane.b32.xlu0 %v1617_v14, %s2609_s8 }
0x1632   :  { %v1611_v15 = vpop.permute.xlu0 %1610 }
0x1633   :  { %v3182_v17 = vmul.f32 %v1611_v15, %v1594_v8 }
0x1635   :  { %1623 = vrot.lane.b32.xlu2 %v3182_v17, %s2613_s23  ;;  %v1647_v49 = vrot.slane %v3182_v17, 2 }
0x1637   :  { %1648 = vrot.lane.b32.xlu1 %v1647_v49, %s2613_s23 }
0x163a   :  { %v1619_v27 = vpop.permute.xlu0 %1618 }
0x163b   :  { %v1621_v21 = vsel %vm176_vm3, %v1615_v1, %v1619_v27 }
0x168f   :  { %v1624_v18 = vpop.permute.xlu2 %1623 }
0x1690   :  { %2421 = vmatmul.msk.f32.vlgmr.msrb.gmra.mxu2 %vm586_vm5, %v1624_v18 }
0x1691   :  { %2031 = vmatpush.msrb.mxu2 %v3124_v34 }
0x1693   :  { %2032 = vmatpush.msrb.mxu2 %v3136_v30 }
0x16a9   :  { %v1649_v19 = vpop.permute.xlu1 %1648 }
0x16aa   :  { %2422 = vmatmul.msk.f32.vlgmr.msrb.gmra.mxu3 %vm586_vm5, %v1649_v19 }
0x16ab   :  { %2056 = vmatpush.msrb.mxu3 %v3119_v32 }
0x16ad   :  { %2057 = vmatpush.msrb.mxu3 %v3129_v33 }
0x1713   :  { %v1644_v20 = vpop.f32.mrf.mxu2 }
0x172d   :  { %v1669_v16 = vpop.f32.mrf.mxu3 }
0x172e   :  { %v1673_v50 = vrot.slane %v1669_v16, 6 }
0x1730   :  { %v1675_v54 = vsel %vm176_vm3, %v1644_v20, %v1673_v50 }
0x1731   :  { %v1676_v22 = vadd.f32 %v1675_v54, %v1621_v21 }
0x1733   :  { %2526 = vtanh.f32 %v1676_v22  ;;  %v2423_v24 = vmul.f32 -1.442695, %v1676_v22  ;;  %v1814_v22 = vrot.slane %v3166_v45, 6 }
0x1735   :  { %2528 = vpow2.f32 %v2423_v24 }
0x1739   :  { %v2527_v23 = vpop.eup %2526 }
0x173a   :  { %1699 = vrot.lane.b32.xlu1 %v2527_v23, %s2611_s12 }
0x173b   :  { %v2529_v25 = vpop.eup %2528 }
0x173c   :  { %v1680_v26 = vadd.f32 1.0, %v2529_v25 }
0x173e   :  { %2530 = vrcp.f32 %v1680_v26  ;;  %v1692_v44 = vand.u32 2147483648, %v1680_v26  ;;  %vm1686_vm9 = vweird.f32 %v1680_v26  ;;  %v1690_v47 = vand.u32 2147483647, %v1680_v26 }
0x1740   :  { %v1693_v37 = vor.u32 1.1754944e-38, %v1692_v44  ;;  %vm1691_vm12 = vcmp.eq.f32.partialorder %v1690_v47, 8.507059e+37 }
0x1744   :  { %v2531_v28 = vpop.eup %2530 }
0x1745   :  { %v1682_v3 = vmul.f32 %v2531_v28, %v1680_v26  ;;  %vm1687_vm8 = vweird.f32 %v2531_v28 }
0x1746   :  { %vm1688_vm11 = vmor %vm1686_vm9, %vm1687_vm8 }
0x1747   :  { %v1683_v29 = vsub.f32 1.0, %v1682_v3 }
0x1749   :  { %v1684_v38 = vmul.f32 %v2531_v28, %v1683_v29 }
0x174b   :  { %v1685_v41 = vadd.f32 %v2531_v28, %v1684_v38  ;;  %v1812_v38 = vrot.slane %v3164_v36, 6 }
0x174d   :  { %v1689_v35 = vsel %vm1688_vm11, %v2531_v28, %v1685_v41 }
0x174e   :  { %v1694_v43 = vsel %vm1691_vm12, %v1693_v37, %v1689_v35 }
0x174f   :  { %v1697_v42 = vmul.f32 %v1694_v43, %v1607_v12 }
0x17ac   :  { %v1700_v40 = vpop.permute.xlu1 %1699 }
0x17ad   :  { %v1702_v31 = vmul.f32 %v1700_v40, %v1694_v43 }
0x17af   :  { %1704 = vrot.lane.b32.xlu2 %v1702_v31, %s2612_s6 }
0x1809   :  { %v1705_v46 = vpop.permute.xlu2 %1704 }
0x180a   :  { %v1707_v53 = vadd.f32 %v1705_v46, %v1697_v42 }
0x180c   :  { %2532 = vtanh.f32 %v1707_v53 }
0x1812   :  { %v2533_v48 = vpop.eup %2532 }
0x1813   :  { %1710 = vrot.lane.b32.xlu0 %v2533_v48, %s2610_s22 }
0x181b   :  { %1716 = vrot.lane.b32.xlu0 %v3166_v45, %s2609_s8 }
0x1885   :  { %v1711_v51 = vpop.permute.xlu0 %1710 }
0x1886   :  { %v3204_v57 = vmul.f32 %v1711_v51, %v1694_v43 }
0x1888   :  { %1721 = vrot.lane.b32.xlu2 %v3204_v57, %s2613_s23  ;;  %v1745_v52 = vrot.slane %v3204_v57, 2 }
0x188a   :  { %1746 = vrot.lane.b32.xlu1 %v1745_v52, %s2613_s23 }
0x188d   :  { %v1717_v58 = vpop.permute.xlu0 %1716 }
0x188e   :  { %v1719_v0 = vsel %vm176_vm3, %v1714_v60, %v1717_v58 }
0x18e2   :  { %v1722_v56 = vpop.permute.xlu2 %1721 }
0x18e3   :  { %2424 = vmatmul.msk.f32.vlgmr.msrb.gmra.mxu0 %vm586_vm5, %v1722_v56 }
0x18e4   :  { %2128 = vmatpush.msrb.mxu0 %v3124_v34 }
0x18e6   :  { %2129 = vmatpush.msrb.mxu0 %v3136_v30 }
0x18fc   :  { %v1747_v55 = vpop.permute.xlu1 %1746 }
0x18fd   :  { %2425 = vmatmul.msk.f32.vlgmr.msrb.gmra.mxu1 %vm586_vm5, %v1747_v55 }
0x18fe   :  { %2153 = vmatpush.msrb.mxu1 %v3119_v32 }
0x1900   :  { %2154 = vmatpush.msrb.mxu1 %v3129_v33 }
0x1960   :  { %v1742_v63 = vpop.f32.mrf.mxu0 }
0x197a   :  { %v1767_v59 = vpop.f32.mrf.mxu1 }
0x197b   :  { %v1771_v62 = vrot.slane %v1767_v59, 6 }
0x197d   :  { %v1773_v2 = vsel %vm176_vm3, %v1742_v63, %v1771_v62 }
0x197e   :  { %v1774_v4 = vadd.f32 %v1773_v2, %v1719_v0 }
0x1980   :  { %2534 = vtanh.f32 %v1774_v4  ;;  %v2426_v6 = vmul.f32 -1.442695, %v1774_v4 }
0x1982   :  { %2536 = vpow2.f32 %v2426_v6  ;;  %v2309_v6 = vrot.slane %v3204_v57, 6 }
0x1986   :  { %v2535_v5 = vpop.eup %2534 }
0x1987   :  { %1797 = vrot.lane.b32.xlu1 %v2535_v5, %s2611_s12 }
0x1988   :  { %v2537_v61 = vpop.eup %2536 }
0x1989   :  { %v1778_v7 = vadd.f32 1.0, %v2537_v61  ;;  %v2311_v61 = vrot.slane %v3182_v17, 4 }
0x198b   :  { %2538 = vrcp.f32 %v1778_v7  ;;  %v1790_v13 = vand.u32 2147483648, %v1778_v7  ;;  %vm1784_vm14 = vweird.f32 %v1778_v7  ;;  %v1788_v15 = vand.u32 2147483647, %v1778_v7 }
0x198d   :  { %v1791_v18 = vor.u32 1.1754944e-38, %v1790_v13  ;;  %vm1789_vm2 = vcmp.eq.f32.partialorder %v1788_v15, 8.507059e+37 }
0x1991   :  { %v2539_v8 = vpop.eup %2538 }
0x1992   :  { %v1780_v9 = vmul.f32 %v2539_v8, %v1778_v7  ;;  %vm1785_vm13 = vweird.f32 %v2539_v8 }
0x1993   :  { %vm1786_vm15 = vmor %vm1784_vm14, %vm1785_vm13 }
0x1994   :  { %v1781_v10 = vsub.f32 1.0, %v1780_v9 }
0x1996   :  { %v1782_v11 = vmul.f32 %v2539_v8, %v1781_v10 }
0x1998   :  { %v1783_v12 = vadd.f32 %v2539_v8, %v1782_v11 }
0x199a   :  { %v1787_v49 = vsel %vm1786_vm15, %v2539_v8, %v1783_v12 }
0x199b   :  { %v1792_v27 = vsel %vm1789_vm2, %v1791_v18, %v1787_v49 }
0x199c   :  { %v1795_v50 = vmul.f32 %v1792_v27, %v1707_v53 }
0x19f9   :  { %v1798_v19 = vpop.permute.xlu1 %1797 }
0x19fa   :  { %v1800_v16 = vmul.f32 %v1798_v19, %v1792_v27 }
0x19fc   :  { %1802 = vrot.lane.b32.xlu2 %v1800_v16, %s2612_s6 }
0x1a56   :  { %v1803_v20 = vpop.permute.xlu2 %1802 }
0x1a57   :  { %v1805_v21 = vadd.f32 %v1803_v20, %v1795_v50 }
0x1a59   :  { %2540 = vtanh.f32 %v1805_v21 }
0x1a5f   :  { %v2541_v54 = vpop.eup %2540 }
0x1a60   :  { %1808 = vrot.lane.b32.xlu0 %v2541_v54, %s2610_s22 }
0x1a68   :  { %1815 = vrot.lane.b32.xlu0 %v1814_v22, %s2609_s8 }
0x1ad2   :  { %v1809_v23 = vpop.permute.xlu0 %1808 }
0x1ad3   :  { %v1811_v24 = vmul.f32 %v1809_v23, %v1792_v27 }
0x1ad5   :  { %1820 = vrot.lane.b32.xlu2 %v1811_v24, %s2613_s23  ;;  %v1844_v25 = vrot.slane %v1811_v24, 2 }
0x1ad7   :  { %1845 = vrot.lane.b32.xlu1 %v1844_v25, %s2613_s23 }
0x1ada   :  { %v1816_v3 = vpop.permute.xlu0 %1815 }
0x1adb   :  { %v1818_v47 = vsel %vm176_vm3, %v1812_v38, %v1816_v3 }
0x1b2f   :  { %v1821_v26 = vpop.permute.xlu2 %1820 }
0x1b30   :  { %2427 = vmatmul.msk.f32.vlgmr.msra.gmra.mxu2 %vm586_vm5, %v1821_v26 }
0x1b31   :  { %2225 = vmatpush.msra.mxu2 %v3124_v34 }
0x1b33   :  { %2226 = vmatpush.msra.mxu2 %v3136_v30 }
0x1b49   :  { %v1846_v28 = vpop.permute.xlu1 %1845 }
0x1b4a   :  { %2428 = vmatmul.msk.f32.vlgmr.msra.gmra.mxu3 %vm586_vm5, %v1846_v28 }
0x1b4b   :  { %2250 = vmatpush.msra.mxu3 %v3119_v32 }
0x1b4d   :  { %2251 = vmatpush.msra.mxu3 %v3129_v33 }
0x1bb3   :  { %v1841_v44 = vpop.f32.mrf.mxu2 }
0x1bcd   :  { %v1866_v29 = vpop.f32.mrf.mxu3 }
0x1bce   :  { %v1870_v41 = vrot.slane %v1866_v29, 6 }
0x1bd0   :  { %v1872_v34 = vsel %vm176_vm3, %v1841_v44, %v1870_v41 }
0x1bd1   :  { %v1873_v30 = vadd.f32 %v1872_v34, %v1818_v47 }
0x1bd3   :  { %2542 = vtanh.f32 %v1873_v30  ;;  %v2429_v32 = vmul.f32 -1.442695, %v1873_v30 }
0x1bd5   :  { %2544 = vpow2.f32 %v2429_v32 }
0x1bd9   :  { %v2543_v35 = vpop.eup %2542 }
0x1bda   :  { %1896 = vrot.lane.b32.xlu1 %v2543_v35, %s2611_s12 }
0x1bdb   :  { %v2545_v33 = vpop.eup %2544 }
0x1bdc   :  { %v1877_v37 = vadd.f32 1.0, %v2545_v33 }
0x1bde   :  { %2546 = vrcp.f32 %v1877_v37  ;;  %v1889_v53 = vand.u32 2147483648, %v1877_v37  ;;  %vm1883_vm4 = vweird.f32 %v1877_v37  ;;  %v1887_v48 = vand.u32 2147483647, %v1877_v37 }
0x1be0   :  { %v1890_v52 = vor.u32 1.1754944e-38, %v1889_v53  ;;  %vm1888_vm7 = vcmp.eq.f32.partialorder %v1887_v48, 8.507059e+37 }
0x1be4   :  { %v2547_v40 = vpop.eup %2546 }
0x1be5   :  { %v1879_v43 = vmul.f32 %v2547_v40, %v1877_v37  ;;  %vm1884_vm10 = vweird.f32 %v2547_v40 }
0x1be6   :  { %vm1885_vm6 = vmor %vm1883_vm4, %vm1884_vm10 }
0x1be7   :  { %v1880_v31 = vsub.f32 1.0, %v1879_v43 }
0x1be9   :  { %v1881_v42 = vmul.f32 %v2547_v40, %v1880_v31 }
0x1beb   :  { %v1882_v46 = vadd.f32 %v2547_v40, %v1881_v42 }
0x1bed   :  { %v1886_v51 = vsel %vm1885_vm6, %v2547_v40, %v1882_v46 }
0x1bee   :  { %v1891_v55 = vsel %vm1888_vm7, %v1890_v52, %v1886_v51 }
0x1bef   :  { %v1894_v59 = vmul.f32 %v1891_v55, %v1805_v21 }
0x1c4c   :  { %v1897_v56 = vpop.permute.xlu1 %1896 }
0x1c4d   :  { %v1899_v58 = vmul.f32 %v1897_v56, %v1891_v55 }
0x1c4f   :  { %1901 = vrot.lane.b32.xlu2 %v1899_v58, %s2612_s6 }
0x1ca9   :  { %v1902_v62 = vpop.permute.xlu2 %1901 }
0x1caa   :  { %v1904_v63 = vadd.f32 %v1902_v62, %v1894_v59 }
0x1cac   :  { %2548 = vtanh.f32 %v1904_v63 }
0x1cb2   :  { %v2549_v0 = vpop.eup %2548 }
0x1cb3   :  { %1907 = vrot.lane.b32.xlu0 %v2549_v0, %s2610_s22 }
0x1cbb   :  { %1911 = vrot.lane.b32.xlu0 %v1714_v60, %s2609_s8 }
0x1d25   :  { %v1908_v2 = vpop.permute.xlu0 %1907 }
0x1d26   :  { %v1910_v4 = vmul.f32 %v1908_v2, %v1891_v55 }
0x1d28   :  { %v1940_v5 = vrot.slane %v1910_v4, 2  ;;  %1916 = vrot.lane.b32.xlu2 %v1910_v4, %s2613_s23 }
0x1d2a   :  { %1941 = vrot.lane.b32.xlu1 %v1940_v5, %s2613_s23  ;;  %v2313_v7 = vsel %vm176_vm3, %v1940_v5, %v1811_v24 }
0x1d2b   :  { %v2314_v8 = vsel %vm78_vm0, %v2313_v7, %v2309_v6 }
0x1d2c   :  { %v3254_v9 = vsel %vm55_vm1, %v2314_v8, %v2311_v61 }
0x1d2d   :  { %v1912_v11 = vpop.permute.xlu0 %1911 }
0x1d2e   :  { %v1914_v17 = vsel %vm176_vm3, %v3166_v45, %v1912_v11 }
0x1d82   :  { %v1917_v10 = vpop.permute.xlu2 %1916 }
0x1d83   :  { %2430 = vmatmul.msk.f32.vlgmr.msra.gmra.mxu0 %vm586_vm5, %v1917_v10 }
0x1d9c   :  { %v1942_v60 = vpop.permute.xlu1 %1941 }
0x1d9d   :  { %2431 = vmatmul.msk.f32.vlgmr.msra.gmra.mxu1 %vm586_vm5, %v1942_v60 }
0x1e00   :  { %v1937_v13 = vpop.f32.mrf.mxu0 }
0x1e1a   :  { %v1962_v12 = vpop.f32.mrf.mxu1 }
0x1e1b   :  { %v1966_v57 = vrot.slane %v1962_v12, 6 }
0x1e1d   :  { %v1968_v15 = vsel %vm176_vm3, %v1937_v13, %v1966_v57 }
0x1e1e   :  { %v1969_v49 = vadd.f32 %v1968_v15, %v1914_v17 }
0x1e20   :  { %2550 = vtanh.f32 %v1969_v49  ;;  %v2432_v19 = vmul.f32 -1.442695, %v1969_v49 }
0x1e22   :  { %2552 = vpow2.f32 %v2432_v19 }
0x1e26   :  { %v2551_v18 = vpop.eup %2550 }
0x1e27   :  { %1992 = vrot.lane.b32.xlu1 %v2551_v18, %s2611_s12 }
0x1e28   :  { %v2553_v27 = vpop.eup %2552 }
0x1e29   :  { %v1973_v16 = vadd.f32 1.0, %v2553_v27 }
0x1e2b   :  { %2554 = vrcp.f32 %v1973_v16  ;;  %v1985_v24 = vand.u32 2147483648, %v1973_v16  ;;  %vm1979_vm9 = vweird.f32 %v1973_v16  ;;  %v1983_v25 = vand.u32 2147483647, %v1973_v16 }
0x1e2d   :  { %v1986_v28 = vor.u32 1.1754944e-38, %v1985_v24  ;;  %vm1984_vm12 = vcmp.eq.f32.partialorder %v1983_v25, 8.507059e+37 }
0x1e31   :  { %v2555_v50 = vpop.eup %2554 }
0x1e32   :  { %v1975_v20 = vmul.f32 %v2555_v50, %v1973_v16  ;;  %vm1980_vm8 = vweird.f32 %v2555_v50 }
0x1e33   :  { %vm1981_vm11 = vmor %vm1979_vm9, %vm1980_vm8 }
0x1e34   :  { %v1976_v21 = vsub.f32 1.0, %v1975_v20 }
0x1e36   :  { %v1977_v54 = vmul.f32 %v2555_v50, %v1976_v21 }
0x1e38   :  { %v1978_v23 = vadd.f32 %v2555_v50, %v1977_v54 }
0x1e3a   :  { %v1982_v26 = vsel %vm1981_vm11, %v2555_v50, %v1978_v23  ;;  %vm2325_vm11 = vcmask 261126  }
0x1e3b   :  { %v1987_v29 = vsel %vm1984_vm12, %v1986_v28, %v1982_v26 }
0x1e3c   :  { %v1990_v44 = vmul.f32 %v1987_v29, %v1904_v63 }
0x1e99   :  { %v1993_v3 = vpop.permute.xlu1 %1992 }
0x1e9a   :  { %v1995_v41 = vmul.f32 %v1993_v3, %v1987_v29 }
0x1e9c   :  { %1997 = vrot.lane.b32.xlu2 %v1995_v41, %s2612_s6 }
0x1ef6   :  { %v1998_v47 = vpop.permute.xlu2 %1997 }
0x1ef7   :  { %v2000_v34 = vadd.f32 %v1998_v47, %v1990_v44 }
0x1ef9   :  { %2556 = vtanh.f32 %v2000_v34 }
0x1eff   :  { %v2557_v30 = vpop.eup %2556 }
0x1f00   :  { %2003 = vrot.lane.b32.xlu0 %v2557_v30, %s2610_s22 }
0x1f08   :  { %2008 = vrot.lane.b32.xlu0 %v1615_v1, %s2609_s8 }
0x1f72   :  { %v2004_v35 = vpop.permute.xlu0 %2003 }
0x1f73   :  { %v3267_v32 = vmul.f32 %v2004_v35, %v1987_v29 }
0x1f75   :  { %2013 = vrot.lane.b32.xlu2 %v3267_v32, %s2613_s23  ;;  %v2037_v33 = vrot.slane %v3267_v32, 2 }
0x1f77   :  { %2038 = vrot.lane.b32.xlu1 %v2037_v33, %s2613_s23 }
0x1f7a   :  { %v2009_v43 = vpop.permute.xlu0 %2008 }
0x1f7b   :  { %v2011_v46 = vsel %vm176_vm3, %v1617_v14, %v2009_v43 }
0x1fcf   :  { %v2014_v37 = vpop.permute.xlu2 %2013 }
0x1fd0   :  { %2433 = vmatmul.msk.f32.vlgmr.msrb.gmra.mxu2 %vm586_vm5, %v2014_v37 }
0x1fe9   :  { %v2039_v40 = vpop.permute.xlu1 %2038 }
0x1fea   :  { %2434 = vmatmul.msk.f32.vlgmr.msrb.gmra.mxu3 %vm586_vm5, %v2039_v40 }
0x2053   :  { %v2034_v1 = vpop.f32.mrf.mxu2 }
0x206d   :  { %v2059_v31 = vpop.f32.mrf.mxu3 }
0x206e   :  { %v2063_v42 = vrot.slane %v2059_v31, 6 }
0x2070   :  { %v2065_v53 = vsel %vm176_vm3, %v2034_v1, %v2063_v42 }
0x2071   :  { %v2066_v48 = vadd.f32 %v2065_v53, %v2011_v46 }
0x2073   :  { %2558 = vtanh.f32 %v2066_v48  ;;  %v2435_v52 = vmul.f32 -1.442695, %v2066_v48 }
0x2075   :  { %2560 = vpow2.f32 %v2435_v52 }
0x2079   :  { %v2559_v51 = vpop.eup %2558 }
0x207a   :  { %2089 = vrot.lane.b32.xlu1 %v2559_v51, %s2611_s12 }
0x207b   :  { %v2561_v56 = vpop.eup %2560 }
0x207c   :  { %v2070_v55 = vadd.f32 1.0, %v2561_v56 }
0x207e   :  { %2562 = vrcp.f32 %v2070_v55  ;;  %v2082_v2 = vand.u32 2147483648, %v2070_v55  ;;  %vm2076_vm14 = vweird.f32 %v2070_v55  ;;  %v2080_v14 = vand.u32 2147483647, %v2070_v55 }
0x2080   :  { %v2083_v5 = vor.u32 1.1754944e-38, %v2082_v2  ;;  %vm2081_vm2 = vcmp.eq.f32.partialorder %v2080_v14, 8.507059e+37 }
0x2084   :  { %v2563_v58 = vpop.eup %2562 }
0x2085   :  { %v2072_v59 = vmul.f32 %v2563_v58, %v2070_v55  ;;  %vm2077_vm13 = vweird.f32 %v2563_v58 }
0x2086   :  { %vm2078_vm15 = vmor %vm2076_vm14, %vm2077_vm13 }
0x2087   :  { %v2073_v62 = vsub.f32 1.0, %v2072_v59 }
0x2089   :  { %v2074_v63 = vmul.f32 %v2563_v58, %v2073_v62 }
0x208b   :  { %v2075_v0 = vadd.f32 %v2563_v58, %v2074_v63 }
0x208d   :  { %v2079_v4 = vsel %vm2078_vm15, %v2563_v58, %v2075_v0 }
0x208e   :  { %v2084_v61 = vsel %vm2081_vm2, %v2083_v5, %v2079_v4 }
0x208f   :  { %v2087_v8 = vmul.f32 %v2084_v61, %v2000_v34 }
0x20ec   :  { %v2090_v6 = vpop.permute.xlu1 %2089 }
0x20ed   :  { %v2092_v7 = vmul.f32 %v2090_v6, %v2084_v61 }
0x20ef   :  { %2094 = vrot.lane.b32.xlu2 %v2092_v7, %s2612_s6 }
0x2149   :  { %v2095_v10 = vpop.permute.xlu2 %2094 }
0x214a   :  { %v2097_v60 = vadd.f32 %v2095_v10, %v2087_v8 }
0x214c   :  { %2564 = vtanh.f32 %v2097_v60 }
0x2152   :  { %v2565_v11 = vpop.eup %2564 }
0x2153   :  { %2100 = vrot.lane.b32.xlu0 %v2565_v11, %s2610_s22 }
0x215b   :  { %2105 = vrot.lane.b32.xlu0 %v3164_v36, %s2609_s8 }
0x21c5   :  { %v2101_v12 = vpop.permute.xlu0 %2100 }
0x21c6   :  { %v2103_v57 = vmul.f32 %v2101_v12, %v2084_v61 }
0x21c8   :  { %2110 = vrot.lane.b32.xlu2 %v2103_v57, %s2613_s23  ;;  %v2134_v13 = vrot.slane %v2103_v57, 2  ;;  %v2298_v31 = vrot.slane %v2103_v57, 6 }
0x21ca   :  { %2135 = vrot.lane.b32.xlu1 %v2134_v13, %s2613_s23  ;;  %v2305_v48 = vsel %vm176_vm3, %v3267_v32, %v2298_v31 }
0x21cd   :  { %v2106_v49 = vpop.permute.xlu0 %2105 }
0x21ce   :  { %v2108_v16 = vsel %vm176_vm3, %v1525_v39, %v2106_v49 }
0x2222   :  { %v2111_v17 = vpop.permute.xlu2 %2110 }
0x2223   :  { %2436 = vmatmul.msk.f32.vlgmr.msrb.gmra.mxu0 %vm586_vm5, %v2111_v17 }
0x223c   :  { %v2136_v15 = vpop.permute.xlu1 %2135 }
0x223d   :  { %2437 = vmatmul.msk.f32.vlgmr.msrb.gmra.mxu1 %vm586_vm5, %v2136_v15 }
0x22a0   :  { %v2131_v27 = vpop.f32.mrf.mxu0 }
0x22ba   :  { %v2156_v18 = vpop.f32.mrf.mxu1 }
0x22bb   :  { %v2160_v19 = vrot.slane %v2156_v18, 6 }
0x22bd   :  { %v2162_v50 = vsel %vm176_vm3, %v2131_v27, %v2160_v19 }
0x22be   :  { %v2163_v20 = vadd.f32 %v2162_v50, %v2108_v16 }
0x22c0   :  { %2566 = vtanh.f32 %v2163_v20  ;;  %v2438_v54 = vmul.f32 -1.442695, %v2163_v20 }
0x22c2   :  { %2568 = vpow2.f32 %v2438_v54 }
0x22c6   :  { %v2567_v21 = vpop.eup %2566 }
0x22c7   :  { %2186 = vrot.lane.b32.xlu1 %v2567_v21, %s2611_s12 }
0x22c8   :  { %v2569_v23 = vpop.eup %2568 }
0x22c9   :  { %v2167_v24 = vadd.f32 1.0, %v2569_v23 }
0x22cb   :  { %2570 = vrcp.f32 %v2167_v24  ;;  %v2179_v41 = vand.u32 2147483648, %v2167_v24  ;;  %vm2173_vm4 = vweird.f32 %v2167_v24  ;;  %v2177_v39 = vand.u32 2147483647, %v2167_v24 }
0x22cd   :  { %v2180_v47 = vor.u32 1.1754944e-38, %v2179_v41  ;;  %vm2178_vm7 = vcmp.eq.f32.partialorder %v2177_v39, 8.507059e+37 }
0x22d1   :  { %v2571_v25 = vpop.eup %2570 }
0x22d2   :  { %v2169_v26 = vmul.f32 %v2571_v25, %v2167_v24  ;;  %vm2174_vm10 = vweird.f32 %v2571_v25 }
0x22d3   :  { %vm2175_vm6 = vmor %vm2173_vm4, %vm2174_vm10 }
0x22d4   :  { %v2170_v28 = vsub.f32 1.0, %v2169_v26 }
0x22d6   :  { %v2171_v3 = vmul.f32 %v2571_v25, %v2170_v28 }
0x22d8   :  { %v2172_v29 = vadd.f32 %v2571_v25, %v2171_v3 }
0x22da   :  { %v2176_v44 = vsel %vm2175_vm6, %v2571_v25, %v2172_v29 }
0x22db   :  { %v2181_v30 = vsel %vm2178_vm7, %v2180_v47, %v2176_v44 }
0x22dc   :  { %v2184_v33 = vmul.f32 %v2181_v30, %v2097_v60 }
0x2339   :  { %v2187_v34 = vpop.permute.xlu1 %2186 }
0x233a   :  { %v2189_v35 = vmul.f32 %v2187_v34, %v2181_v30 }
0x233c   :  { %2191 = vrot.lane.b32.xlu2 %v2189_v35, %s2612_s6 }
0x2396   :  { %v2192_v37 = vpop.permute.xlu2 %2191 }
0x2397   :  { %v2194_v40 = vadd.f32 %v2192_v37, %v2184_v33 }
0x2399   :  { %2572 = vtanh.f32 %v2194_v40 }
0x239f   :  { %v2573_v43 = vpop.eup %2572 }
0x23a0   :  { %2197 = vrot.lane.b32.xlu0 %v2573_v43, %s2610_s22 }
0x23a8   :  { %2202 = vrot.lane.b32.xlu0 %v1812_v38, %s2609_s8  ;;  %s2614_s8 = smov [#allocation2]  }
0x23a9   :  { %s2332_s24 = sshll.u32 %s2614_s8, 4  ;;  %s2333_s24 = int_to_ptr.vmem [resolvable:$true] %s2332_s24 }
0x2412   :  { %v2198_v42 = vpop.permute.xlu0 %2197 }
0x2413   :  { %v2200_v1 = vmul.f32 %v2198_v42, %v2181_v30 }
0x2415   :  { %v2300_v46 = vrot.slane %v2200_v1, 4  ;;  %2207 = vrot.lane.b32.xlu2 %v2200_v1, %s2613_s23  ;;  %v2231_v53 = vrot.slane %v2200_v1, 2 }
0x2417   :  { %2232 = vrot.lane.b32.xlu1 %v2231_v53, %s2613_s23  ;;  %v2306_v51 = vsel %vm78_vm0, %v2305_v48, %v2300_v46 }
0x241a   :  { %v2203_v36 = vpop.permute.xlu0 %2202 }
0x241b   :  { %v2205_v59 = vsel %vm176_vm3, %v1814_v22, %v2203_v36 }
0x246f   :  { %v2208_v52 = vpop.permute.xlu2 %2207 }
0x2470   :  { %2439 = vmatmul.msk.f32.vlgmr.msra.gmra.mxu2 %vm586_vm5, %v2208_v52 }
0x2489   :  { %v2233_v56 = vpop.permute.xlu1 %2232 }
0x248a   :  { %2440 = vmatmul.msk.f32.vlgmr.msra.gmra.mxu3 %vm586_vm5, %v2233_v56 }
0x24f3   :  { %v2228_v58 = vpop.f32.mrf.mxu2 }
0x250d   :  { %v2253_v38 = vpop.f32.mrf.mxu3 }
0x250e   :  { %v2257_v55 = vrot.slane %v2253_v38, 6 }
0x2510   :  { %v2259_v32 = vsel %vm176_vm3, %v2228_v58, %v2257_v55 }
0x2511   :  { %v2260_v62 = vadd.f32 %v2259_v32, %v2205_v59 }
0x2513   :  { %2574 = vtanh.f32 %v2260_v62  ;;  %v2441_v0 = vmul.f32 -1.442695, %v2260_v62 }
0x2515   :  { %2576 = vpow2.f32 %v2441_v0 }
0x2519   :  { %v2575_v63 = vpop.eup %2574 }
0x251a   :  { %2283 = vrot.lane.b32.xlu1 %v2575_v63, %s2611_s12 }
0x251b   :  { %v2577_v2 = vpop.eup %2576 }
0x251c   :  { %v2264_v14 = vadd.f32 1.0, %v2577_v2 }
0x251e   :  { %2578 = vrcp.f32 %v2264_v14  ;;  %v2276_v45 = vand.u32 2147483648, %v2264_v14  ;;  %vm2270_vm8 = vweird.f32 %v2264_v14  ;;  %v2274_v22 = vand.u32 2147483647, %v2264_v14 }
0x2520   :  { %v2277_v10 = vor.u32 1.1754944e-38, %v2276_v45  ;;  %vm2275_vm9 = vcmp.eq.f32.partialorder %v2274_v22, 8.507059e+37 }
0x2524   :  { %v2579_v4 = vpop.eup %2578 }
0x2525   :  { %v2266_v5 = vmul.f32 %v2579_v4, %v2264_v14  ;;  %vm2271_vm0 = vweird.f32 %v2579_v4 }
0x2526   :  { %vm2272_vm3 = vmor %vm2270_vm8, %vm2271_vm0 }
0x2527   :  { %v2267_v6 = vsub.f32 1.0, %v2266_v5 }
0x2529   :  { %v2268_v61 = vmul.f32 %v2579_v4, %v2267_v6 }
0x252b   :  { %v2269_v7 = vadd.f32 %v2579_v4, %v2268_v61 }
0x252d   :  { %v2273_v8 = vsel %vm2272_vm3, %v2579_v4, %v2269_v7 }
0x252e   :  { %v2278_v11 = vsel %vm2275_vm9, %v2277_v10, %v2273_v8 }
0x252f   :  { %v2281_v57 = vmul.f32 %v2278_v11, %v2194_v40 }
0x258c   :  { %v2284_v60 = vpop.permute.xlu1 %2283 }
0x258d   :  { %v2286_v12 = vmul.f32 %v2284_v60, %v2278_v11 }
0x258f   :  { %2288 = vrot.lane.b32.xlu2 %v2286_v12, %s2612_s6 }
0x2597   :  { %2321 = vrot.lane.b32.xlu2 %v3254_v9, %s2611_s12 }
0x25e9   :  { %v2289_v13 = vpop.permute.xlu2 %2288 }
0x25ea   :  { %v2291_v17 = vadd.f32 %v2289_v13, %v2281_v57 }
0x25ec   :  { %2580 = vtanh.f32 %v2291_v17 }
0x25f1   :  { %v2322_v9 = vpop.permute.xlu2 %2321 }
0x25f2   :  { %v2581_v15 = vpop.eup %2580 }
0x25f3   :  { %2294 = vrot.lane.b32.xlu0 %v2581_v15, %s2610_s22 }
0x2665   :  { %v2295_v49 = vpop.permute.xlu0 %2294 }
0x2666   :  { %v2297_v18 = vmul.f32 %v2295_v49, %v2278_v11 }
0x2668   :  { %v2303_v19 = vrot.slane %v2297_v18, 2 }
0x266a   :  { %v2307_v27 = vsel %vm55_vm1, %v2306_v51, %v2303_v19 }
0x266b   :  { %2317 = vrot.lane.b32.xlu1 %v2307_v27, %s2613_s23 }
0x26dd   :  { %v2318_v16 = vpop.permute.xlu1 %2317 }
0x26de   :  { %v2324_v50 = vsel %vm586_vm5, %v2318_v16, %v2322_v9 }
0x26df   :  { %2326 = vst.msk [vmem:[#allocation2 - $0x6] sm:$0xc0] %vm2325_vm11, %v2324_v50 }
0x26e0   :  { %2337 = dma.vmem_to_hbm [thread:$0]  %s2333_s24, 32, %s2335_s27, [#allocation3]  }
0x26e1   :  { %2606 = dma.done.wait [#allocation3], 32  }
0x26e2   :  { %2607 = vsyncadd [#allocation3], 4294967264 }
0x26e3   :  { %2342 = vsyncpa [#allocation3], 1 }

</bundles_post_ra>
